<compile_context>
chip_gen: v7x
topology: tpu7x:2x2x1
jax: 0.10.0
libtpu: 0.0.40
codegen_flags: <defaults>
</compile_context>

<pallas_src>
import functools

import jax
import jax.numpy as jnp
import numpy as np
from jax.experimental import pallas as pl
from jax.experimental.pallas import tpu as pltpu


def _round_up(x, m):
    return ((x + m - 1) // m) * m


# ----------------------------- Pallas kernel ------------------------------- #
def _cbr_kernel(x_ref, w_ref, b_ref, o_ref, *, db, cpad, wq, lacc):
    """One grid step = one (n, do-block): `db` output depth slices.

    x_ref: (1, 1, DS*4*Cpad, Lext) bf16  parity-split input window; row index
                                         = d*(4*Cpad) + (2*ph+pw)*Cpad + c,
                                         lane = jh*Wq + jw (zero-padded to Lext).
    w_ref: (4, Cout, 3*4*Cpad)     bf16  BN-folded weights, one matrix per lane
                                         shift group; row = kd*4*Cpad + p*Cpad + c.
    b_ref: (Cout, 1)               f32   BN shift (bias).
    o_ref: (1, Cout, db*Lacc)      f32   output block, lane-dense.
    """
    cout = o_ref.shape[1]
    rows2 = 2 * 4 * cpad                     # rows spanning two depth slabs
    rows3 = 3 * 4 * cpad                     # rows of one 3-slab conv window
    shifts = (0, 1, wq, wq + 1)              # the 4 distinct (kh//2, kw//2) lane shifts

    for j in range(db):                      # static unroll over output depths
        r0 = j * rows2                       # window for output depth j: slabs 2j..2j+2
        xs = x_ref[0, 0, r0:r0 + rows3, :]   # (rows3, Lext) bf16
        acc = jnp.zeros((cout, lacc), jnp.float32)
        for g, s in enumerate(shifts):       # 4 grouped bf16xbf16 MXU pushes, K=rows3
            acc = acc + jnp.dot(w_ref[g], xs[:, s:s + lacc],
                                preferred_element_type=jnp.float32)
        # bias (BN shift) + ReLU epilogue, aligned lane-dense f32 store.
        o_ref[0, :, j * lacc:(j + 1) * lacc] = jnp.maximum(acc + b_ref[...], 0.0)


# ------------------------------- wrapper ------------------------------------ #
@jax.jit
def downsampler_a(x_ncdhw, conv_w, gamma, beta, run_mean, run_var, eps=1e-3):
    """Forward of DownSamplerA.  x: (N, Cin, D, H, W), conv_w: (Cout, Cin, 3,3,3)."""
    N, Cin, D, H, W = x_ncdhw.shape
    Cout = conv_w.shape[0]
    Do, Ho, Wo = (D + 1) // 2, (H + 1) // 2, (W + 1) // 2
    Hq, Wq = Ho + 1, Wo + 1                 # per-parity H/W extents (incl. halo)
    Lhw = Hq * Wq                           # flattened (parity) H*W frame
    Lacc = _round_up(Lhw, 128)              # lane-dense output width
    Lext = Lacc + Wq + 1                    # input slab width (room for tap shifts);
                                            # block last dim == full dim, so any size ok
    Cpad = _round_up(Cin, 8)                # sublane-aligned channel dim

    # Output depths per grid step: bounded by a small VMEM budget and unroll cap.
    slab_bytes = 4 * Cpad * Lext * 2        # one bf16 depth slab
    DB = max(1, min(Do, 16, ((6 << 20) // slab_bytes - 1) // 2))
    nblk = -(-Do // DB)                     # cdiv
    DS = 2 * DB + 1                         # depth slabs per window
    Do_pad = nblk * DB
    Dp_full = 2 * Do_pad + 1                # padded depth slices materialized

    # --- BatchNorm folded into the conv (running-stats / eval semantics) -----
    # TODO(synk): PyTorch BatchNorm3d in training mode uses batch statistics;
    # inference (running-stats) semantics are implemented here. eps=1e-3 matches
    # the module's BatchNorm3d(eps=0.001).
    scale = gamma / jnp.sqrt(run_var + eps)          # (Cout,)
    shift = beta - run_mean * scale                  # (Cout,)

    # weights -> (4 shift-groups, Cout, 3*4*Cpad), BN scale folded, bf16 MXU feed.
    w_fold = conv_w * scale[:, None, None, None, None]             # (Cout, Cin, 3,3,3)
    w5 = jnp.transpose(w_fold, (2, 3, 4, 0, 1))                    # (kd, kh, kw, Cout, Cin)
    w5 = jnp.pad(w5, ((0, 0), (0, 1), (0, 1), (0, 0), (0, Cpad - Cin)))  # kh,kw -> 4 (pad row is 0)
    w5 = w5.reshape(3, 2, 2, 2, 2, Cout, Cpad)                     # (kd, gh, ph, gw, pw, Cout, C)
    w5 = jnp.transpose(w5, (1, 3, 5, 0, 2, 4, 6))                  # (gh, gw, Cout, kd, ph, pw, C)
    w_g = w5.reshape(4, Cout, 3 * 4 * Cpad).astype(jnp.bfloat16)
    bias2d = shift.reshape(Cout, 1).astype(jnp.float32)

    # --- glue: single pad + H/W parity-split relayout pass (bf16, no im2col) --
    # xg[n, d, 2*ph+pw, c, jh*Wq+jw] = xpad[n, c, d, 2*jh+ph, 2*jw+pw]
    xb = x_ncdhw.astype(jnp.bfloat16)
    xp = jnp.pad(xb, ((0, 0), (0, 0),
                      (1, Dp_full - D - 1), (1, 2 * Hq - H - 1), (1, 2 * Wq - W - 1)))
    xg = xp.reshape(N, Cin, Dp_full, Hq, 2, Wq, 2)
    xg = jnp.transpose(xg, (0, 2, 4, 6, 1, 3, 5))                  # (N, Dp, ph, pw, Cin, Hq, Wq)
    xg = xg.reshape(N, Dp_full, 4, Cin, Lhw)
    xg = jnp.pad(xg, ((0, 0), (0, 0), (0, 0), (0, Cpad - Cin), (0, Lext - Lhw)))
    if nblk == 1:
        xw = xg.reshape(N, 1, DS * 4 * Cpad, Lext)
    else:
        # Overlapping depth windows: only the boundary slab is duplicated per block.
        idx = (jnp.arange(nblk)[:, None] * (2 * DB) + jnp.arange(DS)[None, :]).reshape(-1)
        xw = jnp.take(xg, idx, axis=1).reshape(N, nblk, DS * 4 * Cpad, Lext)

    kernel = functools.partial(_cbr_kernel, db=DB, cpad=Cpad, wq=Wq, lacc=Lacc)
    out_flat = pl.pallas_call(
        kernel,
        out_shape=jax.ShapeDtypeStruct((N, Cout, Do_pad * Lacc), jnp.float32),
        grid_spec=pltpu.PrefetchScalarGridSpec(
            num_scalar_prefetch=0,
            grid=(N, nblk),
            in_specs=[
                pl.BlockSpec((1, 1, DS * 4 * Cpad, Lext), lambda n, b: (n, b, 0, 0)),
                pl.BlockSpec((4, Cout, 3 * 4 * Cpad), lambda n, b: (0, 0, 0)),   # resident
                pl.BlockSpec((Cout, 1), lambda n, b: (0, 0)),                    # resident
            ],
            out_specs=pl.BlockSpec((1, Cout, DB * Lacc), lambda n, b: (n, 0, b)),
        ),
        compiler_params=pltpu.CompilerParams(
            dimension_semantics=("parallel", "parallel")),
    )(xw, w_g, bias2d)

    # (N, Cout, Do_pad*Lacc) -> (N, Cout, Do, Ho, Wo): crop/reshape only, no transpose.
    out = out_flat.reshape(N, Cout, Do_pad, Lacc)[:, :, :Do, :Lhw]
    out = out.reshape(N, Cout, Do, Hq, Wq)[:, :, :, :Ho, :Wo]
    return out


# ------------------------------- reference ---------------------------------- #
def downsampler_a_reference(x, conv_w, gamma, beta, run_mean, run_var, eps=1e-3):
    y = jax.lax.conv_general_dilated(
        x, conv_w, window_strides=(2, 2, 2),
        padding=((1, 1), (1, 1), (1, 1)),
        dimension_numbers=("NCDHW", "OIDHW", "NCDHW"),
        precision=jax.lax.Precision.HIGHEST)
    scale = gamma / jnp.sqrt(run_var + eps)
    shift = beta - run_mean * scale
    y = y * scale.reshape(1, -1, 1, 1, 1) + shift.reshape(1, -1, 1, 1, 1)
    return jnp.maximum(y, 0.0)


# --------------------------------- main -------------------------------------- #
if __name__ == "__main__":
    key = jax.random.PRNGKey(0)
    k_x, k_w, k_g, k_b, k_m, k_v = jax.random.split(key, 6)

    N, Cin, Cout = 2, 4, 16
    D = H = W = 16

    x = jax.random.normal(k_x, (N, Cin, D, H, W), dtype=jnp.float32)
    # Conv3d(nIn=4, nOut=16, kSize=3, stride=2, padding=1, bias=False)
    conv_w = jax.random.normal(k_w, (Cout, Cin, 3, 3, 3), dtype=jnp.float32) * 0.1
    gamma = jax.random.uniform(k_g, (Cout,), minval=0.5, maxval=1.5, dtype=jnp.float32)
    beta = jax.random.normal(k_b, (Cout,), dtype=jnp.float32) * 0.1
    run_mean = jax.random.normal(k_m, (Cout,), dtype=jnp.float32) * 0.1
    run_var = jax.random.uniform(k_v, (Cout,), minval=0.5, maxval=1.5, dtype=jnp.float32)

    out = jax.block_until_ready(downsampler_a(x, conv_w, gamma, beta, run_mean, run_var))
    ref = jax.block_until_ready(downsampler_a_reference(x, conv_w, gamma, beta, run_mean, run_var))

    assert out.shape == (N, Cout, (D + 1) // 2, (H + 1) // 2, (W + 1) // 2), out.shape
    # bf16 streamed input + bf16 folded weights (f32 accumulation) -> loosened tolerance.
    np.testing.assert_allclose(np.asarray(out), np.asarray(ref), rtol=3e-2, atol=3e-2)

    print("KERNEL_OK")
</pallas_src>

<mosaic_0001>
module attributes {stable_mosaic.version = 11 : i64} {
  func.func @_cbr_kernel(%arg0: i32, %arg1: i32, %arg2: memref<1x1x544x138xbf16, #tpu.memory_space<vmem>>, %arg3: memref<4x16x96xbf16, #tpu.memory_space<vmem>>, %arg4: memref<16x1xf32, #tpu.memory_space<vmem>>, %arg5: memref<1x16x1024xf32, #tpu.memory_space<vmem>>) attributes {dimension_semantics = [#tpu.dimension_semantics<parallel>, #tpu.dimension_semantics<parallel>], iteration_bounds = array<i64: 2, 1>, scalar_prefetch = 0 : i64, scratch_operands = 0 : i64, tpu.core_type = #tpu.core_type<tc>, window_params = [{transform_indices = @transform_0, window_bounds = array<i64: 1, 1, 544, 138>}, {pipeline_mode = #tpu.pipeline_mode<synchronous>, transform_indices = @transform_1, window_bounds = array<i64: 4, 16, 96>}, {pipeline_mode = #tpu.pipeline_mode<synchronous>, transform_indices = @transform_2, window_bounds = array<i64: 16, 1>}, {transform_indices = @transform_3, window_bounds = array<i64: 1, 16, 1024>}]} {
    %c0 = arith.constant 0 : index
    %c0_0 = arith.constant 0 : index
    %c0_1 = arith.constant 0 : index
    %c0_2 = arith.constant 0 : index
    %0 = vector.load %arg2[%c0, %c0_0, %c0_1, %c0_2] : memref<1x1x544x138xbf16, #tpu.memory_space<vmem>>, vector<1x1x96x138xbf16>
    %1 = vector.shape_cast %0 : vector<1x1x96x138xbf16> to vector<96x138xbf16>
    %cst = arith.constant 0.000000e+00 : f32
    %2 = vector.broadcast %cst : f32 to vector<16x128xf32>
    %c0_3 = arith.constant 0 : index
    %c0_4 = arith.constant 0 : index
    %c0_5 = arith.constant 0 : index
    %3 = vector.load %arg3[%c0_3, %c0_4, %c0_5] : memref<4x16x96xbf16, #tpu.memory_space<vmem>>, vector<1x16x96xbf16>
    %4 = vector.shape_cast %3 : vector<1x16x96xbf16> to vector<16x96xbf16>
    %5 = vector.extract_strided_slice %1 {offsets = [0, 0], sizes = [96, 128], strides = [1, 1]} : vector<96x138xbf16> to vector<96x128xbf16>
    %cst_6 = arith.constant dense<0.000000e+00> : vector<16x128xf32>
    %6 = tpu.matmul %4, %5, %cst_6 {dimension_numbers = #tpu.dot_dimension_numbers<[1], [0], [0], [1], [0, 0, 1, 1], [], []>} : vector<16x96xbf16>, vector<96x128xbf16>, vector<16x128xf32> -> vector<16x128xf32>
    %7 = arith.addf %2, %6 : vector<16x128xf32>
    %c1 = arith.constant 1 : index
    %c0_7 = arith.constant 0 : index
    %c0_8 = arith.constant 0 : index
    %8 = vector.load %arg3[%c1, %c0_7, %c0_8] : memref<4x16x96xbf16, #tpu.memory_space<vmem>>, vector<1x16x96xbf16>
    %9 = vector.shape_cast %8 : vector<1x16x96xbf16> to vector<16x96xbf16>
    %10 = vector.extract_strided_slice %1 {offsets = [0, 1], sizes = [96, 128], strides = [1, 1]} : vector<96x138xbf16> to vector<96x128xbf16>
    %cst_9 = arith.constant dense<0.000000e+00> : vector<16x128xf32>
    %11 = tpu.matmul %9, %10, %cst_9 {dimension_numbers = #tpu.dot_dimension_numbers<[1], [0], [0], [1], [0, 0, 1, 1], [], []>} : vector<16x96xbf16>, vector<96x128xbf16>, vector<16x128xf32> -> vector<16x128xf32>
    %12 = arith.addf %7, %11 : vector<16x128xf32>
    %c2 = arith.constant 2 : index
    %c0_10 = arith.constant 0 : index
    %c0_11 = arith.constant 0 : index
    %13 = vector.load %arg3[%c2, %c0_10, %c0_11] : memref<4x16x96xbf16, #tpu.memory_space<vmem>>, vector<1x16x96xbf16>
    %14 = vector.shape_cast %13 : vector<1x16x96xbf16> to vector<16x96xbf16>
    %15 = vector.extract_strided_slice %1 {offsets = [0, 9], sizes = [96, 128], strides = [1, 1]} : vector<96x138xbf16> to vector<96x128xbf16>
    %cst_12 = arith.constant dense<0.000000e+00> : vector<16x128xf32>
    %16 = tpu.matmul %14, %15, %cst_12 {dimension_numbers = #tpu.dot_dimension_numbers<[1], [0], [0], [1], [0, 0, 1, 1], [], []>} : vector<16x96xbf16>, vector<96x128xbf16>, vector<16x128xf32> -> vector<16x128xf32>
    %17 = arith.addf %12, %16 : vector<16x128xf32>
    %c3 = arith.constant 3 : index
    %c0_13 = arith.constant 0 : index
    %c0_14 = arith.constant 0 : index
    %18 = vector.load %arg3[%c3, %c0_13, %c0_14] : memref<4x16x96xbf16, #tpu.memory_space<vmem>>, vector<1x16x96xbf16>
    %19 = vector.shape_cast %18 : vector<1x16x96xbf16> to vector<16x96xbf16>
    %20 = vector.extract_strided_slice %1 {offsets = [0, 10], sizes = [96, 128], strides = [1, 1]} : vector<96x138xbf16> to vector<96x128xbf16>
    %cst_15 = arith.constant dense<0.000000e+00> : vector<16x128xf32>
    %21 = tpu.matmul %19, %20, %cst_15 {dimension_numbers = #tpu.dot_dimension_numbers<[1], [0], [0], [1], [0, 0, 1, 1], [], []>} : vector<16x96xbf16>, vector<96x128xbf16>, vector<16x128xf32> -> vector<16x128xf32>
    %22 = arith.addf %17, %21 : vector<16x128xf32>
    %c0_16 = arith.constant 0 : index
    %c0_17 = arith.constant 0 : index
    %23 = vector.load %arg4[%c0_16, %c0_17] : memref<16x1xf32, #tpu.memory_space<vmem>>, vector<16x1xf32>
    %24 = vector.broadcast %23 : vector<16x1xf32> to vector<16x128xf32>
    %25 = arith.addf %22, %24 : vector<16x128xf32>
    %cst_18 = arith.constant 0.000000e+00 : f32
    %26 = vector.broadcast %cst_18 : f32 to vector<16x128xf32>
    %27 = arith.maximumf %25, %26 : vector<16x128xf32>
    %c0_19 = arith.constant 0 : index
    %c0_20 = arith.constant 0 : index
    %c0_21 = arith.constant 0 : index
    %28 = vector.load %arg5[%c0_19, %c0_20, %c0_21] : memref<1x16x1024xf32, #tpu.memory_space<vmem>>, vector<1x16x128xf32>
    %29 = vector.shape_cast %28 : vector<1x16x128xf32> to vector<16x128xf32>
    %30 = vector.shape_cast %27 : vector<16x128xf32> to vector<1x16x128xf32>
    tpu.vector_store %arg5[%c0_19, %c0_20, %c0_21], %30 {strides = array<i32>} : memref<1x16x1024xf32, #tpu.memory_space<vmem>>, vector<1x16x128xf32>,
    %c0_22 = arith.constant 0 : index
    %c0_23 = arith.constant 0 : index
    %c64 = arith.constant 64 : index
    %c0_24 = arith.constant 0 : index
    %31 = vector.load %arg2[%c0_22, %c0_23, %c64, %c0_24] : memref<1x1x544x138xbf16, #tpu.memory_space<vmem>>, vector<1x1x96x138xbf16>
    %32 = vector.shape_cast %31 : vector<1x1x96x138xbf16> to vector<96x138xbf16>
    %cst_25 = arith.constant 0.000000e+00 : f32
    %33 = vector.broadcast %cst_25 : f32 to vector<16x128xf32>
    %c0_26 = arith.constant 0 : index
    %c0_27 = arith.constant 0 : index
    %c0_28 = arith.constant 0 : index
    %34 = vector.load %arg3[%c0_26, %c0_27, %c0_28] : memref<4x16x96xbf16, #tpu.memory_space<vmem>>, vector<1x16x96xbf16>
    %35 = vector.shape_cast %34 : vector<1x16x96xbf16> to vector<16x96xbf16>
    %36 = vector.extract_strided_slice %32 {offsets = [0, 0], sizes = [96, 128], strides = [1, 1]} : vector<96x138xbf16> to vector<96x128xbf16>
    %cst_29 = arith.constant dense<0.000000e+00> : vector<16x128xf32>
    %37 = tpu.matmul %35, %36, %cst_29 {dimension_numbers = #tpu.dot_dimension_numbers<[1], [0], [0], [1], [0, 0, 1, 1], [], []>} : vector<16x96xbf16>, vector<96x128xbf16>, vector<16x128xf32> -> vector<16x128xf32>
    %38 = arith.addf %33, %37 : vector<16x128xf32>
    %c1_30 = arith.constant 1 : index
    %c0_31 = arith.constant 0 : index
    %c0_32 = arith.constant 0 : index
    %39 = vector.load %arg3[%c1_30, %c0_31, %c0_32] : memref<4x16x96xbf16, #tpu.memory_space<vmem>>, vector<1x16x96xbf16>
    %40 = vector.shape_cast %39 : vector<1x16x96xbf16> to vector<16x96xbf16>
    %41 = vector.extract_strided_slice %32 {offsets = [0, 1], sizes = [96, 128], strides = [1, 1]} : vector<96x138xbf16> to vector<96x128xbf16>
    %cst_33 = arith.constant dense<0.000000e+00> : vector<16x128xf32>
    %42 = tpu.matmul %40, %41, %cst_33 {dimension_numbers = #tpu.dot_dimension_numbers<[1], [0], [0], [1], [0, 0, 1, 1], [], []>} : vector<16x96xbf16>, vector<96x128xbf16>, vector<16x128xf32> -> vector<16x128xf32>
    %43 = arith.addf %38, %42 : vector<16x128xf32>
    %c2_34 = arith.constant 2 : index
    %c0_35 = arith.constant 0 : index
    %c0_36 = arith.constant 0 : index
    %44 = vector.load %arg3[%c2_34, %c0_35, %c0_36] : memref<4x16x96xbf16, #tpu.memory_space<vmem>>, vector<1x16x96xbf16>
    %45 = vector.shape_cast %44 : vector<1x16x96xbf16> to vector<16x96xbf16>
    %46 = vector.extract_strided_slice %32 {offsets = [0, 9], sizes = [96, 128], strides = [1, 1]} : vector<96x138xbf16> to vector<96x128xbf16>
    %cst_37 = arith.constant dense<0.000000e+00> : vector<16x128xf32>
    %47 = tpu.matmul %45, %46, %cst_37 {dimension_numbers = #tpu.dot_dimension_numbers<[1], [0], [0], [1], [0, 0, 1, 1], [], []>} : vector<16x96xbf16>, vector<96x128xbf16>, vector<16x128xf32> -> vector<16x128xf32>
    %48 = arith.addf %43, %47 : vector<16x128xf32>
    %c3_38 = arith.constant 3 : index
    %c0_39 = arith.constant 0 : index
    %c0_40 = arith.constant 0 : index
    %49 = vector.load %arg3[%c3_38, %c0_39, %c0_40] : memref<4x16x96xbf16, #tpu.memory_space<vmem>>, vector<1x16x96xbf16>
    %50 = vector.shape_cast %49 : vector<1x16x96xbf16> to vector<16x96xbf16>
    %51 = vector.extract_strided_slice %32 {offsets = [0, 10], sizes = [96, 128], strides = [1, 1]} : vector<96x138xbf16> to vector<96x128xbf16>
    %cst_41 = arith.constant dense<0.000000e+00> : vector<16x128xf32>
    %52 = tpu.matmul %50, %51, %cst_41 {dimension_numbers = #tpu.dot_dimension_numbers<[1], [0], [0], [1], [0, 0, 1, 1], [], []>} : vector<16x96xbf16>, vector<96x128xbf16>, vector<16x128xf32> -> vector<16x128xf32>
    %53 = arith.addf %48, %52 : vector<16x128xf32>
    %c0_42 = arith.constant 0 : index
    %c0_43 = arith.constant 0 : index
    %54 = vector.load %arg4[%c0_42, %c0_43] : memref<16x1xf32, #tpu.memory_space<vmem>>, vector<16x1xf32>
    %55 = vector.broadcast %54 : vector<16x1xf32> to vector<16x128xf32>
    %56 = arith.addf %53, %55 : vector<16x128xf32>
    %cst_44 = arith.constant 0.000000e+00 : f32
    %57 = vector.broadcast %cst_44 : f32 to vector<16x128xf32>
    %58 = arith.maximumf %56, %57 : vector<16x128xf32>
    %c0_45 = arith.constant 0 : index
    %c0_46 = arith.constant 0 : index
    %c128 = arith.constant 128 : index
    %59 = vector.load %arg5[%c0_45, %c0_46, %c128] : memref<1x16x1024xf32, #tpu.memory_space<vmem>>, vector<1x16x128xf32>
    %60 = vector.shape_cast %59 : vector<1x16x128xf32> to vector<16x128xf32>
    %61 = vector.shape_cast %58 : vector<16x128xf32> to vector<1x16x128xf32>
    tpu.vector_store %arg5[%c0_45, %c0_46, %c128], %61 {strides = array<i32>} : memref<1x16x1024xf32, #tpu.memory_space<vmem>>, vector<1x16x128xf32>,
    %c0_47 = arith.constant 0 : index
    %c0_48 = arith.constant 0 : index
    %c128_49 = arith.constant 128 : index
    %c0_50 = arith.constant 0 : index
    %62 = vector.load %arg2[%c0_47, %c0_48, %c128_49, %c0_50] : memref<1x1x544x138xbf16, #tpu.memory_space<vmem>>, vector<1x1x96x138xbf16>
    %63 = vector.shape_cast %62 : vector<1x1x96x138xbf16> to vector<96x138xbf16>
    %cst_51 = arith.constant 0.000000e+00 : f32
    %64 = vector.broadcast %cst_51 : f32 to vector<16x128xf32>
    %c0_52 = arith.constant 0 : index
    %c0_53 = arith.constant 0 : index
    %c0_54 = arith.constant 0 : index
    %65 = vector.load %arg3[%c0_52, %c0_53, %c0_54] : memref<4x16x96xbf16, #tpu.memory_space<vmem>>, vector<1x16x96xbf16>
    %66 = vector.shape_cast %65 : vector<1x16x96xbf16> to vector<16x96xbf16>
    %67 = vector.extract_strided_slice %63 {offsets = [0, 0], sizes = [96, 128], strides = [1, 1]} : vector<96x138xbf16> to vector<96x128xbf16>
    %cst_55 = arith.constant dense<0.000000e+00> : vector<16x128xf32>
    %68 = tpu.matmul %66, %67, %cst_55 {dimension_numbers = #tpu.dot_dimension_numbers<[1], [0], [0], [1], [0, 0, 1, 1], [], []>} : vector<16x96xbf16>, vector<96x128xbf16>, vector<16x128xf32> -> vector<16x128xf32>
    %69 = arith.addf %64, %68 : vector<16x128xf32>
    %c1_56 = arith.constant 1 : index
    %c0_57 = arith.constant 0 : index
    %c0_58 = arith.constant 0 : index
    %70 = vector.load %arg3[%c1_56, %c0_57, %c0_58] : memref<4x16x96xbf16, #tpu.memory_space<vmem>>, vector<1x16x96xbf16>
    %71 = vector.shape_cast %70 : vector<1x16x96xbf16> to vector<16x96xbf16>
    %72 = vector.extract_strided_slice %63 {offsets = [0, 1], sizes = [96, 128], strides = [1, 1]} : vector<96x138xbf16> to vector<96x128xbf16>
    %cst_59 = arith.constant dense<0.000000e+00> : vector<16x128xf32>
    %73 = tpu.matmul %71, %72, %cst_59 {dimension_numbers = #tpu.dot_dimension_numbers<[1], [0], [0], [1], [0, 0, 1, 1], [], []>} : vector<16x96xbf16>, vector<96x128xbf16>, vector<16x128xf32> -> vector<16x128xf32>
    %74 = arith.addf %69, %73 : vector<16x128xf32>
    %c2_60 = arith.constant 2 : index
    %c0_61 = arith.constant 0 : index
    %c0_62 = arith.constant 0 : index
    %75 = vector.load %arg3[%c2_60, %c0_61, %c0_62] : memref<4x16x96xbf16, #tpu.memory_space<vmem>>, vector<1x16x96xbf16>
    %76 = vector.shape_cast %75 : vector<1x16x96xbf16> to vector<16x96xbf16>
    %77 = vector.extract_strided_slice %63 {offsets = [0, 9], sizes = [96, 128], strides = [1, 1]} : vector<96x138xbf16> to vector<96x128xbf16>
    %cst_63 = arith.constant dense<0.000000e+00> : vector<16x128xf32>
    %78 = tpu.matmul %76, %77, %cst_63 {dimension_numbers = #tpu.dot_dimension_numbers<[1], [0], [0], [1], [0, 0, 1, 1], [], []>} : vector<16x96xbf16>, vector<96x128xbf16>, vector<16x128xf32> -> vector<16x128xf32>
    %79 = arith.addf %74, %78 : vector<16x128xf32>
    %c3_64 = arith.constant 3 : index
    %c0_65 = arith.constant 0 : index
    %c0_66 = arith.constant 0 : index
    %80 = vector.load %arg3[%c3_64, %c0_65, %c0_66] : memref<4x16x96xbf16, #tpu.memory_space<vmem>>, vector<1x16x96xbf16>
    %81 = vector.shape_cast %80 : vector<1x16x96xbf16> to vector<16x96xbf16>
    %82 = vector.extract_strided_slice %63 {offsets = [0, 10], sizes = [96, 128], strides = [1, 1]} : vector<96x138xbf16> to vector<96x128xbf16>
    %cst_67 = arith.constant dense<0.000000e+00> : vector<16x128xf32>
    %83 = tpu.matmul %81, %82, %cst_67 {dimension_numbers = #tpu.dot_dimension_numbers<[1], [0], [0], [1], [0, 0, 1, 1], [], []>} : vector<16x96xbf16>, vector<96x128xbf16>, vector<16x128xf32> -> vector<16x128xf32>
    %84 = arith.addf %79, %83 : vector<16x128xf32>
    %c0_68 = arith.constant 0 : index
    %c0_69 = arith.constant 0 : index
    %85 = vector.load %arg4[%c0_68, %c0_69] : memref<16x1xf32, #tpu.memory_space<vmem>>, vector<16x1xf32>
    %86 = vector.broadcast %85 : vector<16x1xf32> to vector<16x128xf32>
    %87 = arith.addf %84, %86 : vector<16x128xf32>
    %cst_70 = arith.constant 0.000000e+00 : f32
    %88 = vector.broadcast %cst_70 : f32 to vector<16x128xf32>
    %89 = arith.maximumf %87, %88 : vector<16x128xf32>
    %c0_71 = arith.constant 0 : index
    %c0_72 = arith.constant 0 : index
    %c256 = arith.constant 256 : index
    %90 = vector.load %arg5[%c0_71, %c0_72, %c256] : memref<1x16x1024xf32, #tpu.memory_space<vmem>>, vector<1x16x128xf32>
    %91 = vector.shape_cast %90 : vector<1x16x128xf32> to vector<16x128xf32>
    %92 = vector.shape_cast %89 : vector<16x128xf32> to vector<1x16x128xf32>
    tpu.vector_store %arg5[%c0_71, %c0_72, %c256], %92 {strides = array<i32>} : memref<1x16x1024xf32, #tpu.memory_space<vmem>>, vector<1x16x128xf32>,
    %c0_73 = arith.constant 0 : index
    %c0_74 = arith.constant 0 : index
    %c192 = arith.constant 192 : index
    %c0_75 = arith.constant 0 : index
    %93 = vector.load %arg2[%c0_73, %c0_74, %c192, %c0_75] : memref<1x1x544x138xbf16, #tpu.memory_space<vmem>>, vector<1x1x96x138xbf16>
    %94 = vector.shape_cast %93 : vector<1x1x96x138xbf16> to vector<96x138xbf16>
    %cst_76 = arith.constant 0.000000e+00 : f32
    %95 = vector.broadcast %cst_76 : f32 to vector<16x128xf32>
    %c0_77 = arith.constant 0 : index
    %c0_78 = arith.constant 0 : index
    %c0_79 = arith.constant 0 : index
    %96 = vector.load %arg3[%c0_77, %c0_78, %c0_79] : memref<4x16x96xbf16, #tpu.memory_space<vmem>>, vector<1x16x96xbf16>
    %97 = vector.shape_cast %96 : vector<1x16x96xbf16> to vector<16x96xbf16>
    %98 = vector.extract_strided_slice %94 {offsets = [0, 0], sizes = [96, 128], strides = [1, 1]} : vector<96x138xbf16> to vector<96x128xbf16>
    %cst_80 = arith.constant dense<0.000000e+00> : vector<16x128xf32>
    %99 = tpu.matmul %97, %98, %cst_80 {dimension_numbers = #tpu.dot_dimension_numbers<[1], [0], [0], [1], [0, 0, 1, 1], [], []>} : vector<16x96xbf16>, vector<96x128xbf16>, vector<16x128xf32> -> vector<16x128xf32>
    %100 = arith.addf %95, %99 : vector<16x128xf32>
    %c1_81 = arith.constant 1 : index
    %c0_82 = arith.constant 0 : index
    %c0_83 = arith.constant 0 : index
    %101 = vector.load %arg3[%c1_81, %c0_82, %c0_83] : memref<4x16x96xbf16, #tpu.memory_space<vmem>>, vector<1x16x96xbf16>
    %102 = vector.shape_cast %101 : vector<1x16x96xbf16> to vector<16x96xbf16>
    %103 = vector.extract_strided_slice %94 {offsets = [0, 1], sizes = [96, 128], strides = [1, 1]} : vector<96x138xbf16> to vector<96x128xbf16>
    %cst_84 = arith.constant dense<0.000000e+00> : vector<16x128xf32>
    %104 = tpu.matmul %102, %103, %cst_84 {dimension_numbers = #tpu.dot_dimension_numbers<[1], [0], [0], [1], [0, 0, 1, 1], [], []>} : vector<16x96xbf16>, vector<96x128xbf16>, vector<16x128xf32> -> vector<16x128xf32>
    %105 = arith.addf %100, %104 : vector<16x128xf32>
    %c2_85 = arith.constant 2 : index
    %c0_86 = arith.constant 0 : index
    %c0_87 = arith.constant 0 : index
    %106 = vector.load %arg3[%c2_85, %c0_86, %c0_87] : memref<4x16x96xbf16, #tpu.memory_space<vmem>>, vector<1x16x96xbf16>
    %107 = vector.shape_cast %106 : vector<1x16x96xbf16> to vector<16x96xbf16>
    %108 = vector.extract_strided_slice %94 {offsets = [0, 9], sizes = [96, 128], strides = [1, 1]} : vector<96x138xbf16> to vector<96x128xbf16>
    %cst_88 = arith.constant dense<0.000000e+00> : vector<16x128xf32>
    %109 = tpu.matmul %107, %108, %cst_88 {dimension_numbers = #tpu.dot_dimension_numbers<[1], [0], [0], [1], [0, 0, 1, 1], [], []>} : vector<16x96xbf16>, vector<96x128xbf16>, vector<16x128xf32> -> vector<16x128xf32>
    %110 = arith.addf %105, %109 : vector<16x128xf32>
    %c3_89 = arith.constant 3 : index
    %c0_90 = arith.constant 0 : index
    %c0_91 = arith.constant 0 : index
    %111 = vector.load %arg3[%c3_89, %c0_90, %c0_91] : memref<4x16x96xbf16, #tpu.memory_space<vmem>>, vector<1x16x96xbf16>
    %112 = vector.shape_cast %111 : vector<1x16x96xbf16> to vector<16x96xbf16>
    %113 = vector.extract_strided_slice %94 {offsets = [0, 10], sizes = [96, 128], strides = [1, 1]} : vector<96x138xbf16> to vector<96x128xbf16>
    %cst_92 = arith.constant dense<0.000000e+00> : vector<16x128xf32>
    %114 = tpu.matmul %112, %113, %cst_92 {dimension_numbers = #tpu.dot_dimension_numbers<[1], [0], [0], [1], [0, 0, 1, 1], [], []>} : vector<16x96xbf16>, vector<96x128xbf16>, vector<16x128xf32> -> vector<16x128xf32>
    %115 = arith.addf %110, %114 : vector<16x128xf32>
    %c0_93 = arith.constant 0 : index
    %c0_94 = arith.constant 0 : index
    %116 = vector.load %arg4[%c0_93, %c0_94] : memref<16x1xf32, #tpu.memory_space<vmem>>, vector<16x1xf32>
    %117 = vector.broadcast %116 : vector<16x1xf32> to vector<16x128xf32>
    %118 = arith.addf %115, %117 : vector<16x128xf32>
    %cst_95 = arith.constant 0.000000e+00 : f32
    %119 = vector.broadcast %cst_95 : f32 to vector<16x128xf32>
    %120 = arith.maximumf %118, %119 : vector<16x128xf32>
    %c0_96 = arith.constant 0 : index
    %c0_97 = arith.constant 0 : index
    %c384 = arith.constant 384 : index
    %121 = vector.load %arg5[%c0_96, %c0_97, %c384] : memref<1x16x1024xf32, #tpu.memory_space<vmem>>, vector<1x16x128xf32>
    %122 = vector.shape_cast %121 : vector<1x16x128xf32> to vector<16x128xf32>
    %123 = vector.shape_cast %120 : vector<16x128xf32> to vector<1x16x128xf32>
    tpu.vector_store %arg5[%c0_96, %c0_97, %c384], %123 {strides = array<i32>} : memref<1x16x1024xf32, #tpu.memory_space<vmem>>, vector<1x16x128xf32>,
    %c0_98 = arith.constant 0 : index
    %c0_99 = arith.constant 0 : index
    %c256_100 = arith.constant 256 : index
    %c0_101 = arith.constant 0 : index
    %124 = vector.load %arg2[%c0_98, %c0_99, %c256_100, %c0_101] : memref<1x1x544x138xbf16, #tpu.memory_space<vmem>>, vector<1x1x96x138xbf16>
    %125 = vector.shape_cast %124 : vector<1x1x96x138xbf16> to vector<96x138xbf16>
    %cst_102 = arith.constant 0.000000e+00 : f32
    %126 = vector.broadcast %cst_102 : f32 to vector<16x128xf32>
    %c0_103 = arith.constant 0 : index
    %c0_104 = arith.constant 0 : index
    %c0_105 = arith.constant 0 : index
    %127 = vector.load %arg3[%c0_103, %c0_104, %c0_105] : memref<4x16x96xbf16, #tpu.memory_space<vmem>>, vector<1x16x96xbf16>
    %128 = vector.shape_cast %127 : vector<1x16x96xbf16> to vector<16x96xbf16>
    %129 = vector.extract_strided_slice %125 {offsets = [0, 0], sizes = [96, 128], strides = [1, 1]} : vector<96x138xbf16> to vector<96x128xbf16>
    %cst_106 = arith.constant dense<0.000000e+00> : vector<16x128xf32>
    %130 = tpu.matmul %128, %129, %cst_106 {dimension_numbers = #tpu.dot_dimension_numbers<[1], [0], [0], [1], [0, 0, 1, 1], [], []>} : vector<16x96xbf16>, vector<96x128xbf16>, vector<16x128xf32> -> vector<16x128xf32>
    %131 = arith.addf %126, %130 : vector<16x128xf32>
    %c1_107 = arith.constant 1 : index
    %c0_108 = arith.constant 0 : index
    %c0_109 = arith.constant 0 : index
    %132 = vector.load %arg3[%c1_107, %c0_108, %c0_109] : memref<4x16x96xbf16, #tpu.memory_space<vmem>>, vector<1x16x96xbf16>
    %133 = vector.shape_cast %132 : vector<1x16x96xbf16> to vector<16x96xbf16>
    %134 = vector.extract_strided_slice %125 {offsets = [0, 1], sizes = [96, 128], strides = [1, 1]} : vector<96x138xbf16> to vector<96x128xbf16>
    %cst_110 = arith.constant dense<0.000000e+00> : vector<16x128xf32>
    %135 = tpu.matmul %133, %134, %cst_110 {dimension_numbers = #tpu.dot_dimension_numbers<[1], [0], [0], [1], [0, 0, 1, 1], [], []>} : vector<16x96xbf16>, vector<96x128xbf16>, vector<16x128xf32> -> vector<16x128xf32>
    %136 = arith.addf %131, %135 : vector<16x128xf32>
    %c2_111 = arith.constant 2 : index
    %c0_112 = arith.constant 0 : index
    %c0_113 = arith.constant 0 : index
    %137 = vector.load %arg3[%c2_111, %c0_112, %c0_113] : memref<4x16x96xbf16, #tpu.memory_space<vmem>>, vector<1x16x96xbf16>
    %138 = vector.shape_cast %137 : vector<1x16x96xbf16> to vector<16x96xbf16>
    %139 = vector.extract_strided_slice %125 {offsets = [0, 9], sizes = [96, 128], strides = [1, 1]} : vector<96x138xbf16> to vector<96x128xbf16>
    %cst_114 = arith.constant dense<0.000000e+00> : vector<16x128xf32>
    %140 = tpu.matmul %138, %139, %cst_114 {dimension_numbers = #tpu.dot_dimension_numbers<[1], [0], [0], [1], [0, 0, 1, 1], [], []>} : vector<16x96xbf16>, vector<96x128xbf16>, vector<16x128xf32> -> vector<16x128xf32>
    %141 = arith.addf %136, %140 : vector<16x128xf32>
    %c3_115 = arith.constant 3 : index
    %c0_116 = arith.constant 0 : index
    %c0_117 = arith.constant 0 : index
    %142 = vector.load %arg3[%c3_115, %c0_116, %c0_117] : memref<4x16x96xbf16, #tpu.memory_space<vmem>>, vector<1x16x96xbf16>
    %143 = vector.shape_cast %142 : vector<1x16x96xbf16> to vector<16x96xbf16>
    %144 = vector.extract_strided_slice %125 {offsets = [0, 10], sizes = [96, 128], strides = [1, 1]} : vector<96x138xbf16> to vector<96x128xbf16>
    %cst_118 = arith.constant dense<0.000000e+00> : vector<16x128xf32>
    %145 = tpu.matmul %143, %144, %cst_118 {dimension_numbers = #tpu.dot_dimension_numbers<[1], [0], [0], [1], [0, 0, 1, 1], [], []>} : vector<16x96xbf16>, vector<96x128xbf16>, vector<16x128xf32> -> vector<16x128xf32>
    %146 = arith.addf %141, %145 : vector<16x128xf32>
    %c0_119 = arith.constant 0 : index
    %c0_120 = arith.constant 0 : index
    %147 = vector.load %arg4[%c0_119, %c0_120] : memref<16x1xf32, #tpu.memory_space<vmem>>, vector<16x1xf32>
    %148 = vector.broadcast %147 : vector<16x1xf32> to vector<16x128xf32>
    %149 = arith.addf %146, %148 : vector<16x128xf32>
    %cst_121 = arith.constant 0.000000e+00 : f32
    %150 = vector.broadcast %cst_121 : f32 to vector<16x128xf32>
    %151 = arith.maximumf %149, %150 : vector<16x128xf32>
    %c0_122 = arith.constant 0 : index
    %c0_123 = arith.constant 0 : index
    %c512 = arith.constant 512 : index
    %152 = vector.load %arg5[%c0_122, %c0_123, %c512] : memref<1x16x1024xf32, #tpu.memory_space<vmem>>, vector<1x16x128xf32>
    %153 = vector.shape_cast %152 : vector<1x16x128xf32> to vector<16x128xf32>
    %154 = vector.shape_cast %151 : vector<16x128xf32> to vector<1x16x128xf32>
    tpu.vector_store %arg5[%c0_122, %c0_123, %c512], %154 {strides = array<i32>} : memref<1x16x1024xf32, #tpu.memory_space<vmem>>, vector<1x16x128xf32>,
    %c0_124 = arith.constant 0 : index
    %c0_125 = arith.constant 0 : index
    %c320 = arith.constant 320 : index
    %c0_126 = arith.constant 0 : index
    %155 = vector.load %arg2[%c0_124, %c0_125, %c320, %c0_126] : memref<1x1x544x138xbf16, #tpu.memory_space<vmem>>, vector<1x1x96x138xbf16>
    %156 = vector.shape_cast %155 : vector<1x1x96x138xbf16> to vector<96x138xbf16>
    %cst_127 = arith.constant 0.000000e+00 : f32
    %157 = vector.broadcast %cst_127 : f32 to vector<16x128xf32>
    %c0_128 = arith.constant 0 : index
    %c0_129 = arith.constant 0 : index
    %c0_130 = arith.constant 0 : index
    %158 = vector.load %arg3[%c0_128, %c0_129, %c0_130] : memref<4x16x96xbf16, #tpu.memory_space<vmem>>, vector<1x16x96xbf16>
    %159 = vector.shape_cast %158 : vector<1x16x96xbf16> to vector<16x96xbf16>
    %160 = vector.extract_strided_slice %156 {offsets = [0, 0], sizes = [96, 128], strides = [1, 1]} : vector<96x138xbf16> to vector<96x128xbf16>
    %cst_131 = arith.constant dense<0.000000e+00> : vector<16x128xf32>
    %161 = tpu.matmul %159, %160, %cst_131 {dimension_numbers = #tpu.dot_dimension_numbers<[1], [0], [0], [1], [0, 0, 1, 1], [], []>} : vector<16x96xbf16>, vector<96x128xbf16>, vector<16x128xf32> -> vector<16x128xf32>
    %162 = arith.addf %157, %161 : vector<16x128xf32>
    %c1_132 = arith.constant 1 : index
    %c0_133 = arith.constant 0 : index
    %c0_134 = arith.constant 0 : index
    %163 = vector.load %arg3[%c1_132, %c0_133, %c0_134] : memref<4x16x96xbf16, #tpu.memory_space<vmem>>, vector<1x16x96xbf16>
    %164 = vector.shape_cast %163 : vector<1x16x96xbf16> to vector<16x96xbf16>
    %165 = vector.extract_strided_slice %156 {offsets = [0, 1], sizes = [96, 128], strides = [1, 1]} : vector<96x138xbf16> to vector<96x128xbf16>
    %cst_135 = arith.constant dense<0.000000e+00> : vector<16x128xf32>
    %166 = tpu.matmul %164, %165, %cst_135 {dimension_numbers = #tpu.dot_dimension_numbers<[1], [0], [0], [1], [0, 0, 1, 1], [], []>} : vector<16x96xbf16>, vector<96x128xbf16>, vector<16x128xf32> -> vector<16x128xf32>
    %167 = arith.addf %162, %166 : vector<16x128xf32>
    %c2_136 = arith.constant 2 : index
    %c0_137 = arith.constant 0 : index
    %c0_138 = arith.constant 0 : index
    %168 = vector.load %arg3[%c2_136, %c0_137, %c0_138] : memref<4x16x96xbf16, #tpu.memory_space<vmem>>, vector<1x16x96xbf16>
    %169 = vector.shape_cast %168 : vector<1x16x96xbf16> to vector<16x96xbf16>
    %170 = vector.extract_strided_slice %156 {offsets = [0, 9], sizes = [96, 128], strides = [1, 1]} : vector<96x138xbf16> to vector<96x128xbf16>
    %cst_139 = arith.constant dense<0.000000e+00> : vector<16x128xf32>
    %171 = tpu.matmul %169, %170, %cst_139 {dimension_numbers = #tpu.dot_dimension_numbers<[1], [0], [0], [1], [0, 0, 1, 1], [], []>} : vector<16x96xbf16>, vector<96x128xbf16>, vector<16x128xf32> -> vector<16x128xf32>
    %172 = arith.addf %167, %171 : vector<16x128xf32>
    %c3_140 = arith.constant 3 : index
    %c0_141 = arith.constant 0 : index
    %c0_142 = arith.constant 0 : index
    %173 = vector.load %arg3[%c3_140, %c0_141, %c0_142] : memref<4x16x96xbf16, #tpu.memory_space<vmem>>, vector<1x16x96xbf16>
    %174 = vector.shape_cast %173 : vector<1x16x96xbf16> to vector<16x96xbf16>
    %175 = vector.extract_strided_slice %156 {offsets = [0, 10], sizes = [96, 128], strides = [1, 1]} : vector<96x138xbf16> to vector<96x128xbf16>
    %cst_143 = arith.constant dense<0.000000e+00> : vector<16x128xf32>
    %176 = tpu.matmul %174, %175, %cst_143 {dimension_numbers = #tpu.dot_dimension_numbers<[1], [0], [0], [1], [0, 0, 1, 1], [], []>} : vector<16x96xbf16>, vector<96x128xbf16>, vector<16x128xf32> -> vector<16x128xf32>
    %177 = arith.addf %172, %176 : vector<16x128xf32>
    %c0_144 = arith.constant 0 : index
    %c0_145 = arith.constant 0 : index
    %178 = vector.load %arg4[%c0_144, %c0_145] : memref<16x1xf32, #tpu.memory_space<vmem>>, vector<16x1xf32>
    %179 = vector.broadcast %178 : vector<16x1xf32> to vector<16x128xf32>
    %180 = arith.addf %177, %179 : vector<16x128xf32>
    %cst_146 = arith.constant 0.000000e+00 : f32
    %181 = vector.broadcast %cst_146 : f32 to vector<16x128xf32>
    %182 = arith.maximumf %180, %181 : vector<16x128xf32>
    %c0_147 = arith.constant 0 : index
    %c0_148 = arith.constant 0 : index
    %c640 = arith.constant 640 : index
    %183 = vector.load %arg5[%c0_147, %c0_148, %c640] : memref<1x16x1024xf32, #tpu.memory_space<vmem>>, vector<1x16x128xf32>
    %184 = vector.shape_cast %183 : vector<1x16x128xf32> to vector<16x128xf32>
    %185 = vector.shape_cast %182 : vector<16x128xf32> to vector<1x16x128xf32>
    tpu.vector_store %arg5[%c0_147, %c0_148, %c640], %185 {strides = array<i32>} : memref<1x16x1024xf32, #tpu.memory_space<vmem>>, vector<1x16x128xf32>,
    %c0_149 = arith.constant 0 : index
    %c0_150 = arith.constant 0 : index
    %c384_151 = arith.constant 384 : index
    %c0_152 = arith.constant 0 : index
    %186 = vector.load %arg2[%c0_149, %c0_150, %c384_151, %c0_152] : memref<1x1x544x138xbf16, #tpu.memory_space<vmem>>, vector<1x1x96x138xbf16>
    %187 = vector.shape_cast %186 : vector<1x1x96x138xbf16> to vector<96x138xbf16>
    %cst_153 = arith.constant 0.000000e+00 : f32
    %188 = vector.broadcast %cst_153 : f32 to vector<16x128xf32>
    %c0_154 = arith.constant 0 : index
    %c0_155 = arith.constant 0 : index
    %c0_156 = arith.constant 0 : index
    %189 = vector.load %arg3[%c0_154, %c0_155, %c0_156] : memref<4x16x96xbf16, #tpu.memory_space<vmem>>, vector<1x16x96xbf16>
    %190 = vector.shape_cast %189 : vector<1x16x96xbf16> to vector<16x96xbf16>
    %191 = vector.extract_strided_slice %187 {offsets = [0, 0], sizes = [96, 128], strides = [1, 1]} : vector<96x138xbf16> to vector<96x128xbf16>
    %cst_157 = arith.constant dense<0.000000e+00> : vector<16x128xf32>
    %192 = tpu.matmul %190, %191, %cst_157 {dimension_numbers = #tpu.dot_dimension_numbers<[1], [0], [0], [1], [0, 0, 1, 1], [], []>} : vector<16x96xbf16>, vector<96x128xbf16>, vector<16x128xf32> -> vector<16x128xf32>
    %193 = arith.addf %188, %192 : vector<16x128xf32>
    %c1_158 = arith.constant 1 : index
    %c0_159 = arith.constant 0 : index
    %c0_160 = arith.constant 0 : index
    %194 = vector.load %arg3[%c1_158, %c0_159, %c0_160] : memref<4x16x96xbf16, #tpu.memory_space<vmem>>, vector<1x16x96xbf16>
    %195 = vector.shape_cast %194 : vector<1x16x96xbf16> to vector<16x96xbf16>
    %196 = vector.extract_strided_slice %187 {offsets = [0, 1], sizes = [96, 128], strides = [1, 1]} : vector<96x138xbf16> to vector<96x128xbf16>
    %cst_161 = arith.constant dense<0.000000e+00> : vector<16x128xf32>
    %197 = tpu.matmul %195, %196, %cst_161 {dimension_numbers = #tpu.dot_dimension_numbers<[1], [0], [0], [1], [0, 0, 1, 1], [], []>} : vector<16x96xbf16>, vector<96x128xbf16>, vector<16x128xf32> -> vector<16x128xf32>
    %198 = arith.addf %193, %197 : vector<16x128xf32>
    %c2_162 = arith.constant 2 : index
    %c0_163 = arith.constant 0 : index
    %c0_164 = arith.constant 0 : index
    %199 = vector.load %arg3[%c2_162, %c0_163, %c0_164] : memref<4x16x96xbf16, #tpu.memory_space<vmem>>, vector<1x16x96xbf16>
    %200 = vector.shape_cast %199 : vector<1x16x96xbf16> to vector<16x96xbf16>
    %201 = vector.extract_strided_slice %187 {offsets = [0, 9], sizes = [96, 128], strides = [1, 1]} : vector<96x138xbf16> to vector<96x128xbf16>
    %cst_165 = arith.constant dense<0.000000e+00> : vector<16x128xf32>
    %202 = tpu.matmul %200, %201, %cst_165 {dimension_numbers = #tpu.dot_dimension_numbers<[1], [0], [0], [1], [0, 0, 1, 1], [], []>} : vector<16x96xbf16>, vector<96x128xbf16>, vector<16x128xf32> -> vector<16x128xf32>
    %203 = arith.addf %198, %202 : vector<16x128xf32>
    %c3_166 = arith.constant 3 : index
    %c0_167 = arith.constant 0 : index
    %c0_168 = arith.constant 0 : index
    %204 = vector.load %arg3[%c3_166, %c0_167, %c0_168] : memref<4x16x96xbf16, #tpu.memory_space<vmem>>, vector<1x16x96xbf16>
    %205 = vector.shape_cast %204 : vector<1x16x96xbf16> to vector<16x96xbf16>
    %206 = vector.extract_strided_slice %187 {offsets = [0, 10], sizes = [96, 128], strides = [1, 1]} : vector<96x138xbf16> to vector<96x128xbf16>
    %cst_169 = arith.constant dense<0.000000e+00> : vector<16x128xf32>
    %207 = tpu.matmul %205, %206, %cst_169 {dimension_numbers = #tpu.dot_dimension_numbers<[1], [0], [0], [1], [0, 0, 1, 1], [], []>} : vector<16x96xbf16>, vector<96x128xbf16>, vector<16x128xf32> -> vector<16x128xf32>
    %208 = arith.addf %203, %207 : vector<16x128xf32>
    %c0_170 = arith.constant 0 : index
    %c0_171 = arith.constant 0 : index
    %209 = vector.load %arg4[%c0_170, %c0_171] : memref<16x1xf32, #tpu.memory_space<vmem>>, vector<16x1xf32>
    %210 = vector.broadcast %209 : vector<16x1xf32> to vector<16x128xf32>
    %211 = arith.addf %208, %210 : vector<16x128xf32>
    %cst_172 = arith.constant 0.000000e+00 : f32
    %212 = vector.broadcast %cst_172 : f32 to vector<16x128xf32>
    %213 = arith.maximumf %211, %212 : vector<16x128xf32>
    %c0_173 = arith.constant 0 : index
    %c0_174 = arith.constant 0 : index
    %c768 = arith.constant 768 : index
    %214 = vector.load %arg5[%c0_173, %c0_174, %c768] : memref<1x16x1024xf32, #tpu.memory_space<vmem>>, vector<1x16x128xf32>
    %215 = vector.shape_cast %214 : vector<1x16x128xf32> to vector<16x128xf32>
    %216 = vector.shape_cast %213 : vector<16x128xf32> to vector<1x16x128xf32>
    tpu.vector_store %arg5[%c0_173, %c0_174, %c768], %216 {strides = array<i32>} : memref<1x16x1024xf32, #tpu.memory_space<vmem>>, vector<1x16x128xf32>,
    %c0_175 = arith.constant 0 : index
    %c0_176 = arith.constant 0 : index
    %c448 = arith.constant 448 : index
    %c0_177 = arith.constant 0 : index
    %217 = vector.load %arg2[%c0_175, %c0_176, %c448, %c0_177] : memref<1x1x544x138xbf16, #tpu.memory_space<vmem>>, vector<1x1x96x138xbf16>
    %218 = vector.shape_cast %217 : vector<1x1x96x138xbf16> to vector<96x138xbf16>
    %cst_178 = arith.constant 0.000000e+00 : f32
    %219 = vector.broadcast %cst_178 : f32 to vector<16x128xf32>
    %c0_179 = arith.constant 0 : index
    %c0_180 = arith.constant 0 : index
    %c0_181 = arith.constant 0 : index
    %220 = vector.load %arg3[%c0_179, %c0_180, %c0_181] : memref<4x16x96xbf16, #tpu.memory_space<vmem>>, vector<1x16x96xbf16>
    %221 = vector.shape_cast %220 : vector<1x16x96xbf16> to vector<16x96xbf16>
    %222 = vector.extract_strided_slice %218 {offsets = [0, 0], sizes = [96, 128], strides = [1, 1]} : vector<96x138xbf16> to vector<96x128xbf16>
    %cst_182 = arith.constant dense<0.000000e+00> : vector<16x128xf32>
    %223 = tpu.matmul %221, %222, %cst_182 {dimension_numbers = #tpu.dot_dimension_numbers<[1], [0], [0], [1], [0, 0, 1, 1], [], []>} : vector<16x96xbf16>, vector<96x128xbf16>, vector<16x128xf32> -> vector<16x128xf32>
    %224 = arith.addf %219, %223 : vector<16x128xf32>
    %c1_183 = arith.constant 1 : index
    %c0_184 = arith.constant 0 : index
    %c0_185 = arith.constant 0 : index
    %225 = vector.load %arg3[%c1_183, %c0_184, %c0_185] : memref<4x16x96xbf16, #tpu.memory_space<vmem>>, vector<1x16x96xbf16>
    %226 = vector.shape_cast %225 : vector<1x16x96xbf16> to vector<16x96xbf16>
    %227 = vector.extract_strided_slice %218 {offsets = [0, 1], sizes = [96, 128], strides = [1, 1]} : vector<96x138xbf16> to vector<96x128xbf16>
    %cst_186 = arith.constant dense<0.000000e+00> : vector<16x128xf32>
    %228 = tpu.matmul %226, %227, %cst_186 {dimension_numbers = #tpu.dot_dimension_numbers<[1], [0], [0], [1], [0, 0, 1, 1], [], []>} : vector<16x96xbf16>, vector<96x128xbf16>, vector<16x128xf32> -> vector<16x128xf32>
    %229 = arith.addf %224, %228 : vector<16x128xf32>
    %c2_187 = arith.constant 2 : index
    %c0_188 = arith.constant 0 : index
    %c0_189 = arith.constant 0 : index
    %230 = vector.load %arg3[%c2_187, %c0_188, %c0_189] : memref<4x16x96xbf16, #tpu.memory_space<vmem>>, vector<1x16x96xbf16>
    %231 = vector.shape_cast %230 : vector<1x16x96xbf16> to vector<16x96xbf16>
    %232 = vector.extract_strided_slice %218 {offsets = [0, 9], sizes = [96, 128], strides = [1, 1]} : vector<96x138xbf16> to vector<96x128xbf16>
    %cst_190 = arith.constant dense<0.000000e+00> : vector<16x128xf32>
    %233 = tpu.matmul %231, %232, %cst_190 {dimension_numbers = #tpu.dot_dimension_numbers<[1], [0], [0], [1], [0, 0, 1, 1], [], []>} : vector<16x96xbf16>, vector<96x128xbf16>, vector<16x128xf32> -> vector<16x128xf32>
    %234 = arith.addf %229, %233 : vector<16x128xf32>
    %c3_191 = arith.constant 3 : index
    %c0_192 = arith.constant 0 : index
    %c0_193 = arith.constant 0 : index
    %235 = vector.load %arg3[%c3_191, %c0_192, %c0_193] : memref<4x16x96xbf16, #tpu.memory_space<vmem>>, vector<1x16x96xbf16>
    %236 = vector.shape_cast %235 : vector<1x16x96xbf16> to vector<16x96xbf16>
    %237 = vector.extract_strided_slice %218 {offsets = [0, 10], sizes = [96, 128], strides = [1, 1]} : vector<96x138xbf16> to vector<96x128xbf16>
    %cst_194 = arith.constant dense<0.000000e+00> : vector<16x128xf32>
    %238 = tpu.matmul %236, %237, %cst_194 {dimension_numbers = #tpu.dot_dimension_numbers<[1], [0], [0], [1], [0, 0, 1, 1], [], []>} : vector<16x96xbf16>, vector<96x128xbf16>, vector<16x128xf32> -> vector<16x128xf32>
    %239 = arith.addf %234, %238 : vector<16x128xf32>
    %c0_195 = arith.constant 0 : index
    %c0_196 = arith.constant 0 : index
    %240 = vector.load %arg4[%c0_195, %c0_196] : memref<16x1xf32, #tpu.memory_space<vmem>>, vector<16x1xf32>
    %241 = vector.broadcast %240 : vector<16x1xf32> to vector<16x128xf32>
    %242 = arith.addf %239, %241 : vector<16x128xf32>
    %cst_197 = arith.constant 0.000000e+00 : f32
    %243 = vector.broadcast %cst_197 : f32 to vector<16x128xf32>
    %244 = arith.maximumf %242, %243 : vector<16x128xf32>
    %c0_198 = arith.constant 0 : index
    %c0_199 = arith.constant 0 : index
    %c896 = arith.constant 896 : index
    %245 = vector.load %arg5[%c0_198, %c0_199, %c896] : memref<1x16x1024xf32, #tpu.memory_space<vmem>>, vector<1x16x128xf32>
    %246 = vector.shape_cast %245 : vector<1x16x128xf32> to vector<16x128xf32>
    %247 = vector.shape_cast %244 : vector<16x128xf32> to vector<1x16x128xf32>
    tpu.vector_store %arg5[%c0_198, %c0_199, %c896], %247 {strides = array<i32>} : memref<1x16x1024xf32, #tpu.memory_space<vmem>>, vector<1x16x128xf32>,
    return
  }
  func.func @transform_0(%arg0: i32, %arg1: i32) -> (i32, i32, i32, i32) {
    %c0_i32 = arith.constant 0 : i32
    %c0_i32_0 = arith.constant 0 : i32
    %c0_i32_1 = arith.constant 0 : i32
    return %arg0, %arg1, %c0_i32, %c0_i32_0 : i32, i32, i32, i32
  }
  func.func @transform_1(%arg0: i32, %arg1: i32) -> (i32, i32, i32) {
    %c0_i32 = arith.constant 0 : i32
    %c0_i32_0 = arith.constant 0 : i32
    %c0_i32_1 = arith.constant 0 : i32
    %c0_i32_2 = arith.constant 0 : i32
    return %c0_i32, %c0_i32_0, %c0_i32_1 : i32, i32, i32
  }
  func.func @transform_2(%arg0: i32, %arg1: i32) -> (i32, i32) {
    %c0_i32 = arith.constant 0 : i32
    %c0_i32_0 = arith.constant 0 : i32
    %c0_i32_1 = arith.constant 0 : i32
    return %c0_i32, %c0_i32_0 : i32, i32
  }
  func.func @transform_3(%arg0: i32, %arg1: i32) -> (i32, i32, i32) {
    %c0_i32 = arith.constant 0 : i32
    %c0_i32_0 = arith.constant 0 : i32
    return %arg0, %c0_i32, %arg1 : i32, i32, i32
  }
}

</mosaic_0001>

<bundles_post_ra>
// kernel: downsampler_a.1
= control target key start
LH: loop header
LB: loop body
LE: loop exit
PB: predicated region body
PF: predicated region fallthrough
CT: control target
= control target key end

     0   :  { %s4678_s12 = smov 0   ;;  %s4680_s13 = smov 0   ;;  %s6082_s0 = inlined_call_operand.vmem [shape: bf16[2,1,544,138], index: 0, kind: input, shape index: {}]   ;;  %s6083_s1 = inlined_call_operand.vmem [shape: bf16[4,16,96], index: 1, kind: input, shape index: {}]   ;;  %s6084_s2 = inlined_call_operand.vmem [shape: f32[16,1], index: 2, kind: input, shape index: {}]   ;;  %s6085_s3 = inlined_call_operand.vmem [shape: f32[2,16,1024], index: 3, kind: output, shape index: {}]  }
   0x1   :  { %s4682_s14 = smov 0  }
   0x2 LB: > { %s25_s15 = sadd.s32 1, %s4646_s13  ;;  %p3510_p0 = scmp.ge.s32.totalorder %s4650_s14, 1  ;;  %s4650_s14 = sphi %s4682_s14, %s13_s14   ;;  %s4646_s13 = sphi %s4680_s13, %s6087_s13   ;;  %s4642_s12 = sphi %s4678_s12, %s6086_s12  }
   0x3   : > { %p27_p1 = scmp.ge.s32.totalorder %s25_s15, 2  ;;  %p157_p2 = scmp.lt.s32.totalorder %s4650_s14, 3 }
   0x5   : > { %s6089_s15 = smov (%p27_p1, %s25_s15), 0  ;;  %p158_p3 = pnand %p3510_p0, %p157_p2 }
   0x6   : > { %p189_p4 = scmp.lt.s32.totalorder (!%p158_p3), %s4642_s12, 1  ;;  %v4652_v0 = vmov (!%p158_p3), 0.0   ;;  %s4653_s20 = smov (!%p158_p3), 127   ;;  %vm4654_vm0 = vmmov (!%p158_p3), 0   ;;  %v4525_v13 = vld [vmem:[%s6083_s1] sm:$0xff] (!%p158_p3)   ;;  %vm316_vm1 = vcmask (!%p158_p3), 785408  }
   0x7   : > { %161 = sbr.rel (%p158_p3) target bundleno = 932 (0x3a4), region = 32  ;;  %3949 = vmatprep.subr.bf16.mxu0 (!%p158_p3), %v4652_v0  ;;  %3965 = vmatprep.subr.bf16.mxu1 (!%p158_p3), %v4652_v0  ;;  %s4655_s23 = smov (!%p158_p3), 119   ;;  %vm303_vm2 = vcmask (!%p158_p3), 1039360   ;;  %v4524_v42 = vld [vmem:[%s6083_s1 + $0x8] sm:$0xff] (!%p158_p3)   ;;  %vm448_vm3 = vcmask (!%p158_p3), 973824   ;;  %vm539_vm4 = vcmask (!%p158_p3), 965632  }
   0x8   : > { %3961 = vmatprep.mubr.msk.bf16.mxu0 (!%p158_p3), %vm4654_vm0, %v4652_v0  ;;  %3977 = vmatprep.mubr.msk.bf16.mxu1 (!%p158_p3), %vm4654_vm0, %v4652_v0  ;;  %s4656_s24 = smov (!%p158_p3), 118  }
   0xe   : > { %s6091_s12 = smov (!%p189_p4, %s4642_s12), 1 }
   0xf   : > { %s4461_s16 = smul.u32 544, %s6091_s12 }
  0x11   : > { %s4704_s19 = scalar_lea.vmem %s6082_s0, %s4461_s16 }
  0x12   : > { %v4494_v1 = vld [vmem:[%s4704_s19 + $0x10] ss:$8 sps:$4 sm:$0xff]   ;;  %v4496_v2 = vld [vmem:[%s4704_s19] ss:$8 sps:$4 sm:$0xff]   ;;  %v4498_v3 = vld [vmem:[%s4704_s19 + $0x14] ss:$8 sps:$4 sm:$0xff]  }
  0x13   : > { %283 = vrot.lane.b32.xlu1 %v4494_v1, %s4653_s20  ;;  %279 = vrot.lane.b32.xlu0 %v4496_v2, %s4653_s20  ;;  %v4499_v4 = vld [vmem:[%s4704_s19 + $0x4] ss:$8 sps:$4 sm:$0xff]   ;;  %v4500_v6 = vld [vmem:[%s4704_s19 + $0x20] ss:$8 sps:$4 sm:$0xff]  }
  0x14   : > { %3966 = vmatpush3.bf16.msra.mxu1 %v4496_v2  ;;  %v4502_v5 = vld [vmem:[%s4704_s19 + $0x24] ss:$8 sps:$4 sm:$0xff]   ;;  %v4505_v7 = vld [vmem:[%s4704_s19 + $0x34] ss:$8 sps:$4 sm:$0xff]   ;;  %v4503_v8 = vld [vmem:[%s4704_s19 + $0x30] ss:$8 sps:$4 sm:$0xff]  }
  0x15   : > { %3967 = vmatprep.subr.bf16.mxu1 %v4652_v0  ;;  %v4724_v9 = vld [vmem:[%s4704_s19 + $0x40] ss:$8 sps:$4 sm:$0xff]   ;;  %v4727_v10 = vld [vmem:[%s4704_s19 + $0x44] ss:$8 sps:$4 sm:$0xff]   ;;  %v4733_v11 = vld [vmem:[%s4704_s19 + $0x50] ss:$8 sps:$4 sm:$0xff]  }
  0x16   : > { %v4736_v12 = vld [vmem:[%s4704_s19 + $0x54] ss:$8 sps:$4 sm:$0xff]   ;;  %v4514_v14 = vld [vmem:[%s4704_s19 + $0x64] ss:$8 sps:$4 sm:$0xff]   ;;  %v4802_v15 = vld [vmem:[%s4704_s19 + $0x60] ss:$8 sps:$4 sm:$0xff]  }
  0x17   : > { %285 = vrot.lane.b32.xlu1 %v4498_v3, %s4653_s20  ;;  %281 = vrot.lane.b32.xlu0 %v4499_v4, %s4653_s20  ;;  %v4517_v16 = vld [vmem:[%s4704_s19 + $0x74] ss:$8 sps:$4 sm:$0xff]   ;;  %v4809_v17 = vld [vmem:[%s4704_s19 + $0x70] ss:$8 sps:$4 sm:$0xff]  }
  0x18   : > { %3968 = vmatpush3.bf16.msra.mxu1 %v4494_v1  ;;  %v4813_v18 = vld [vmem:[%s4704_s19 + $0x84] ss:$8 sps:$4 sm:$0xff]   ;;  %v4818_v19 = vld [vmem:[%s4704_s19 + $0x80] ss:$8 sps:$4 sm:$0xff]   ;;  %v4823_v20 = vld [vmem:[%s4704_s19 + $0x94] ss:$8 sps:$4 sm:$0xff]  }
  0x19   : > { %3969 = vmatprep.subr.bf16.mxu1 %v4652_v0  ;;  %v4828_v21 = vld [vmem:[%s4704_s19 + $0x90] ss:$8 sps:$4 sm:$0xff]   ;;  %v4908_v50 = vld [vmem:[%s4704_s19 + $0xa4] ss:$8 sps:$4 sm:$0xff]   ;;  %v4913_v51 = vld [vmem:[%s4704_s19 + $0xa0] ss:$8 sps:$4 sm:$0xff]  }
  0x1a   : > { %v4920_v55 = vld [vmem:[%s4704_s19 + $0xb4] ss:$8 sps:$4 sm:$0xff]   ;;  %v4925_v56 = vld [vmem:[%s4704_s19 + $0xb0] ss:$8 sps:$4 sm:$0xff]   ;;  %v4932_v60 = vld [vmem:[%s4704_s19 + $0xc4] ss:$8 sps:$4 sm:$0xff]  }
  0x1b   : > { %289 = vrot.lane.b32.xlu1 %v4502_v5, %s4653_s20  ;;  %287 = vrot.lane.b32.xlu0 %v4500_v6, %s4653_s20  ;;  %v4937_v61 = vld [vmem:[%s4704_s19 + $0xc0] ss:$8 sps:$4 sm:$0xff]  }
  0x1c   : > { %3970 = vmatpush3.bf16.msra.mxu1 %v4500_v6 }
  0x1d   : > { %3971 = vmatprep.subr.bf16.mxu1 %v4652_v0 }
  0x1f   : > { %293 = vrot.lane.b32.xlu1 %v4505_v7, %s4653_s20  ;;  %291 = vrot.lane.b32.xlu0 %v4503_v8, %s4653_s20 }
  0x20   : > { %3972 = vmatpush3.bf16.msra.mxu1 %v4503_v8 }
  0x21   : > { %3973 = vmatprep.subr.bf16.mxu1 %v4652_v0 }
  0x23   : > { %297 = vrot.lane.b32.xlu1 %v4727_v10, %s4653_s20  ;;  %295 = vrot.lane.b32.xlu0 %v4724_v9, %s4653_s20 }
  0x24   : > { %3974 = vmatpush3.bf16.msra.mxu1 %v4724_v9 }
  0x25   : > { %3975 = vmatprep.subr.bf16.mxu1 %v4652_v0 }
  0x27   : > { %301 = vrot.lane.b32.xlu1 %v4736_v12, %s4653_s20  ;;  %299 = vrot.lane.b32.xlu0 %v4733_v11, %s4653_s20 }
  0x28   : > { %3976 = vmatpush3.bf16.msra.mxu1 %v4733_v11 }
  0x29   : > { %3997 = vmatprep.subr.bf16.mxu1 %v4652_v0 }
  0x2b   : > { %426 = vrot.lane.b32.xlu1 %v4499_v4, %s4655_s23  ;;  %3978 = vmatmul.mubr.msk.bf16.vlgmr.msra.gmra.mrb[0].mxu1 %vm316_vm1, %v4525_v13 }
  0x2c   : > { %424 = vrot.lane.b32.xlu0 %v4496_v2, %s4655_s23  ;;  %4009 = vmatprep.mubr.msk.bf16.mxu1 %vm4654_vm0, %v4652_v0 }
  0x2f   : > { %517 = vrot.lane.b32.xlu1 %v4499_v4, %s4656_s24 }
  0x30   : > { %515 = vrot.lane.b32.xlu0 %v4496_v2, %s4656_s24  ;;  %v4944_v2 = vld [vmem:[%s4704_s19 + $0xd4] ss:$8 sps:$4 sm:$0xff]  }
  0x33   : > { %430 = vrot.lane.b32.xlu1 %v4498_v3, %s4655_s23 }
  0x34   : > { %428 = vrot.lane.b32.xlu0 %v4494_v1, %s4655_s23 }
  0x37   : > { %521 = vrot.lane.b32.xlu1 %v4498_v3, %s4656_s24  ;;  %v4949_v3 = vld [vmem:[%s4704_s19 + $0xd0] ss:$8 sps:$4 sm:$0xff]  }
  0x38   : > { %519 = vrot.lane.b32.xlu0 %v4494_v1, %s4656_s24 }
  0x3b   : > { %434 = vrot.lane.b32.xlu1 %v4502_v5, %s4655_s23 }
  0x3c   : > { %432 = vrot.lane.b32.xlu0 %v4500_v6, %s4655_s23 }
  0x3f   : > { %525 = vrot.lane.b32.xlu1 %v4502_v5, %s4656_s24 }
  0x40   : > { %523 = vrot.lane.b32.xlu0 %v4500_v6, %s4656_s24 }
  0x43   : > { %438 = vrot.lane.b32.xlu1 %v4505_v7, %s4655_s23 }
  0x44   : > { %436 = vrot.lane.b32.xlu0 %v4503_v8, %s4655_s23 }
  0x47   : > { %529 = vrot.lane.b32.xlu1 %v4505_v7, %s4656_s24 }
  0x48   : > { %527 = vrot.lane.b32.xlu0 %v4503_v8, %s4656_s24 }
  0x4b   : > { %442 = vrot.lane.b32.xlu1 %v4727_v10, %s4655_s23 }
  0x4c   : > { %440 = vrot.lane.b32.xlu0 %v4724_v9, %s4655_s23 }
  0x4f   : > { %533 = vrot.lane.b32.xlu1 %v4727_v10, %s4656_s24 }
  0x50   : > { %531 = vrot.lane.b32.xlu0 %v4724_v9, %s4656_s24 }
  0x53   : > { %446 = vrot.lane.b32.xlu1 %v4736_v12, %s4655_s23 }
  0x54   : > { %444 = vrot.lane.b32.xlu0 %v4733_v11, %s4655_s23 }
  0x57   : > { %537 = vrot.lane.b32.xlu1 %v4736_v12, %s4656_s24 }
  0x58   : > { %535 = vrot.lane.b32.xlu0 %v4733_v11, %s4656_s24 }
  0x5b   : > { %687 = vrot.lane.b32.xlu1 %v4727_v10, %s4653_s20 }
  0x5c   : > { %685 = vrot.lane.b32.xlu0 %v4724_v9, %s4653_s20 }
  0x5f   : > { %691 = vrot.lane.b32.xlu1 %v4736_v12, %s4653_s20 }
  0x60   : > { %689 = vrot.lane.b32.xlu0 %v4733_v11, %s4653_s20 }
  0x63   : > { %695 = vrot.lane.b32.xlu1 %v4514_v14, %s4653_s20 }
  0x64   : > { %693 = vrot.lane.b32.xlu0 %v4802_v15, %s4653_s20 }
  0x67   : > { %699 = vrot.lane.b32.xlu1 %v4517_v16, %s4653_s20 }
  0x68   : > { %697 = vrot.lane.b32.xlu0 %v4809_v17, %s4653_s20 }
  0x6b   : > { %703 = vrot.lane.b32.xlu1 %v4813_v18, %s4653_s20 }
  0x6c   : > { %701 = vrot.lane.b32.xlu0 %v4818_v19, %s4653_s20 }
  0x6f   : > { %707 = vrot.lane.b32.xlu1 %v4823_v20, %s4653_s20 }
  0x70   : > { %705 = vrot.lane.b32.xlu0 %v4828_v21, %s4653_s20 }
  0x73   : > { %829 = vrot.lane.b32.xlu1 %v4727_v10, %s4655_s23 }
  0x74   : > { %827 = vrot.lane.b32.xlu0 %v4724_v9, %s4655_s23 }
  0x77   : > { %918 = vrot.lane.b32.xlu1 %v4727_v10, %s4656_s24 }
  0x78   : > { %916 = vrot.lane.b32.xlu0 %v4724_v9, %s4656_s24 }
  0x7b   : > { %833 = vrot.lane.b32.xlu1 %v4736_v12, %s4655_s23 }
  0x7c   : > { %831 = vrot.lane.b32.xlu0 %v4733_v11, %s4655_s23 }
  0x7f   : > { %922 = vrot.lane.b32.xlu1 %v4736_v12, %s4656_s24 }
  0x80   : > { %920 = vrot.lane.b32.xlu0 %v4733_v11, %s4656_s24 }
  0x83   : > { %837 = vrot.lane.b32.xlu1 %v4514_v14, %s4655_s23 }
  0x84   : > { %835 = vrot.lane.b32.xlu0 %v4802_v15, %s4655_s23 }
  0x85   : > { %v284_v22 = vpop.permute.xlu1 %283  ;;  %v280_v23 = vpop.permute.xlu0 %279 }
  0x87   : > { %926 = vrot.lane.b32.xlu1 %v4514_v14, %s4656_s24 }
  0x88   : > { %924 = vrot.lane.b32.xlu0 %v4802_v15, %s4656_s24 }
  0x89   : > { %v286_v24 = vpop.permute.xlu1 %285  ;;  %v282_v25 = vpop.permute.xlu0 %281 }
  0x8a   : > { %v304_v26 = vsel %vm303_vm2, %v280_v23, %v282_v25  ;;  %v305_v29 = vsel %vm303_vm2, %v284_v22, %v286_v24 }
  0x8b   : > { %841 = vrot.lane.b32.xlu1 %v4517_v16, %s4655_s23  ;;  %3950 = vmatpush3.bf16.msra.mxu0 %v304_v26  ;;  %v4538_v26 = vld [vmem:[%s6083_s1 + $0x10] sm:$0xff]  }
  0x8c   : > { %839 = vrot.lane.b32.xlu0 %v4809_v17, %s4655_s23  ;;  %3951 = vmatprep.subr.bf16.mxu0 %v4652_v0 }
  0x8d   : > { %v290_v27 = vpop.permute.xlu1 %289  ;;  %v288_v28 = vpop.permute.xlu0 %287 }
  0x8e   : > { %v306_v32 = vsel %vm303_vm2, %v288_v28, %v290_v27 }
  0x8f   : > { %930 = vrot.lane.b32.xlu1 %v4517_v16, %s4656_s24  ;;  %3952 = vmatpush3.bf16.msra.mxu0 %v305_v29 }
  0x90   : > { %928 = vrot.lane.b32.xlu0 %v4809_v17, %s4656_s24  ;;  %3953 = vmatprep.subr.bf16.mxu0 %v4652_v0 }
  0x91   : > { %v294_v30 = vpop.permute.xlu1 %293  ;;  %v292_v31 = vpop.permute.xlu0 %291 }
  0x92   : > { %v307_v35 = vsel %vm303_vm2, %v292_v31, %v294_v30 }
  0x93   : > { %845 = vrot.lane.b32.xlu1 %v4813_v18, %s4655_s23  ;;  %3954 = vmatpush3.bf16.msra.mxu0 %v306_v32 }
  0x94   : > { %843 = vrot.lane.b32.xlu0 %v4818_v19, %s4655_s23  ;;  %3955 = vmatprep.subr.bf16.mxu0 %v4652_v0 }
  0x95   : > { %v298_v33 = vpop.permute.xlu1 %297  ;;  %v296_v34 = vpop.permute.xlu0 %295 }
  0x96   : > { %v308_v38 = vsel %vm303_vm2, %v296_v34, %v298_v33 }
  0x97   : > { %934 = vrot.lane.b32.xlu1 %v4813_v18, %s4656_s24  ;;  %3956 = vmatpush3.bf16.msra.mxu0 %v307_v35 }
  0x98   : > { %932 = vrot.lane.b32.xlu0 %v4818_v19, %s4656_s24  ;;  %3957 = vmatprep.subr.bf16.mxu0 %v4652_v0 }
  0x99   : > { %v302_v36 = vpop.permute.xlu1 %301  ;;  %v300_v37 = vpop.permute.xlu0 %299 }
  0x9a   : > { %v309_v41 = vsel %vm303_vm2, %v300_v37, %v302_v36 }
  0x9b   : > { %849 = vrot.lane.b32.xlu1 %v4823_v20, %s4655_s23  ;;  %3958 = vmatpush3.bf16.msra.mxu0 %v308_v38 }
  0x9c   : > { %847 = vrot.lane.b32.xlu0 %v4828_v21, %s4655_s23  ;;  %3959 = vmatprep.subr.bf16.mxu0 %v4652_v0 }
  0x9d   : > { %v427_v39 = vpop.permute.xlu1 %426 }
  0x9e   : > { %v425_v40 = vpop.permute.xlu0 %424 }
  0x9f   : > { %938 = vrot.lane.b32.xlu1 %v4823_v20, %s4656_s24  ;;  %3960 = vmatpush3.bf16.msra.mxu0 %v309_v41  ;;  %v449_v45 = vsel %vm448_vm3, %v425_v40, %v427_v39 }
  0xa0   : > { %936 = vrot.lane.b32.xlu0 %v4828_v21, %s4656_s24  ;;  %3981 = vmatprep.subr.bf16.mxu0 %v4652_v0 }
  0xa1   : > { %v518_v43 = vpop.permute.xlu1 %517 }
  0xa2   : > { %v516_v44 = vpop.permute.xlu0 %515  ;;  %3962 = vmatmul.mubr.msk.bf16.vlgmr.msra.gmra.mrb[0].mxu0 %vm316_vm1, %v4524_v42 }
  0xa3   : > { %v540_v46 = vsel %vm539_vm4, %v516_v44, %v518_v43  ;;  %1087 = vrot.lane.b32.xlu1 %v4813_v18, %s4653_s20  ;;  %3982 = vmatpush3.bf16.msra.mxu0 %v449_v45  ;;  %v4540_v44 = vld [vmem:[%s6083_s1 + $0x8] sm:$0xff]  }
  0xa4   : > { %1085 = vrot.lane.b32.xlu0 %v4818_v19, %s4653_s20  ;;  %3998 = vmatpush3.bf16.msra.mxu1 %v540_v46  ;;  %v4541_v46 = vld [vmem:[%s6083_s1] sm:$0xff]  }
  0xa5   : > { %v431_v47 = vpop.permute.xlu1 %430  ;;  %3983 = vmatprep.subr.bf16.mxu0 %v4652_v0  ;;  %3999 = vmatprep.subr.bf16.mxu1 %v4652_v0 }
  0xa6   : > { %v429_v48 = vpop.permute.xlu0 %428  ;;  %3993 = vmatprep.mubr.msk.bf16.mxu0 %vm4654_vm0, %v4652_v0 }
  0xa7   : > { %v450_v49 = vsel %vm448_vm3, %v429_v48, %v431_v47  ;;  %1091 = vrot.lane.b32.xlu1 %v4823_v20, %s4653_s20 }
  0xa8   : > { %1089 = vrot.lane.b32.xlu0 %v4828_v21, %s4653_s20  ;;  %3984 = vmatpush3.bf16.msra.mxu0 %v450_v49 }
  0xa9   : > { %v522_v52 = vpop.permute.xlu1 %521  ;;  %3985 = vmatprep.subr.bf16.mxu0 %v4652_v0 }
  0xaa   : > { %v520_v53 = vpop.permute.xlu0 %519 }
  0xab   : > { %v541_v54 = vsel %vm539_vm4, %v520_v53, %v522_v52  ;;  %1095 = vrot.lane.b32.xlu1 %v4908_v50, %s4653_s20 }
  0xac   : > { %1093 = vrot.lane.b32.xlu0 %v4913_v51, %s4653_s20  ;;  %4000 = vmatpush3.bf16.msra.mxu1 %v541_v54 }
  0xad   : > { %v435_v57 = vpop.permute.xlu1 %434  ;;  %4001 = vmatprep.subr.bf16.mxu1 %v4652_v0 }
  0xae   : > { %v433_v58 = vpop.permute.xlu0 %432 }
  0xaf   : > { %v451_v59 = vsel %vm448_vm3, %v433_v58, %v435_v57  ;;  %1099 = vrot.lane.b32.xlu1 %v4920_v55, %s4653_s20  ;;  %v5076_v57 = vld [vmem:[%s4704_s19 + $0xe4] ss:$8 sps:$4 sm:$0xff]   ;;  %v5081_v58 = vld [vmem:[%s4704_s19 + $0xe0] ss:$8 sps:$4 sm:$0xff]  }
  0xb0   : > { %1097 = vrot.lane.b32.xlu0 %v4925_v56, %s4653_s20  ;;  %3986 = vmatpush3.bf16.msra.mxu0 %v451_v59 }
  0xb1   : > { %v526_v62 = vpop.permute.xlu1 %525  ;;  %3987 = vmatprep.subr.bf16.mxu0 %v4652_v0 }
  0xb2   : > { %v524_v63 = vpop.permute.xlu0 %523 }
  0xb3   : > { %v542_v1 = vsel %vm539_vm4, %v524_v63, %v526_v62  ;;  %1103 = vrot.lane.b32.xlu1 %v4932_v60, %s4653_s20 }
  0xb4   : > { %1101 = vrot.lane.b32.xlu0 %v4937_v61, %s4653_s20  ;;  %4002 = vmatpush3.bf16.msra.mxu1 %v542_v1  ;;  %v5088_v1 = vld [vmem:[%s4704_s19 + $0xf4] ss:$8 sps:$4 sm:$0xff]  }
  0xb5   : > { %v439_v4 = vpop.permute.xlu1 %438  ;;  %4003 = vmatprep.subr.bf16.mxu1 %v4652_v0 }
  0xb6   : > { %v437_v5 = vpop.permute.xlu0 %436 }
  0xb7   : > { %v452_v6 = vsel %vm448_vm3, %v437_v5, %v439_v4  ;;  %1107 = vrot.lane.b32.xlu1 %v4944_v2, %s4653_s20  ;;  %v5093_v4 = vld [vmem:[%s4704_s19 + $0xf0] ss:$8 sps:$4 sm:$0xff]  }
  0xb8   : > { %1105 = vrot.lane.b32.xlu0 %v4949_v3, %s4653_s20  ;;  %3988 = vmatpush3.bf16.msra.mxu0 %v452_v6 }
  0xb9   : > { %v530_v7 = vpop.permute.xlu1 %529  ;;  %3989 = vmatprep.subr.bf16.mxu0 %v4652_v0 }
  0xba   : > { %v528_v8 = vpop.permute.xlu0 %527 }
  0xbb   : > { %v543_v10 = vsel %vm539_vm4, %v528_v8, %v530_v7  ;;  %1229 = vrot.lane.b32.xlu1 %v4813_v18, %s4655_s23  ;;  %v5100_v8 = vld [vmem:[%s4704_s19 + $0x104] ss:$8 sps:$4 sm:$0xff]  }
  0xbc   : > { %1227 = vrot.lane.b32.xlu0 %v4818_v19, %s4655_s23  ;;  %4004 = vmatpush3.bf16.msra.mxu1 %v543_v10  ;;  %v5105_v10 = vld [vmem:[%s4704_s19 + $0x100] ss:$8 sps:$4 sm:$0xff]  }
  0xbd   : > { %v443_v12 = vpop.permute.xlu1 %442  ;;  %4005 = vmatprep.subr.bf16.mxu1 %v4652_v0 }
  0xbe   : > { %v441_v13 = vpop.permute.xlu0 %440 }
  0xbf   : > { %v453_v14 = vsel %vm448_vm3, %v441_v13, %v443_v12  ;;  %1318 = vrot.lane.b32.xlu1 %v4813_v18, %s4656_s24 }
  0xc0   : > { %1316 = vrot.lane.b32.xlu0 %v4818_v19, %s4656_s24  ;;  %3990 = vmatpush3.bf16.msra.mxu0 %v453_v14 }
  0xc1   : > { %v534_v16 = vpop.permute.xlu1 %533  ;;  %3991 = vmatprep.subr.bf16.mxu0 %v4652_v0 }
  0xc2   : > { %v532_v22 = vpop.permute.xlu0 %531 }
  0xc3   : > { %v544_v23 = vsel %vm539_vm4, %v532_v22, %v534_v16  ;;  %1233 = vrot.lane.b32.xlu1 %v4823_v20, %s4655_s23  ;;  %v5112_v16 = vld [vmem:[%s4704_s19 + $0x114] ss:$8 sps:$4 sm:$0xff]   ;;  %v5117_v22 = vld [vmem:[%s4704_s19 + $0x110] ss:$8 sps:$4 sm:$0xff]  }
  0xc4   : > { %1231 = vrot.lane.b32.xlu0 %v4828_v21, %s4655_s23  ;;  %4006 = vmatpush3.bf16.msra.mxu1 %v544_v23 }
  0xc5   : > { %v447_v24 = vpop.permute.xlu1 %446  ;;  %4007 = vmatprep.subr.bf16.mxu1 %v4652_v0 }
  0xc6   : > { %v445_v18 = vpop.permute.xlu0 %444 }
  0xc7   : > { %v454_v25 = vsel %vm448_vm3, %v445_v18, %v447_v24  ;;  %1322 = vrot.lane.b32.xlu1 %v4823_v20, %s4656_s24  ;;  %v4539_v20 = vld [vmem:[%s6083_s1 + $0x18] sm:$0xff]  }
  0xc8   : > { %1320 = vrot.lane.b32.xlu0 %v4828_v21, %s4656_s24  ;;  %3992 = vmatpush3.bf16.msra.mxu0 %v454_v25 }
  0xc9   : > { %v538_v27 = vpop.permute.xlu1 %537  ;;  %4013 = vmatprep.subr.bf16.mxu0 %v4652_v0 }
  0xca   : > { %v536_v28 = vpop.permute.xlu0 %535 }
  0xcb   : > { %v545_v29 = vsel %vm539_vm4, %v536_v28, %v538_v27  ;;  %1237 = vrot.lane.b32.xlu1 %v4908_v50, %s4655_s23  ;;  %3994 = vmatmul.mubr.msk.bf16.vlgmr.msra.gmra.mrb[4].mxu0 %vm316_vm1, %v4538_v26 }
  0xcc   : > { %1235 = vrot.lane.b32.xlu0 %v4913_v51, %s4655_s23  ;;  %4008 = vmatpush3.bf16.msra.mxu1 %v545_v29 }
  0xcd   : > { %v688_v30 = vpop.permute.xlu1 %687  ;;  %4029 = vmatprep.subr.bf16.mxu1 %v4652_v0  ;;  %4025 = vmatprep.mubr.msk.bf16.mxu0 %vm4654_vm0, %v4652_v0 }
  0xce   : > { %v686_v31 = vpop.permute.xlu0 %685 }
  0xcf   : > { %v709_v32 = vsel %vm303_vm2, %v686_v31, %v688_v30  ;;  %1326 = vrot.lane.b32.xlu1 %v4908_v50, %s4656_s24  ;;  %4010 = vmatmul.mubr.msk.bf16.vlgmr.msra.gmra.mrb[4].mxu1 %vm316_vm1, %v4539_v20 }
  0xd0   : > { %1324 = vrot.lane.b32.xlu0 %v4913_v51, %s4656_s24  ;;  %4014 = vmatpush3.bf16.msra.mxu0 %v709_v32 }
  0xd1   : > { %v692_v33 = vpop.permute.xlu1 %691  ;;  %4015 = vmatprep.subr.bf16.mxu0 %v4652_v0  ;;  %4030 = vmatpush3.bf16.msra.mxu1 %v4724_v9 }
  0xd2   : > { %v690_v34 = vpop.permute.xlu0 %689  ;;  %4031 = vmatprep.subr.bf16.mxu1 %v4652_v0  ;;  %4041 = vmatprep.mubr.msk.bf16.mxu1 %vm4654_vm0, %v4652_v0 }
  0xd3   : > { %v710_v35 = vsel %vm303_vm2, %v690_v34, %v692_v33  ;;  %1241 = vrot.lane.b32.xlu1 %v4920_v55, %s4655_s23 }
  0xd4   : > { %1239 = vrot.lane.b32.xlu0 %v4925_v56, %s4655_s23  ;;  %4016 = vmatpush3.bf16.msra.mxu0 %v710_v35  ;;  %v4554_v35 = vld [vmem:[%s6083_s1 + $0x10] sm:$0xff]  }
  0xd5   : > { %v696_v36 = vpop.permute.xlu1 %695  ;;  %4017 = vmatprep.subr.bf16.mxu0 %v4652_v0  ;;  %4032 = vmatpush3.bf16.msra.mxu1 %v4733_v11 }
  0xd6   : > { %v694_v9 = vpop.permute.xlu0 %693  ;;  %4033 = vmatprep.subr.bf16.mxu1 %v4652_v0 }
  0xd7   : > { %v711_v37 = vsel %vm303_vm2, %v694_v9, %v696_v36  ;;  %1330 = vrot.lane.b32.xlu1 %v4920_v55, %s4656_s24 }
  0xd8   : > { %1328 = vrot.lane.b32.xlu0 %v4925_v56, %s4656_s24  ;;  %4018 = vmatpush3.bf16.msra.mxu0 %v711_v37 }
  0xd9   : > { %v700_v38 = vpop.permute.xlu1 %699  ;;  %4019 = vmatprep.subr.bf16.mxu0 %v4652_v0  ;;  %4034 = vmatpush3.bf16.msra.mxu1 %v4802_v15 }
  0xda   : > { %v698_v39 = vpop.permute.xlu0 %697  ;;  %4035 = vmatprep.subr.bf16.mxu1 %v4652_v0 }
  0xdb   : > { %v712_v11 = vsel %vm303_vm2, %v698_v39, %v700_v38  ;;  %1245 = vrot.lane.b32.xlu1 %v4932_v60, %s4655_s23 }
  0xdc   : > { %1243 = vrot.lane.b32.xlu0 %v4937_v61, %s4655_s23  ;;  %4020 = vmatpush3.bf16.msra.mxu0 %v712_v11 }
  0xdd   : > { %v704_v40 = vpop.permute.xlu1 %703  ;;  %4021 = vmatprep.subr.bf16.mxu0 %v4652_v0  ;;  %4036 = vmatpush3.bf16.msra.mxu1 %v4809_v17 }
  0xde   : > { %v702_v41 = vpop.permute.xlu0 %701  ;;  %4037 = vmatprep.subr.bf16.mxu1 %v4652_v0 }
  0xdf   : > { %v713_v15 = vsel %vm303_vm2, %v702_v41, %v704_v40  ;;  %1334 = vrot.lane.b32.xlu1 %v4932_v60, %s4656_s24 }
  0xe0   : > { %1332 = vrot.lane.b32.xlu0 %v4937_v61, %s4656_s24  ;;  %4022 = vmatpush3.bf16.msra.mxu0 %v713_v15 }
  0xe1   : > { %v708_v42 = vpop.permute.xlu1 %707  ;;  %4023 = vmatprep.subr.bf16.mxu0 %v4652_v0  ;;  %4038 = vmatpush3.bf16.msra.mxu1 %v4818_v19 }
  0xe2   : > { %v706_v43 = vpop.permute.xlu0 %705  ;;  %4039 = vmatprep.subr.bf16.mxu1 %v4652_v0 }
  0xe3   : > { %v714_v17 = vsel %vm303_vm2, %v706_v43, %v708_v42  ;;  %1249 = vrot.lane.b32.xlu1 %v4944_v2, %s4655_s23 }
  0xe4   : > { %1247 = vrot.lane.b32.xlu0 %v4949_v3, %s4655_s23  ;;  %4024 = vmatpush3.bf16.msra.mxu0 %v714_v17 }
  0xe5   : > { %v830_v45 = vpop.permute.xlu1 %829  ;;  %4045 = vmatprep.subr.bf16.mxu0 %v4652_v0  ;;  %4040 = vmatpush3.bf16.msra.mxu1 %v4828_v21 }
  0xe6   : > { %v828_v47 = vpop.permute.xlu0 %827  ;;  %4061 = vmatprep.subr.bf16.mxu1 %v4652_v0 }
  0xe7   : > { %v851_v48 = vsel %vm448_vm3, %v828_v47, %v830_v45  ;;  %1338 = vrot.lane.b32.xlu1 %v4944_v2, %s4656_s24  ;;  %4026 = vmatmul.mubr.msk.bf16.vlgmr.msra.gmra.mrb[8].mxu0 %vm316_vm1, %v4540_v44 }
  0xe8   : > { %1336 = vrot.lane.b32.xlu0 %v4949_v3, %s4656_s24  ;;  %4046 = vmatpush3.bf16.msra.mxu0 %v851_v48 }
  0xe9   : > { %v919_v49 = vpop.permute.xlu1 %918  ;;  %4042 = vmatmul.mubr.msk.bf16.vlgmr.msra.gmra.mrb[8].mxu1 %vm316_vm1, %v4541_v46  ;;  %4047 = vmatprep.subr.bf16.mxu0 %v4652_v0 }
  0xea   : > { %v917_v50 = vpop.permute.xlu0 %916  ;;  %4057 = vmatprep.mubr.msk.bf16.mxu0 %vm4654_vm0, %v4652_v0  ;;  %4073 = vmatprep.mubr.msk.bf16.mxu1 %vm4654_vm0, %v4652_v0 }
  0xeb   : > { %v940_v52 = vsel %vm539_vm4, %v917_v50, %v919_v49  ;;  %1487 = vrot.lane.b32.xlu1 %v4932_v60, %s4653_s20  ;;  %v4556_v49 = vld [vmem:[%s6083_s1 + $0x8] sm:$0xff]  }
  0xec   : > { %1485 = vrot.lane.b32.xlu0 %v4937_v61, %s4653_s20  ;;  %4062 = vmatpush3.bf16.msra.mxu1 %v940_v52  ;;  %v4557_v52 = vld [vmem:[%s6083_s1] sm:$0xff]  }
  0xed   : > { %v834_v53 = vpop.permute.xlu1 %833  ;;  %4063 = vmatprep.subr.bf16.mxu1 %v4652_v0 }
  0xee   : > { %v832_v54 = vpop.permute.xlu0 %831 }
  0xef   : > { %v852_v55 = vsel %vm448_vm3, %v832_v54, %v834_v53  ;;  %1491 = vrot.lane.b32.xlu1 %v4944_v2, %s4653_s20 }
  0xf0   : > { %1489 = vrot.lane.b32.xlu0 %v4949_v3, %s4653_s20  ;;  %4048 = vmatpush3.bf16.msra.mxu0 %v852_v55 }
  0xf1   : > { %v923_v59 = vpop.permute.xlu1 %922  ;;  %4049 = vmatprep.subr.bf16.mxu0 %v4652_v0 }
  0xf2   : > { %v921_v62 = vpop.permute.xlu0 %920 }
  0xf3   : > { %v941_v63 = vsel %vm539_vm4, %v921_v62, %v923_v59  ;;  %1495 = vrot.lane.b32.xlu1 %v5076_v57, %s4653_s20 }
  0xf4   : > { %1493 = vrot.lane.b32.xlu0 %v5081_v58, %s4653_s20  ;;  %4064 = vmatpush3.bf16.msra.mxu1 %v941_v63 }
  0xf5   : > { %v838_v5 = vpop.permute.xlu1 %837  ;;  %4065 = vmatprep.subr.bf16.mxu1 %v4652_v0 }
  0xf6   : > { %v836_v6 = vpop.permute.xlu0 %835 }
  0xf7   : > { %v853_v7 = vsel %vm448_vm3, %v836_v6, %v838_v5  ;;  %1499 = vrot.lane.b32.xlu1 %v5088_v1, %s4653_s20  ;;  %v5244_v5 = vld [vmem:[%s4704_s19 + $0x124] ss:$8 sps:$4 sm:$0xff]   ;;  %v5249_v6 = vld [vmem:[%s4704_s19 + $0x120] ss:$8 sps:$4 sm:$0xff]  }
  0xf8   : > { %1497 = vrot.lane.b32.xlu0 %v5093_v4, %s4653_s20  ;;  %4050 = vmatpush3.bf16.msra.mxu0 %v853_v7 }
  0xf9   : > { %v927_v12 = vpop.permute.xlu1 %926  ;;  %4051 = vmatprep.subr.bf16.mxu0 %v4652_v0 }
  0xfa   : > { %v925_v13 = vpop.permute.xlu0 %924 }
  0xfb   : > { %v942_v14 = vsel %vm539_vm4, %v925_v13, %v927_v12  ;;  %1503 = vrot.lane.b32.xlu1 %v5100_v8, %s4653_s20 }
  0xfc   : > { %1501 = vrot.lane.b32.xlu0 %v5105_v10, %s4653_s20  ;;  %4066 = vmatpush3.bf16.msra.mxu1 %v942_v14  ;;  %v5256_v14 = vld [vmem:[%s4704_s19 + $0x134] ss:$8 sps:$4 sm:$0xff]  }
  0xfd   : > { %v842_v23 = vpop.permute.xlu1 %841  ;;  %4067 = vmatprep.subr.bf16.mxu1 %v4652_v0 }
  0xfe   : > { %v840_v24 = vpop.permute.xlu0 %839 }
  0xff   : > { %v854_v18 = vsel %vm448_vm3, %v840_v24, %v842_v23  ;;  %1507 = vrot.lane.b32.xlu1 %v5112_v16, %s4653_s20  ;;  %v5261_v23 = vld [vmem:[%s4704_s19 + $0x130] ss:$8 sps:$4 sm:$0xff]  }
 0x100   : > { %1505 = vrot.lane.b32.xlu0 %v5117_v22, %s4653_s20  ;;  %4052 = vmatpush3.bf16.msra.mxu0 %v854_v18 }
 0x101   : > { %v931_v25 = vpop.permute.xlu1 %930  ;;  %4053 = vmatprep.subr.bf16.mxu0 %v4652_v0 }
 0x102   : > { %v929_v26 = vpop.permute.xlu0 %928 }
 0x103   : > { %v943_v27 = vsel %vm539_vm4, %v929_v26, %v931_v25  ;;  %1629 = vrot.lane.b32.xlu1 %v4932_v60, %s4655_s23  ;;  %v5268_v26 = vld [vmem:[%s4704_s19 + $0x144] ss:$8 sps:$4 sm:$0xff]  }
 0x104   : > { %1627 = vrot.lane.b32.xlu0 %v4937_v61, %s4655_s23  ;;  %4068 = vmatpush3.bf16.msra.mxu1 %v943_v27  ;;  %v5273_v27 = vld [vmem:[%s4704_s19 + $0x140] ss:$8 sps:$4 sm:$0xff]  }
 0x105   : > { %v846_v28 = vpop.permute.xlu1 %845  ;;  %4069 = vmatprep.subr.bf16.mxu1 %v4652_v0 }
 0x106   : > { %v844_v29 = vpop.permute.xlu0 %843 }
 0x107   : > { %v855_v20 = vsel %vm448_vm3, %v844_v29, %v846_v28  ;;  %1718 = vrot.lane.b32.xlu1 %v4932_v60, %s4656_s24 }
 0x108   : > { %1716 = vrot.lane.b32.xlu0 %v4937_v61, %s4656_s24  ;;  %4054 = vmatpush3.bf16.msra.mxu0 %v855_v20 }
 0x109   : > { %v935_v30 = vpop.permute.xlu1 %934  ;;  %4055 = vmatprep.subr.bf16.mxu0 %v4652_v0 }
 0x10a   : > { %v933_v31 = vpop.permute.xlu0 %932 }
 0x10b   : > { %v944_v32 = vsel %vm539_vm4, %v933_v31, %v935_v30  ;;  %1633 = vrot.lane.b32.xlu1 %v4944_v2, %s4655_s23  ;;  %v5280_v30 = vld [vmem:[%s4704_s19 + $0x154] ss:$8 sps:$4 sm:$0xff]   ;;  %v5285_v31 = vld [vmem:[%s4704_s19 + $0x150] ss:$8 sps:$4 sm:$0xff]  }
 0x10c   : > { %1631 = vrot.lane.b32.xlu0 %v4949_v3, %s4655_s23  ;;  %4070 = vmatpush3.bf16.msra.mxu1 %v944_v32 }
 0x10d   : > { %v850_v33 = vpop.permute.xlu1 %849  ;;  %4071 = vmatprep.subr.bf16.mxu1 %v4652_v0 }
 0x10e   : > { %v848_v60 = vpop.permute.xlu0 %847 }
 0x10f   : > { %v856_v34 = vsel %vm448_vm3, %v848_v60, %v850_v33  ;;  %1722 = vrot.lane.b32.xlu1 %v4944_v2, %s4656_s24  ;;  %v4555_v2 = vld [vmem:[%s6083_s1 + $0x18] sm:$0xff]  }
 0x110   : > { %1720 = vrot.lane.b32.xlu0 %v4949_v3, %s4656_s24  ;;  %4056 = vmatpush3.bf16.msra.mxu0 %v856_v34 }
 0x111   : > { %v939_v36 = vpop.permute.xlu1 %938  ;;  %4077 = vmatprep.subr.bf16.mxu0 %v4652_v0 }
 0x112   : > { %v937_v9 = vpop.permute.xlu0 %936 }
 0x113   : > { %v945_v37 = vsel %vm539_vm4, %v937_v9, %v939_v36  ;;  %1637 = vrot.lane.b32.xlu1 %v5076_v57, %s4655_s23  ;;  %4058 = vmatmul.mubr.msk.bf16.vlgmr.msra.gmra.mrb[12].mxu0 %vm316_vm1, %v4554_v35 }
 0x114   : > { %1635 = vrot.lane.b32.xlu0 %v5081_v58, %s4655_s23  ;;  %4072 = vmatpush3.bf16.msra.mxu1 %v945_v37 }
 0x115   : > { %v1088_v38 = vpop.permute.xlu1 %1087  ;;  %4093 = vmatprep.subr.bf16.mxu1 %v4652_v0  ;;  %4089 = vmatprep.mubr.msk.bf16.mxu0 %vm4654_vm0, %v4652_v0 }
 0x116   : > { %v1086_v39 = vpop.permute.xlu0 %1085 }
 0x117   : > { %v1109_v11 = vsel %vm303_vm2, %v1086_v39, %v1088_v38  ;;  %1726 = vrot.lane.b32.xlu1 %v5076_v57, %s4656_s24  ;;  %4074 = vmatmul.mubr.msk.bf16.vlgmr.msra.gmra.mrb[12].mxu1 %vm316_vm1, %v4555_v2 }
 0x118   : > { %1724 = vrot.lane.b32.xlu0 %v5081_v58, %s4656_s24  ;;  %4078 = vmatpush3.bf16.msra.mxu0 %v1109_v11 }
 0x119   : > { %v1092_v40 = vpop.permute.xlu1 %1091  ;;  %4079 = vmatprep.subr.bf16.mxu0 %v4652_v0  ;;  %4094 = vmatpush3.bf16.msra.mxu1 %v4818_v19 }
 0x11a   : > { %v1090_v41 = vpop.permute.xlu0 %1089  ;;  %4095 = vmatprep.subr.bf16.mxu1 %v4652_v0  ;;  %4105 = vmatprep.mubr.msk.bf16.mxu1 %vm4654_vm0, %v4652_v0 }
 0x11b   : > { %v1110_v15 = vsel %vm303_vm2, %v1090_v41, %v1092_v40  ;;  %1641 = vrot.lane.b32.xlu1 %v5088_v1, %s4655_s23 }
 0x11c   : > { %1639 = vrot.lane.b32.xlu0 %v5093_v4, %s4655_s23  ;;  %4080 = vmatpush3.bf16.msra.mxu0 %v1110_v15  ;;  %v4570_v15 = vld [vmem:[%s6083_s1 + $0x10] sm:$0xff]  }
 0x11d   : > { %v1096_v42 = vpop.permute.xlu1 %1095  ;;  %4081 = vmatprep.subr.bf16.mxu0 %v4652_v0  ;;  %4096 = vmatpush3.bf16.msra.mxu1 %v4828_v21 }
 0x11e   : > { %v1094_v19 = vpop.permute.xlu0 %1093  ;;  %4097 = vmatprep.subr.bf16.mxu1 %v4652_v0 }
 0x11f   : > { %v1111_v43 = vsel %vm303_vm2, %v1094_v19, %v1096_v42  ;;  %1730 = vrot.lane.b32.xlu1 %v5088_v1, %s4656_s24 }
 0x120   : > { %1728 = vrot.lane.b32.xlu0 %v5093_v4, %s4656_s24  ;;  %4082 = vmatpush3.bf16.msra.mxu0 %v1111_v43 }
 0x121   : > { %v1100_v17 = vpop.permute.xlu1 %1099  ;;  %4083 = vmatprep.subr.bf16.mxu0 %v4652_v0  ;;  %4098 = vmatpush3.bf16.msra.mxu1 %v4913_v51 }
 0x122   : > { %v1098_v44 = vpop.permute.xlu0 %1097  ;;  %4099 = vmatprep.subr.bf16.mxu1 %v4652_v0 }
 0x123   : > { %v1112_v21 = vsel %vm303_vm2, %v1098_v44, %v1100_v17  ;;  %1645 = vrot.lane.b32.xlu1 %v5100_v8, %s4655_s23 }
 0x124   : > { %1643 = vrot.lane.b32.xlu0 %v5105_v10, %s4655_s23  ;;  %4084 = vmatpush3.bf16.msra.mxu0 %v1112_v21 }
 0x125   : > { %v1104_v45 = vpop.permute.xlu1 %1103  ;;  %4085 = vmatprep.subr.bf16.mxu0 %v4652_v0  ;;  %4100 = vmatpush3.bf16.msra.mxu1 %v4925_v56 }
 0x126   : > { %v1102_v46 = vpop.permute.xlu0 %1101  ;;  %4101 = vmatprep.subr.bf16.mxu1 %v4652_v0 }
 0x127   : > { %v1113_v51 = vsel %vm303_vm2, %v1102_v46, %v1104_v45  ;;  %1734 = vrot.lane.b32.xlu1 %v5100_v8, %s4656_s24 }
 0x128   : > { %1732 = vrot.lane.b32.xlu0 %v5105_v10, %s4656_s24  ;;  %4086 = vmatpush3.bf16.msra.mxu0 %v1113_v51 }
 0x129   : > { %v1108_v47 = vpop.permute.xlu1 %1107  ;;  %4087 = vmatprep.subr.bf16.mxu0 %v4652_v0  ;;  %4102 = vmatpush3.bf16.msra.mxu1 %v4937_v61 }
 0x12a   : > { %v1106_v48 = vpop.permute.xlu0 %1105  ;;  %4103 = vmatprep.subr.bf16.mxu1 %v4652_v0 }
 0x12b   : > { %v1114_v56 = vsel %vm303_vm2, %v1106_v48, %v1108_v47  ;;  %1649 = vrot.lane.b32.xlu1 %v5112_v16, %s4655_s23 }
 0x12c   : > { %1647 = vrot.lane.b32.xlu0 %v5117_v22, %s4655_s23  ;;  %4088 = vmatpush3.bf16.msra.mxu0 %v1114_v56 }
 0x12d   : > { %v1230_v50 = vpop.permute.xlu1 %1229  ;;  %4109 = vmatprep.subr.bf16.mxu0 %v4652_v0  ;;  %4104 = vmatpush3.bf16.msra.mxu1 %v4949_v3 }
 0x12e   : > { %v1228_v53 = vpop.permute.xlu0 %1227  ;;  %4125 = vmatprep.subr.bf16.mxu1 %v4652_v0 }
 0x12f   : > { %v1251_v54 = vsel %vm448_vm3, %v1228_v53, %v1230_v50  ;;  %1738 = vrot.lane.b32.xlu1 %v5112_v16, %s4656_s24  ;;  %4090 = vmatmul.mubr.msk.bf16.vlgmr.msra.gmra.mrb[16].mxu0 %vm316_vm1, %v4556_v49 }
 0x130   : > { %1736 = vrot.lane.b32.xlu0 %v5117_v22, %s4656_s24  ;;  %4110 = vmatpush3.bf16.msra.mxu0 %v1251_v54 }
 0x131   : > { %v1319_v55 = vpop.permute.xlu1 %1318  ;;  %4106 = vmatmul.mubr.msk.bf16.vlgmr.msra.gmra.mrb[16].mxu1 %vm316_vm1, %v4557_v52  ;;  %4111 = vmatprep.subr.bf16.mxu0 %v4652_v0 }
 0x132   : > { %v1317_v57 = vpop.permute.xlu0 %1316  ;;  %4121 = vmatprep.mubr.msk.bf16.mxu0 %vm4654_vm0, %v4652_v0  ;;  %4137 = vmatprep.mubr.msk.bf16.mxu1 %vm4654_vm0, %v4652_v0 }
 0x133   : > { %v1340_v59 = vsel %vm539_vm4, %v1317_v57, %v1319_v55  ;;  %1887 = vrot.lane.b32.xlu1 %v5100_v8, %s4653_s20  ;;  %v4572_v55 = vld [vmem:[%s6083_s1 + $0x8] sm:$0xff]  }
 0x134   : > { %1885 = vrot.lane.b32.xlu0 %v5105_v10, %s4653_s20  ;;  %4126 = vmatpush3.bf16.msra.mxu1 %v1340_v59  ;;  %v4573_v59 = vld [vmem:[%s6083_s1] sm:$0xff]  }
 0x135   : > { %v1234_v62 = vpop.permute.xlu1 %1233  ;;  %4127 = vmatprep.subr.bf16.mxu1 %v4652_v0 }
 0x136   : > { %v1232_v63 = vpop.permute.xlu0 %1231 }
 0x137   : > { %v1252_v1 = vsel %vm448_vm3, %v1232_v63, %v1234_v62  ;;  %1891 = vrot.lane.b32.xlu1 %v5112_v16, %s4653_s20 }
 0x138   : > { %1889 = vrot.lane.b32.xlu0 %v5117_v22, %s4653_s20  ;;  %4112 = vmatpush3.bf16.msra.mxu0 %v1252_v1 }
 0x139   : > { %v1323_v7 = vpop.permute.xlu1 %1322  ;;  %4113 = vmatprep.subr.bf16.mxu0 %v4652_v0 }
 0x13a   : > { %v1321_v12 = vpop.permute.xlu0 %1320 }
 0x13b   : > { %v1341_v13 = vsel %vm539_vm4, %v1321_v12, %v1323_v7  ;;  %1895 = vrot.lane.b32.xlu1 %v5244_v5, %s4653_s20 }
 0x13c   : > { %1893 = vrot.lane.b32.xlu0 %v5249_v6, %s4653_s20  ;;  %4128 = vmatpush3.bf16.msra.mxu1 %v1341_v13 }
 0x13d   : > { %v1238_v24 = vpop.permute.xlu1 %1237  ;;  %4129 = vmatprep.subr.bf16.mxu1 %v4652_v0 }
 0x13e   : > { %v1236_v18 = vpop.permute.xlu0 %1235 }
 0x13f   : > { %v1253_v25 = vsel %vm448_vm3, %v1236_v18, %v1238_v24  ;;  %1899 = vrot.lane.b32.xlu1 %v5256_v14, %s4653_s20  ;;  %v5412_v24 = vld [vmem:[%s4704_s19 + $0x164] ss:$8 sps:$4 sm:$0xff]   ;;  %v5417_v18 = vld [vmem:[%s4704_s19 + $0x160] ss:$8 sps:$4 sm:$0xff]  }
 0x140   : > { %1897 = vrot.lane.b32.xlu0 %v5261_v23, %s4653_s20  ;;  %4114 = vmatpush3.bf16.msra.mxu0 %v1253_v25 }
 0x141   : > { %v1327_v28 = vpop.permute.xlu1 %1326  ;;  %4115 = vmatprep.subr.bf16.mxu0 %v4652_v0 }
 0x142   : > { %v1325_v29 = vpop.permute.xlu0 %1324 }
 0x143   : > { %v1342_v20 = vsel %vm539_vm4, %v1325_v29, %v1327_v28  ;;  %1903 = vrot.lane.b32.xlu1 %v5268_v26, %s4653_s20 }
 0x144   : > { %1901 = vrot.lane.b32.xlu0 %v5273_v27, %s4653_s20  ;;  %4130 = vmatpush3.bf16.msra.mxu1 %v1342_v20  ;;  %v5424_v20 = vld [vmem:[%s4704_s19 + $0x174] ss:$8 sps:$4 sm:$0xff]  }
 0x145   : > { %v1242_v32 = vpop.permute.xlu1 %1241  ;;  %4131 = vmatprep.subr.bf16.mxu1 %v4652_v0 }
 0x146   : > { %v1240_v33 = vpop.permute.xlu0 %1239 }
 0x147   : > { %v1254_v60 = vsel %vm448_vm3, %v1240_v33, %v1242_v32  ;;  %1907 = vrot.lane.b32.xlu1 %v5280_v30, %s4653_s20  ;;  %v5429_v32 = vld [vmem:[%s4704_s19 + $0x170] ss:$8 sps:$4 sm:$0xff]  }
 0x148   : > { %1905 = vrot.lane.b32.xlu0 %v5285_v31, %s4653_s20  ;;  %4116 = vmatpush3.bf16.msra.mxu0 %v1254_v60 }
 0x149   : > { %v1331_v34 = vpop.permute.xlu1 %1330  ;;  %4117 = vmatprep.subr.bf16.mxu0 %v4652_v0 }
 0x14a   : > { %v1329_v35 = vpop.permute.xlu0 %1328 }
 0x14b   : > { %v1343_v36 = vsel %vm539_vm4, %v1329_v35, %v1331_v34  ;;  %2029 = vrot.lane.b32.xlu1 %v5100_v8, %s4655_s23  ;;  %v5436_v35 = vld [vmem:[%s4704_s19 + $0x184] ss:$8 sps:$4 sm:$0xff]  }
 0x14c   : > { %2027 = vrot.lane.b32.xlu0 %v5105_v10, %s4655_s23  ;;  %4132 = vmatpush3.bf16.msra.mxu1 %v1343_v36  ;;  %v5441_v36 = vld [vmem:[%s4704_s19 + $0x180] ss:$8 sps:$4 sm:$0xff]  }
 0x14d   : > { %v1246_v9 = vpop.permute.xlu1 %1245  ;;  %4133 = vmatprep.subr.bf16.mxu1 %v4652_v0 }
 0x14e   : > { %v1244_v37 = vpop.permute.xlu0 %1243 }
 0x14f   : > { %v1255_v2 = vsel %vm448_vm3, %v1244_v37, %v1246_v9  ;;  %2118 = vrot.lane.b32.xlu1 %v5100_v8, %s4656_s24 }
 0x150   : > { %2116 = vrot.lane.b32.xlu0 %v5105_v10, %s4656_s24  ;;  %4118 = vmatpush3.bf16.msra.mxu0 %v1255_v2 }
 0x151   : > { %v1335_v38 = vpop.permute.xlu1 %1334  ;;  %4119 = vmatprep.subr.bf16.mxu0 %v4652_v0 }
 0x152   : > { %v1333_v39 = vpop.permute.xlu0 %1332 }
 0x153   : > { %v1344_v11 = vsel %vm539_vm4, %v1333_v39, %v1335_v38  ;;  %2033 = vrot.lane.b32.xlu1 %v5112_v16, %s4655_s23  ;;  %v5448_v38 = vld [vmem:[%s4704_s19 + $0x194] ss:$8 sps:$4 sm:$0xff]   ;;  %v5453_v39 = vld [vmem:[%s4704_s19 + $0x190] ss:$8 sps:$4 sm:$0xff]  }
 0x154   : > { %2031 = vrot.lane.b32.xlu0 %v5117_v22, %s4655_s23  ;;  %4134 = vmatpush3.bf16.msra.mxu1 %v1344_v11 }
 0x155   : > { %v1250_v40 = vpop.permute.xlu1 %1249  ;;  %4135 = vmatprep.subr.bf16.mxu1 %v4652_v0 }
 0x156   : > { %v1248_v8 = vpop.permute.xlu0 %1247 }
 0x157   : > { %v1256_v41 = vsel %vm448_vm3, %v1248_v8, %v1250_v40  ;;  %2122 = vrot.lane.b32.xlu1 %v5112_v16, %s4656_s24  ;;  %v4571_v16 = vld [vmem:[%s6083_s1 + $0x18] sm:$0xff]  }
 0x158   : > { %2120 = vrot.lane.b32.xlu0 %v5117_v22, %s4656_s24  ;;  %4120 = vmatpush3.bf16.msra.mxu0 %v1256_v41 }
 0x159   : > { %v1339_v42 = vpop.permute.xlu1 %1338  ;;  %4141 = vmatprep.subr.bf16.mxu0 %v4652_v0 }
 0x15a   : > { %v1337_v19 = vpop.permute.xlu0 %1336 }
 0x15b   : > { %v1345_v43 = vsel %vm539_vm4, %v1337_v19, %v1339_v42  ;;  %2037 = vrot.lane.b32.xlu1 %v5244_v5, %s4655_s23  ;;  %4122 = vmatmul.mubr.msk.bf16.vlgmr.msra.gmra.mrb[20].mxu0 %vm316_vm1, %v4570_v15 }
 0x15c   : > { %2035 = vrot.lane.b32.xlu0 %v5249_v6, %s4655_s23  ;;  %4136 = vmatpush3.bf16.msra.mxu1 %v1345_v43 }
 0x15d   : > { %v1488_v17 = vpop.permute.xlu1 %1487  ;;  %4157 = vmatprep.subr.bf16.mxu1 %v4652_v0  ;;  %4153 = vmatprep.mubr.msk.bf16.mxu0 %vm4654_vm0, %v4652_v0 }
 0x15e   : > { %v1486_v44 = vpop.permute.xlu0 %1485 }
 0x15f   : > { %v1509_v21 = vsel %vm303_vm2, %v1486_v44, %v1488_v17  ;;  %2126 = vrot.lane.b32.xlu1 %v5244_v5, %s4656_s24  ;;  %4138 = vmatmul.mubr.msk.bf16.vlgmr.msra.gmra.mrb[20].mxu1 %vm316_vm1, %v4571_v16 }
 0x160   : > { %2124 = vrot.lane.b32.xlu0 %v5249_v6, %s4656_s24  ;;  %4142 = vmatpush3.bf16.msra.mxu0 %v1509_v21 }
 0x161   : > { %v1492_v45 = vpop.permute.xlu1 %1491  ;;  %4143 = vmatprep.subr.bf16.mxu0 %v4652_v0  ;;  %4158 = vmatpush3.bf16.msra.mxu1 %v4937_v61 }
 0x162   : > { %v1490_v46 = vpop.permute.xlu0 %1489  ;;  %4159 = vmatprep.subr.bf16.mxu1 %v4652_v0  ;;  %4169 = vmatprep.mubr.msk.bf16.mxu1 %vm4654_vm0, %v4652_v0 }
 0x163   : > { %v1510_v51 = vsel %vm303_vm2, %v1490_v46, %v1492_v45  ;;  %2041 = vrot.lane.b32.xlu1 %v5256_v14, %s4655_s23 }
 0x164   : > { %2039 = vrot.lane.b32.xlu0 %v5261_v23, %s4655_s23  ;;  %4144 = vmatpush3.bf16.msra.mxu0 %v1510_v51  ;;  %v4586_v51 = vld [vmem:[%s6083_s1 + $0x10] sm:$0xff]  }
 0x165   : > { %v1496_v47 = vpop.permute.xlu1 %1495  ;;  %4145 = vmatprep.subr.bf16.mxu0 %v4652_v0  ;;  %4160 = vmatpush3.bf16.msra.mxu1 %v4949_v3 }
 0x166   : > { %v1494_v61 = vpop.permute.xlu0 %1493  ;;  %4161 = vmatprep.subr.bf16.mxu1 %v4652_v0 }
 0x167   : > { %v1511_v48 = vsel %vm303_vm2, %v1494_v61, %v1496_v47  ;;  %2130 = vrot.lane.b32.xlu1 %v5256_v14, %s4656_s24 }
 0x168   : > { %2128 = vrot.lane.b32.xlu0 %v5261_v23, %s4656_s24  ;;  %4146 = vmatpush3.bf16.msra.mxu0 %v1511_v48 }
 0x169   : > { %v1500_v56 = vpop.permute.xlu1 %1499  ;;  %4147 = vmatprep.subr.bf16.mxu0 %v4652_v0  ;;  %4162 = vmatpush3.bf16.msra.mxu1 %v5081_v58 }
 0x16a   : > { %v1498_v49 = vpop.permute.xlu0 %1497  ;;  %4163 = vmatprep.subr.bf16.mxu1 %v4652_v0 }
 0x16b   : > { %v1512_v3 = vsel %vm303_vm2, %v1498_v49, %v1500_v56  ;;  %2045 = vrot.lane.b32.xlu1 %v5268_v26, %s4655_s23 }
 0x16c   : > { %2043 = vrot.lane.b32.xlu0 %v5273_v27, %s4655_s23  ;;  %4148 = vmatpush3.bf16.msra.mxu0 %v1512_v3 }
 0x16d   : > { %v1504_v50 = vpop.permute.xlu1 %1503  ;;  %4149 = vmatprep.subr.bf16.mxu0 %v4652_v0  ;;  %4164 = vmatpush3.bf16.msra.mxu1 %v5093_v4 }
 0x16e   : > { %v1502_v52 = vpop.permute.xlu0 %1501  ;;  %4165 = vmatprep.subr.bf16.mxu1 %v4652_v0 }
 0x16f   : > { %v1513_v58 = vsel %vm303_vm2, %v1502_v52, %v1504_v50  ;;  %2134 = vrot.lane.b32.xlu1 %v5268_v26, %s4656_s24 }
 0x170   : > { %2132 = vrot.lane.b32.xlu0 %v5273_v27, %s4656_s24  ;;  %4150 = vmatpush3.bf16.msra.mxu0 %v1513_v58 }
 0x171   : > { %v1508_v53 = vpop.permute.xlu1 %1507  ;;  %4151 = vmatprep.subr.bf16.mxu0 %v4652_v0  ;;  %4166 = vmatpush3.bf16.msra.mxu1 %v5105_v10 }
 0x172   : > { %v1506_v54 = vpop.permute.xlu0 %1505  ;;  %4167 = vmatprep.subr.bf16.mxu1 %v4652_v0 }
 0x173   : > { %v1514_v4 = vsel %vm303_vm2, %v1506_v54, %v1508_v53  ;;  %2049 = vrot.lane.b32.xlu1 %v5280_v30, %s4655_s23 }
 0x174   : > { %2047 = vrot.lane.b32.xlu0 %v5285_v31, %s4655_s23  ;;  %4152 = vmatpush3.bf16.msra.mxu0 %v1514_v4 }
 0x175   : > { %v1630_v57 = vpop.permute.xlu1 %1629  ;;  %4173 = vmatprep.subr.bf16.mxu0 %v4652_v0  ;;  %4168 = vmatpush3.bf16.msra.mxu1 %v5117_v22  ;;  %v354_v53 = vpop.f32.mrb[0].mxu0 }
 0x176   : > { %v1628_v62 = vpop.permute.xlu0 %1627  ;;  %4189 = vmatprep.subr.bf16.mxu1 %v4652_v0 }
 0x177   : > { %v1651_v63 = vsel %vm448_vm3, %v1628_v62, %v1630_v57  ;;  %2138 = vrot.lane.b32.xlu1 %v5280_v30, %s4656_s24  ;;  %4154 = vmatmul.mubr.msk.bf16.vlgmr.msra.gmra.mrb[24].mxu0 %vm316_vm1, %v4572_v55 }
 0x178   : > { %2136 = vrot.lane.b32.xlu0 %v5285_v31, %s4656_s24  ;;  %4174 = vmatpush3.bf16.msra.mxu0 %v1651_v63 }
 0x179   : > { %v1719_v1 = vpop.permute.xlu1 %1718  ;;  %4170 = vmatmul.mubr.msk.bf16.vlgmr.msra.gmra.mrb[24].mxu1 %vm316_vm1, %v4573_v59  ;;  %4175 = vmatprep.subr.bf16.mxu0 %v4652_v0  ;;  %v409_v59 = vpop.f32.mrb[0].mxu1 }
 0x17a   : > { %v1717_v5 = vpop.permute.xlu0 %1716  ;;  %4185 = vmatprep.mubr.msk.bf16.mxu0 %vm4654_vm0, %v4652_v0  ;;  %4201 = vmatprep.mubr.msk.bf16.mxu1 %vm4654_vm0, %v4652_v0  ;;  %v410_v62 = vadd.f32 %v409_v59, %v354_v53  ;;  %v5608_v53 = vld [vmem:[%s4704_s19 + $0x1c4] ss:$8 sps:$4 sm:$0xff]   ;;  %v5625_v59 = vld [vmem:[%s4704_s19 + $0x1d0] ss:$8 sps:$4 sm:$0xff]  }
 0x17b   : > { %v1740_v7 = vsel %vm539_vm4, %v1717_v5, %v1719_v1  ;;  %2287 = vrot.lane.b32.xlu1 %v5268_v26, %s4653_s20  ;;  %v3979_v1 = vpop.f32.mrb[1].mxu1 }
 0x17c   : > { %2285 = vrot.lane.b32.xlu0 %v5273_v27, %s4653_s20  ;;  %4190 = vmatpush3.bf16.msra.mxu1 %v1740_v7 }
 0x17d   : > { %v1634_v12 = vpop.permute.xlu1 %1633  ;;  %4191 = vmatprep.subr.bf16.mxu1 %v4652_v0 }
 0x17e   : > { %v1632_v13 = vpop.permute.xlu0 %1631 }
 0x17f   : > { %v1652_v14 = vsel %vm448_vm3, %v1632_v13, %v1634_v12  ;;  %2291 = vrot.lane.b32.xlu1 %v5280_v30, %s4653_s20 }
 0x180   : > { %2289 = vrot.lane.b32.xlu0 %v5285_v31, %s4653_s20  ;;  %4176 = vmatpush3.bf16.msra.mxu0 %v1652_v14 }
 0x181   : > { %v1723_v25 = vpop.permute.xlu1 %1722  ;;  %4177 = vmatprep.subr.bf16.mxu0 %v4652_v0 }
 0x182   : > { %v1721_v28 = vpop.permute.xlu0 %1720 }
 0x183   : > { %v1741_v29 = vsel %vm539_vm4, %v1721_v28, %v1723_v25  ;;  %2295 = vrot.lane.b32.xlu1 %v5412_v24, %s4653_s20 }
 0x184   : > { %2293 = vrot.lane.b32.xlu0 %v5417_v18, %s4653_s20  ;;  %4192 = vmatpush3.bf16.msra.mxu1 %v1741_v29 }
 0x185   : > { %v1638_v33 = vpop.permute.xlu1 %1637  ;;  %4193 = vmatprep.subr.bf16.mxu1 %v4652_v0 }
 0x186   : > { %v1636_v60 = vpop.permute.xlu0 %1635 }
 0x187   : > { %v1653_v34 = vsel %vm448_vm3, %v1636_v60, %v1638_v33  ;;  %2299 = vrot.lane.b32.xlu1 %v5424_v20, %s4653_s20 }
 0x188   : > { %2297 = vrot.lane.b32.xlu0 %v5429_v32, %s4653_s20  ;;  %4178 = vmatpush3.bf16.msra.mxu0 %v1653_v34 }
 0x189   : > { %v1727_v9 = vpop.permute.xlu1 %1726  ;;  %4179 = vmatprep.subr.bf16.mxu0 %v4652_v0 }
 0x18a   : > { %v1725_v37 = vpop.permute.xlu0 %1724 }
 0x18b   : > { %v1742_v2 = vsel %vm539_vm4, %v1725_v37, %v1727_v9  ;;  %2303 = vrot.lane.b32.xlu1 %v5436_v35, %s4653_s20 }
 0x18c   : > { %2301 = vrot.lane.b32.xlu0 %v5441_v36, %s4653_s20  ;;  %4194 = vmatpush3.bf16.msra.mxu1 %v1742_v2 }
 0x18d   : > { %v1642_v11 = vpop.permute.xlu1 %1641  ;;  %4195 = vmatprep.subr.bf16.mxu1 %v4652_v0 }
 0x18e   : > { %v1640_v40 = vpop.permute.xlu0 %1639 }
 0x18f   : > { %v1654_v8 = vsel %vm448_vm3, %v1640_v40, %v1642_v11  ;;  %2307 = vrot.lane.b32.xlu1 %v5448_v38, %s4653_s20 }
 0x190   : > { %2305 = vrot.lane.b32.xlu0 %v5453_v39, %s4653_s20  ;;  %4180 = vmatpush3.bf16.msra.mxu0 %v1654_v8 }
 0x191   : > { %v1731_v41 = vpop.permute.xlu1 %1730  ;;  %4181 = vmatprep.subr.bf16.mxu0 %v4652_v0 }
 0x192   : > { %v1729_v15 = vpop.permute.xlu0 %1728 }
 0x193   : > { %v1743_v42 = vsel %vm539_vm4, %v1729_v15, %v1731_v41  ;;  %2429 = vrot.lane.b32.xlu1 %v5268_v26, %s4655_s23 }
 0x194   : > { %2427 = vrot.lane.b32.xlu0 %v5273_v27, %s4655_s23  ;;  %4196 = vmatpush3.bf16.msra.mxu1 %v1743_v42  ;;  %v4588_v42 = vld [vmem:[%s6083_s1 + $0x8] sm:$0xff]  }
 0x195   : > { %v1646_v19 = vpop.permute.xlu1 %1645  ;;  %4197 = vmatprep.subr.bf16.mxu1 %v4652_v0 }
 0x196   : > { %v1644_v43 = vpop.permute.xlu0 %1643 }
 0x197   : > { %v1655_v16 = vsel %vm448_vm3, %v1644_v43, %v1646_v19  ;;  %2518 = vrot.lane.b32.xlu1 %v5268_v26, %s4656_s24  ;;  %v4589_v43 = vld [vmem:[%s6083_s1] sm:$0xff]  }
 0x198   : > { %2516 = vrot.lane.b32.xlu0 %v5273_v27, %s4656_s24  ;;  %4182 = vmatpush3.bf16.msra.mxu0 %v1655_v16 }
 0x199   : > { %v1735_v17 = vpop.permute.xlu1 %1734  ;;  %4183 = vmatprep.subr.bf16.mxu0 %v4652_v0 }
 0x19a   : > { %v1733_v44 = vpop.permute.xlu0 %1732 }
 0x19b   : > { %v1744_v21 = vsel %vm539_vm4, %v1733_v44, %v1735_v17  ;;  %2433 = vrot.lane.b32.xlu1 %v5280_v30, %s4655_s23 }
 0x19c   : > { %2431 = vrot.lane.b32.xlu0 %v5285_v31, %s4655_s23  ;;  %4198 = vmatpush3.bf16.msra.mxu1 %v1744_v21 }
 0x19d   : > { %v1650_v45 = vpop.permute.xlu1 %1649  ;;  %4199 = vmatprep.subr.bf16.mxu1 %v4652_v0 }
 0x19e   : > { %v1648_v26 = vpop.permute.xlu0 %1647 }
 0x19f   : > { %v1656_v46 = vsel %vm448_vm3, %v1648_v26, %v1650_v45  ;;  %2522 = vrot.lane.b32.xlu1 %v5280_v30, %s4656_s24  ;;  %v4587_v30 = vld [vmem:[%s6083_s1 + $0x18] sm:$0xff]  }
 0x1a0   : > { %2520 = vrot.lane.b32.xlu0 %v5285_v31, %s4656_s24  ;;  %4184 = vmatpush3.bf16.msra.mxu0 %v1656_v46 }
 0x1a1   : > { %v1739_v47 = vpop.permute.xlu1 %1738  ;;  %4205 = vmatprep.subr.bf16.mxu0 %v4652_v0 }
 0x1a2   : > { %v1737_v61 = vpop.permute.xlu0 %1736 }
 0x1a3   : > { %v1745_v48 = vsel %vm539_vm4, %v1737_v61, %v1739_v47  ;;  %2437 = vrot.lane.b32.xlu1 %v5412_v24, %s4655_s23  ;;  %4186 = vmatmul.mubr.msk.bf16.vlgmr.msra.gmra.mrb[28].mxu0 %vm316_vm1, %v4586_v51  ;;  %v5584_v47 = vld [vmem:[%s4704_s19 + $0x1a4] ss:$8 sps:$4 sm:$0xff]   ;;  %v5589_v61 = vld [vmem:[%s4704_s19 + $0x1a0] ss:$8 sps:$4 sm:$0xff]  }
 0x1a4   : > { %2435 = vrot.lane.b32.xlu0 %v5417_v18, %s4655_s23  ;;  %4200 = vmatpush3.bf16.msra.mxu1 %v1745_v48 }
 0x1a5   : > { %v1888_v56 = vpop.permute.xlu1 %1887  ;;  %4221 = vmatprep.subr.bf16.mxu1 %v4652_v0  ;;  %4217 = vmatprep.mubr.msk.bf16.mxu0 %vm4654_vm0, %v4652_v0 }
 0x1a6   : > { %v1886_v49 = vpop.permute.xlu0 %1885 }
 0x1a7   : > { %v1909_v3 = vsel %vm303_vm2, %v1886_v49, %v1888_v56  ;;  %2526 = vrot.lane.b32.xlu1 %v5412_v24, %s4656_s24  ;;  %4202 = vmatmul.mubr.msk.bf16.vlgmr.msra.gmra.mrb[28].mxu1 %vm316_vm1, %v4587_v30  ;;  %v5596_v49 = vld [vmem:[%s4704_s19 + $0x1b4] ss:$8 sps:$4 sm:$0xff]  }
 0x1a8   : > { %2524 = vrot.lane.b32.xlu0 %v5417_v18, %s4656_s24  ;;  %4206 = vmatpush3.bf16.msra.mxu0 %v1909_v3  ;;  %v5601_v3 = vld [vmem:[%s4704_s19 + $0x1b0] ss:$8 sps:$4 sm:$0xff]  }
 0x1a9   : > { %v1892_v50 = vpop.permute.xlu1 %1891  ;;  %4207 = vmatprep.subr.bf16.mxu0 %v4652_v0  ;;  %4222 = vmatpush3.bf16.msra.mxu1 %v5105_v10  ;;  %v3963_v10 = vpop.f32.mrb[1].mxu0 }
 0x1aa   : > { %v1890_v52 = vpop.permute.xlu0 %1889  ;;  %4223 = vmatprep.subr.bf16.mxu1 %v4652_v0  ;;  %4233 = vmatprep.mubr.msk.bf16.mxu1 %vm4654_vm0, %v4652_v0  ;;  %v357_v57 = vpop.f32.mrb[2].mxu0 }
 0x1ab   : > { %v1910_v58 = vsel %vm303_vm2, %v1890_v52, %v1892_v50  ;;  %2441 = vrot.lane.b32.xlu1 %v5424_v20, %s4655_s23  ;;  %v3964_v63 = vpop.f32.mrb[3].mxu0 }
 0x1ac   : > { %2439 = vrot.lane.b32.xlu0 %v5429_v32, %s4655_s23  ;;  %4208 = vmatpush3.bf16.msra.mxu0 %v1910_v58  ;;  %v498_v13 = vpop.f32.mrb[4].mxu0  ;;  %v4657_v63 = vmov 0  }
 0x1ad   : > { %v1896_v54 = vpop.permute.xlu1 %1895  ;;  %4209 = vmatprep.subr.bf16.mxu0 %v4652_v0  ;;  %4224 = vmatpush3.bf16.msra.mxu1 %v5117_v22  ;;  %v412_v22 = vpop.f32.mrb[2].mxu1  ;;  %v505_v24 = vadd.f32 %v498_v13, %v410_v62 }
 0x1ae   : > { %v1894_v4 = vpop.permute.xlu0 %1893  ;;  %4225 = vmatprep.subr.bf16.mxu1 %v4652_v0  ;;  %v413_v12 = vadd.f32 %v412_v22, %v357_v57  ;;  %v3995_v25 = vpop.f32.mrb[5].mxu0  ;;  %v5620_v57 = vld [vmem:[%s4704_s19 + $0x1d4] ss:$8 sps:$4 sm:$0xff]   ;;  %4493 = vset.pattern.permute.xlu1 %v4657_v63 }
 0x1af   : > { %v1911_v55 = vsel %vm303_vm2, %v1894_v4, %v1896_v54  ;;  %2530 = vrot.lane.b32.xlu1 %v5424_v20, %s4656_s24  ;;  %v3980_v28 = vpop.f32.mrb[3].mxu1  ;;  %v501_v29 = vpop.f32.mrb[6].mxu0  ;;  %v5613_v54 = vld [vmem:[%s4704_s19 + $0x1c0] ss:$8 sps:$4 sm:$0xff]   ;;  %4492 = vset.pattern.permute.xlu0 %v4657_v63 }
 0x1b0   : > { %2528 = vrot.lane.b32.xlu0 %v5429_v32, %s4656_s24  ;;  %4210 = vmatpush3.bf16.msra.mxu0 %v1911_v55  ;;  %v506_v33 = vadd.f32 %v501_v29, %v413_v12  ;;  %v3996_v40 = vpop.f32.mrb[7].mxu0 }
 0x1b1   : > { %v1900_v5 = vpop.permute.xlu1 %1899  ;;  %4211 = vmatprep.subr.bf16.mxu0 %v4652_v0  ;;  %4226 = vmatpush3.bf16.msra.mxu1 %v5249_v6  ;;  %v589_v6 = vpop.f32.mrb[4].mxu1 }
 0x1b2   : > { %v1898_v7 = vpop.permute.xlu0 %1897  ;;  %4227 = vmatprep.subr.bf16.mxu1 %v4652_v0  ;;  %v5535_v60 = vadd.f32 %v589_v6, %v505_v24  ;;  %v4011_v34 = vpop.f32.mrb[5].mxu1 }
 0x1b3   : > { %v1912_v14 = vsel %vm303_vm2, %v1898_v7, %v1900_v5  ;;  %2445 = vrot.lane.b32.xlu1 %v5436_v35, %s4655_s23  ;;  %v592_v37 = vpop.f32.mrb[6].mxu1 }
 0x1b4   : > { %2443 = vrot.lane.b32.xlu0 %v5441_v36, %s4655_s23  ;;  %4212 = vmatpush3.bf16.msra.mxu0 %v1912_v14  ;;  %v5541_v11 = vadd.f32 %v592_v37, %v506_v33  ;;  %v4012_v8 = vpop.f32.mrb[7].mxu1 }
 0x1b5   : > { %v1904_v20 = vpop.permute.xlu1 %1903  ;;  %4213 = vmatprep.subr.bf16.mxu0 %v4652_v0  ;;  %4228 = vmatpush3.bf16.msra.mxu1 %v5261_v23 }
 0x1b6   : > { %v1902_v9 = vpop.permute.xlu0 %1901  ;;  %4229 = vmatprep.subr.bf16.mxu1 %v4652_v0 }
 0x1b7   : > { %v1913_v2 = vsel %vm303_vm2, %v1902_v9, %v1904_v20  ;;  %2534 = vrot.lane.b32.xlu1 %v5436_v35, %s4656_s24 }
 0x1b8   : > { %2532 = vrot.lane.b32.xlu0 %v5441_v36, %s4656_s24  ;;  %4214 = vmatpush3.bf16.msra.mxu0 %v1913_v2 }
 0x1b9   : > { %v1908_v23 = vpop.permute.xlu1 %1907  ;;  %4215 = vmatprep.subr.bf16.mxu0 %v4652_v0  ;;  %4230 = vmatpush3.bf16.msra.mxu1 %v5273_v27 }
 0x1ba   : > { %v1906_v41 = vpop.permute.xlu0 %1905  ;;  %4231 = vmatprep.subr.bf16.mxu1 %v4652_v0  ;;  %v758_v13 = vpop.f32.mrb[8].mxu0 }
 0x1bb   : > { %v1914_v15 = vsel %vm303_vm2, %v1906_v41, %v1908_v23  ;;  %2449 = vrot.lane.b32.xlu1 %v5448_v38, %s4655_s23  ;;  %v4027_v24 = vpop.f32.mrb[9].mxu0 }
 0x1bc   : > { %2447 = vrot.lane.b32.xlu0 %v5453_v39, %s4655_s23  ;;  %4216 = vmatpush3.bf16.msra.mxu0 %v1914_v15  ;;  %v761_v29 = vpop.f32.mrb[10].mxu0  ;;  %v813_v6 = vpop.f32.mrb[8].mxu1 }
 0x1bd   : > { %v2030_v19 = vpop.permute.xlu1 %2029  ;;  %4237 = vmatprep.subr.bf16.mxu0 %v4652_v0  ;;  %4232 = vmatpush3.bf16.msra.mxu1 %v5285_v31  ;;  %v814_v20 = vadd.f32 %v813_v6, %v758_v13  ;;  %v4028_v33 = vpop.f32.mrb[11].mxu0 }
 0x1be   : > { %v2028_v16 = vpop.permute.xlu0 %2027  ;;  %4253 = vmatprep.subr.bf16.mxu1 %v4652_v0  ;;  %v4043_v34 = vpop.f32.mrb[9].mxu1 }
 0x1bf   : > { %v2051_v17 = vsel %vm448_vm3, %v2028_v16, %v2030_v19  ;;  %2538 = vrot.lane.b32.xlu1 %v5448_v38, %s4656_s24  ;;  %4218 = vmatmul.mubr.msk.bf16.vlgmr.msra.gmra.mrb[32].mxu0 %vm316_vm1, %v4588_v42  ;;  %v816_v37 = vpop.f32.mrb[10].mxu1  ;;  %v4602_v19 = vld [vmem:[%s6083_s1 + $0x10] sm:$0xff]  }
 0x1c0   : > { %2536 = vrot.lane.b32.xlu0 %v5453_v39, %s4656_s24  ;;  %4238 = vmatpush3.bf16.msra.mxu0 %v2051_v17  ;;  %v817_v40 = vadd.f32 %v816_v37, %v761_v29  ;;  %v4044_v8 = vpop.f32.mrb[11].mxu1 }
 0x1c1   : > { %v2119_v44 = vpop.permute.xlu1 %2118  ;;  %4234 = vmatmul.mubr.msk.bf16.vlgmr.msra.gmra.mrb[32].mxu1 %vm316_vm1, %v4589_v43  ;;  %4239 = vmatprep.subr.bf16.mxu0 %v4652_v0  ;;  %v5756_v8 = vld [vmem:[%s4704_s19 + $0x1e4] ss:$8 sps:$4 sm:$0xff]  }
 0x1c2   : > { %v2117_v21 = vpop.permute.xlu0 %2116  ;;  %4249 = vmatprep.mubr.msk.bf16.mxu0 %vm4654_vm0, %v4652_v0  ;;  %4265 = vmatprep.mubr.msk.bf16.mxu1 %vm4654_vm0, %v4652_v0 }
 0x1c3   : > { %v2140_v45 = vsel %vm539_vm4, %v2117_v21, %v2119_v44  ;;  %2687 = vrot.lane.b32.xlu1 %v5436_v35, %s4653_s20 }
 0x1c4   : > { %2685 = vrot.lane.b32.xlu0 %v5441_v36, %s4653_s20  ;;  %4254 = vmatpush3.bf16.msra.mxu1 %v2140_v45 }
 0x1c5   : > { %v2034_v26 = vpop.permute.xlu1 %2033  ;;  %4255 = vmatprep.subr.bf16.mxu1 %v4652_v0 }
 0x1c6   : > { %v2032_v46 = vpop.permute.xlu0 %2031 }
 0x1c7   : > { %v2052_v51 = vsel %vm448_vm3, %v2032_v46, %v2034_v26  ;;  %2691 = vrot.lane.b32.xlu1 %v5448_v38, %s4653_s20 }
 0x1c8   : > { %2689 = vrot.lane.b32.xlu0 %v5453_v39, %s4653_s20  ;;  %4240 = vmatpush3.bf16.msra.mxu0 %v2052_v51  ;;  %v4603_v51 = vld [vmem:[%s6083_s1 + $0x18] sm:$0xff]  }
 0x1c9   : > { %v2123_v48 = vpop.permute.xlu1 %2122  ;;  %4241 = vmatprep.subr.bf16.mxu0 %v4652_v0 }
 0x1ca   : > { %v2121_v30 = vpop.permute.xlu0 %2120 }
 0x1cb   : > { %v2141_v56 = vsel %vm539_vm4, %v2121_v30, %v2123_v48  ;;  %2695 = vrot.lane.b32.xlu1 %v5584_v47, %s4653_s20 }
 0x1cc   : > { %2693 = vrot.lane.b32.xlu0 %v5589_v61, %s4653_s20  ;;  %4256 = vmatpush3.bf16.msra.mxu1 %v2141_v56 }
 0x1cd   : > { %v2038_v50 = vpop.permute.xlu1 %2037  ;;  %4257 = vmatprep.subr.bf16.mxu1 %v4652_v0 }
 0x1ce   : > { %v2036_v52 = vpop.permute.xlu0 %2035 }
 0x1cf   : > { %v2053_v58 = vsel %vm448_vm3, %v2036_v52, %v2038_v50  ;;  %2699 = vrot.lane.b32.xlu1 %v5596_v49, %s4653_s20 }
 0x1d0   : > { %2697 = vrot.lane.b32.xlu0 %v5601_v3, %s4653_s20  ;;  %4242 = vmatpush3.bf16.msra.mxu0 %v2053_v58 }
 0x1d1   : > { %v2127_v10 = vpop.permute.xlu1 %2126  ;;  %4243 = vmatprep.subr.bf16.mxu0 %v4652_v0 }
 0x1d2   : > { %v2125_v4 = vpop.permute.xlu0 %2124 }
 0x1d3   : > { %v2142_v55 = vsel %vm539_vm4, %v2125_v4, %v2127_v10  ;;  %2703 = vrot.lane.b32.xlu1 %v5608_v53, %s4653_s20 }
 0x1d4   : > { %2701 = vrot.lane.b32.xlu0 %v5613_v54, %s4653_s20  ;;  %4258 = vmatpush3.bf16.msra.mxu1 %v2142_v55 }
 0x1d5   : > { %v2042_v62 = vpop.permute.xlu1 %2041  ;;  %4259 = vmatprep.subr.bf16.mxu1 %v4652_v0 }
 0x1d6   : > { %v2040_v1 = vpop.permute.xlu0 %2039 }
 0x1d7   : > { %v2054_v5 = vsel %vm448_vm3, %v2040_v1, %v2042_v62  ;;  %2707 = vrot.lane.b32.xlu1 %v5620_v57, %s4653_s20 }
 0x1d8   : > { %2705 = vrot.lane.b32.xlu0 %v5625_v59, %s4653_s20  ;;  %4244 = vmatpush3.bf16.msra.mxu0 %v2054_v5 }
 0x1d9   : > { %v2131_v22 = vpop.permute.xlu1 %2130  ;;  %4245 = vmatprep.subr.bf16.mxu0 %v4652_v0 }
 0x1da   : > { %v2129_v7 = vpop.permute.xlu0 %2128 }
 0x1db   : > { %v2143_v12 = vsel %vm539_vm4, %v2129_v7, %v2131_v22  ;;  %2829 = vrot.lane.b32.xlu1 %v5436_v35, %s4655_s23 }
 0x1dc   : > { %2827 = vrot.lane.b32.xlu0 %v5441_v36, %s4655_s23  ;;  %4260 = vmatpush3.bf16.msra.mxu1 %v2143_v12 }
 0x1dd   : > { %v2046_v14 = vpop.permute.xlu1 %2045  ;;  %4261 = vmatprep.subr.bf16.mxu1 %v4652_v0 }
 0x1de   : > { %v2044_v25 = vpop.permute.xlu0 %2043 }
 0x1df   : > { %v2055_v28 = vsel %vm448_vm3, %v2044_v25, %v2046_v14  ;;  %2918 = vrot.lane.b32.xlu1 %v5436_v35, %s4656_s24  ;;  %v4604_v14 = vld [vmem:[%s6083_s1 + $0x8] sm:$0xff]   ;;  %v4605_v25 = vld [vmem:[%s6083_s1] sm:$0xff]  }
 0x1e0   : > { %2916 = vrot.lane.b32.xlu0 %v5441_v36, %s4656_s24  ;;  %4246 = vmatpush3.bf16.msra.mxu0 %v2055_v28 }
 0x1e1   : > { %v2135_v9 = vpop.permute.xlu1 %2134  ;;  %4247 = vmatprep.subr.bf16.mxu0 %v4652_v0 }
 0x1e2   : > { %v2133_v2 = vpop.permute.xlu0 %2132 }
 0x1e3   : > { %v2144_v23 = vsel %vm539_vm4, %v2133_v2, %v2135_v9  ;;  %2833 = vrot.lane.b32.xlu1 %v5448_v38, %s4655_s23 }
 0x1e4   : > { %2831 = vrot.lane.b32.xlu0 %v5453_v39, %s4655_s23  ;;  %4262 = vmatpush3.bf16.msra.mxu1 %v2144_v23 }
 0x1e5   : > { %v2050_v35 = vpop.permute.xlu1 %2049  ;;  %4263 = vmatprep.subr.bf16.mxu1 %v4652_v0 }
 0x1e6   : > { %v2048_v41 = vpop.permute.xlu0 %2047  ;;  %v900_v15 = vpop.f32.mrb[12].mxu0 }
 0x1e7   : > { %v2056_v42 = vsel %vm448_vm3, %v2048_v41, %v2050_v35  ;;  %2922 = vrot.lane.b32.xlu1 %v5448_v38, %s4656_s24  ;;  %v907_v43 = vadd.f32 %v900_v15, %v814_v20  ;;  %v4059_v16 = vpop.f32.mrb[13].mxu0  ;;  %v5761_v41 = vld [vmem:[%s4704_s19 + $0x1e0] ss:$8 sps:$4 sm:$0xff]  }
 0x1e8   : > { %2920 = vrot.lane.b32.xlu0 %v5453_v39, %s4656_s24  ;;  %4248 = vmatpush3.bf16.msra.mxu0 %v2056_v42  ;;  %v903_v17 = vpop.f32.mrb[14].mxu0 }
 0x1e9   : > { %v2139_v44 = vpop.permute.xlu1 %2138  ;;  %4269 = vmatprep.subr.bf16.mxu0 %v4652_v0  ;;  %v908_v21 = vadd.f32 %v903_v17, %v817_v40  ;;  %v4060_v45 = vpop.f32.mrb[15].mxu0 }
 0x1ea   : > { %v2137_v26 = vpop.permute.xlu0 %2136  ;;  %v989_v46 = vpop.f32.mrb[12].mxu1 }
 0x1eb   : > { %v2145_v38 = vsel %vm539_vm4, %v2137_v26, %v2139_v44  ;;  %2837 = vrot.lane.b32.xlu1 %v5584_v47, %s4655_s23  ;;  %4250 = vmatmul.mubr.msk.bf16.vlgmr.msra.gmra.mrb[36].mxu0 %vm316_vm1, %v4602_v19  ;;  %v5668_v48 = vadd.f32 %v989_v46, %v907_v43  ;;  %v4075_v30 = vpop.f32.mrb[13].mxu1  ;;  %v5772_v26 = vld [vmem:[%s4704_s19 + $0x1f4] ss:$8 sps:$4 sm:$0xff]   ;;  %v5777_v46 = vld [vmem:[%s4704_s19 + $0x1f0] ss:$8 sps:$4 sm:$0xff]  }
 0x1ec   : > { %2835 = vrot.lane.b32.xlu0 %v5589_v61, %s4655_s23  ;;  %4264 = vmatpush3.bf16.msra.mxu1 %v2145_v38  ;;  %v992_v56 = vpop.f32.mrb[14].mxu1 }
 0x1ed   : > { %v2288_v50 = vpop.permute.xlu1 %2287  ;;  %4285 = vmatprep.subr.bf16.mxu1 %v4652_v0  ;;  %4281 = vmatprep.mubr.msk.bf16.mxu0 %vm4654_vm0, %v4652_v0  ;;  %v5675_v52 = vadd.f32 %v992_v56, %v908_v21  ;;  %v4076_v58 = vpop.f32.mrb[15].mxu1  ;;  %v5784_v56 = vld [vmem:[%s4704_s19 + $0x204] ss:$8 sps:$4 sm:$0xff]  }
 0x1ee   : > { %v2286_v10 = vpop.permute.xlu0 %2285 }
 0x1ef   : > { %v2309_v4 = vsel %vm303_vm2, %v2286_v10, %v2288_v50  ;;  %2926 = vrot.lane.b32.xlu1 %v5584_v47, %s4656_s24  ;;  %4266 = vmatmul.mubr.msk.bf16.vlgmr.msra.gmra.mrb[36].mxu1 %vm316_vm1, %v4603_v51  ;;  %v5789_v50 = vld [vmem:[%s4704_s19 + $0x200] ss:$8 sps:$4 sm:$0xff]  }
 0x1f0   : > { %2924 = vrot.lane.b32.xlu0 %v5589_v61, %s4656_s24  ;;  %4270 = vmatpush3.bf16.msra.mxu0 %v2309_v4 }
 0x1f1   : > { %v2292_v55 = vpop.permute.xlu1 %2291  ;;  %4271 = vmatprep.subr.bf16.mxu0 %v4652_v0  ;;  %4286 = vmatpush3.bf16.msra.mxu1 %v5273_v27 }
 0x1f2   : > { %v2290_v62 = vpop.permute.xlu0 %2289  ;;  %4287 = vmatprep.subr.bf16.mxu1 %v4652_v0  ;;  %4297 = vmatprep.mubr.msk.bf16.mxu1 %vm4654_vm0, %v4652_v0 }
 0x1f3   : > { %v2310_v63 = vsel %vm303_vm2, %v2290_v62, %v2292_v55  ;;  %2841 = vrot.lane.b32.xlu1 %v5596_v49, %s4655_s23  ;;  %v5796_v55 = vld [vmem:[%s4704_s19 + $0x214] ss:$8 sps:$4 sm:$0xff]   ;;  %v5801_v62 = vld [vmem:[%s4704_s19 + $0x210] ss:$8 sps:$4 sm:$0xff]  }
 0x1f4   : > { %2839 = vrot.lane.b32.xlu0 %v5601_v3, %s4655_s23  ;;  %4272 = vmatpush3.bf16.msra.mxu0 %v2310_v63 }
 0x1f5   : > { %v2296_v47 = vpop.permute.xlu1 %2295  ;;  %4273 = vmatprep.subr.bf16.mxu0 %v4652_v0  ;;  %4288 = vmatpush3.bf16.msra.mxu1 %v5285_v31 }
 0x1f6   : > { %v2294_v27 = vpop.permute.xlu0 %2293  ;;  %4289 = vmatprep.subr.bf16.mxu1 %v4652_v0 }
 0x1f7   : > { %v2311_v1 = vsel %vm303_vm2, %v2294_v27, %v2296_v47  ;;  %2930 = vrot.lane.b32.xlu1 %v5596_v49, %s4656_s24 }
 0x1f8   : > { %2928 = vrot.lane.b32.xlu0 %v5601_v3, %s4656_s24  ;;  %4274 = vmatpush3.bf16.msra.mxu0 %v2311_v1 }
 0x1f9   : > { %v2300_v5 = vpop.permute.xlu1 %2299  ;;  %4275 = vmatprep.subr.bf16.mxu0 %v4652_v0  ;;  %4290 = vmatpush3.bf16.msra.mxu1 %v5417_v18 }
 0x1fa   : > { %v2298_v22 = vpop.permute.xlu0 %2297  ;;  %4291 = vmatprep.subr.bf16.mxu1 %v4652_v0 }
 0x1fb   : > { %v2312_v31 = vsel %vm303_vm2, %v2298_v22, %v2300_v5  ;;  %2845 = vrot.lane.b32.xlu1 %v5608_v53, %s4655_s23 }
 0x1fc   : > { %2843 = vrot.lane.b32.xlu0 %v5613_v54, %s4655_s23  ;;  %4276 = vmatpush3.bf16.msra.mxu0 %v2312_v31 }
 0x1fd   : > { %v2304_v49 = vpop.permute.xlu1 %2303  ;;  %4277 = vmatprep.subr.bf16.mxu0 %v4652_v0  ;;  %4292 = vmatpush3.bf16.msra.mxu1 %v5429_v32 }
 0x1fe   : > { %v2302_v7 = vpop.permute.xlu0 %2301  ;;  %4293 = vmatprep.subr.bf16.mxu1 %v4652_v0 }
 0x1ff   : > { %v2313_v18 = vsel %vm303_vm2, %v2302_v7, %v2304_v49  ;;  %2934 = vrot.lane.b32.xlu1 %v5608_v53, %s4656_s24 }
 0x200   : > { %2932 = vrot.lane.b32.xlu0 %v5613_v54, %s4656_s24  ;;  %4278 = vmatpush3.bf16.msra.mxu0 %v2313_v18 }
 0x201   : > { %v2308_v12 = vpop.permute.xlu1 %2307  ;;  %4279 = vmatprep.subr.bf16.mxu0 %v4652_v0  ;;  %4294 = vmatpush3.bf16.msra.mxu1 %v5441_v36 }
 0x202   : > { %v2306_v13 = vpop.permute.xlu0 %2305  ;;  %4295 = vmatprep.subr.bf16.mxu1 %v4652_v0  ;;  %v1158_v34 = vpop.f32.mrb[16].mxu0 }
 0x203   : > { %v2314_v32 = vsel %vm303_vm2, %v2306_v13, %v2308_v12  ;;  %2849 = vrot.lane.b32.xlu1 %v5620_v57, %s4655_s23  ;;  %v4091_v37 = vpop.f32.mrb[17].mxu0 }
 0x204   : > { %2847 = vrot.lane.b32.xlu0 %v5625_v59, %s4655_s23  ;;  %4280 = vmatpush3.bf16.msra.mxu0 %v2314_v32  ;;  %v1161_v23 = vpop.f32.mrb[18].mxu0  ;;  %v1213_v35 = vpop.f32.mrb[16].mxu1 }
 0x205   : > { %v2430_v24 = vpop.permute.xlu1 %2429  ;;  %4301 = vmatprep.subr.bf16.mxu0 %v4652_v0  ;;  %4296 = vmatpush3.bf16.msra.mxu1 %v5453_v39  ;;  %v5763_v15 = vadd.f32 %v1213_v35, %v1158_v34  ;;  %v4092_v42 = vpop.f32.mrb[19].mxu0 }
 0x206   : > { %v2428_v28 = vpop.permute.xlu0 %2427  ;;  %4317 = vmatprep.subr.bf16.mxu1 %v4652_v0  ;;  %v4107_v19 = vpop.f32.mrb[17].mxu1 }
 0x207   : > { %v2451_v29 = vsel %vm448_vm3, %v2428_v28, %v2430_v24  ;;  %2938 = vrot.lane.b32.xlu1 %v5620_v57, %s4656_s24  ;;  %4282 = vmatmul.mubr.msk.bf16.vlgmr.msra.gmra.mrb[40].mxu0 %vm316_vm1, %v4604_v14  ;;  %v1216_v16 = vpop.f32.mrb[18].mxu1 }
 0x208   : > { %2936 = vrot.lane.b32.xlu0 %v5625_v59, %s4656_s24  ;;  %4302 = vmatpush3.bf16.msra.mxu0 %v2451_v29  ;;  %v5766_v44 = vadd.f32 %v1216_v16, %v1161_v23  ;;  %v4108_v21 = vpop.f32.mrb[19].mxu1 }
 0x209   : > { %v2519_v6 = vpop.permute.xlu1 %2518  ;;  %4298 = vmatmul.mubr.msk.bf16.vlgmr.msra.gmra.mrb[40].mxu1 %vm316_vm1, %v4605_v25  ;;  %4303 = vmatprep.subr.bf16.mxu0 %v4652_v0  ;;  %v4618_v25 = vld [vmem:[%s6083_s1 + $0x10] sm:$0xff]  }
 0x20a   : > { %v2517_v20 = vpop.permute.xlu0 %2516  ;;  %4313 = vmatprep.mubr.msk.bf16.mxu0 %vm4654_vm0, %v4652_v0  ;;  %4329 = vmatprep.mubr.msk.bf16.mxu1 %vm4654_vm0, %v4652_v0 }
 0x20b   : > { %v2540_v33 = vsel %vm539_vm4, %v2517_v20, %v2519_v6  ;;  %3087 = vrot.lane.b32.xlu1 %v5608_v53, %s4653_s20 }
 0x20c   : > { %3085 = vrot.lane.b32.xlu0 %v5613_v54, %s4653_s20  ;;  %4318 = vmatpush3.bf16.msra.mxu1 %v2540_v33 }
 0x20d   : > { %v2434_v9 = vpop.permute.xlu1 %2433  ;;  %4319 = vmatprep.subr.bf16.mxu1 %v4652_v0 }
 0x20e   : > { %v2432_v2 = vpop.permute.xlu0 %2431 }
 0x20f   : > { %v2452_v40 = vsel %vm448_vm3, %v2432_v2, %v2434_v9  ;;  %3091 = vrot.lane.b32.xlu1 %v5620_v57, %s4653_s20  ;;  %v4619_v2 = vld [vmem:[%s6083_s1 + $0x18] sm:$0xff]  }
 0x210   : > { %3089 = vrot.lane.b32.xlu0 %v5625_v59, %s4653_s20  ;;  %4304 = vmatpush3.bf16.msra.mxu0 %v2452_v40 }
 0x211   : > { %v2523_v43 = vpop.permute.xlu1 %2522  ;;  %4305 = vmatprep.subr.bf16.mxu0 %v4652_v0 }
 0x212   : > { %v2521_v17 = vpop.permute.xlu0 %2520 }
 0x213   : > { %v2541_v45 = vsel %vm539_vm4, %v2521_v17, %v2523_v43  ;;  %3095 = vrot.lane.b32.xlu1 %v5756_v8, %s4653_s20 }
 0x214   : > { %3093 = vrot.lane.b32.xlu0 %v5761_v41, %s4653_s20  ;;  %4320 = vmatpush3.bf16.msra.mxu1 %v2541_v45 }
 0x215   : > { %v2438_v38 = vpop.permute.xlu1 %2437  ;;  %4321 = vmatprep.subr.bf16.mxu1 %v4652_v0 }
 0x216   : > { %v2436_v51 = vpop.permute.xlu0 %2435 }
 0x217   : > { %v2453_v30 = vsel %vm448_vm3, %v2436_v51, %v2438_v38  ;;  %3099 = vrot.lane.b32.xlu1 %v5772_v26, %s4653_s20 }
 0x218   : > { %3097 = vrot.lane.b32.xlu0 %v5777_v46, %s4653_s20  ;;  %4306 = vmatpush3.bf16.msra.mxu0 %v2453_v30 }
 0x219   : > { %v2527_v58 = vpop.permute.xlu1 %2526  ;;  %4307 = vmatprep.subr.bf16.mxu0 %v4652_v0 }
 0x21a   : > { %v2525_v10 = vpop.permute.xlu0 %2524 }
 0x21b   : > { %v2542_v4 = vsel %vm539_vm4, %v2525_v10, %v2527_v58  ;;  %3103 = vrot.lane.b32.xlu1 %v5784_v56, %s4653_s20 }
 0x21c   : > { %3101 = vrot.lane.b32.xlu0 %v5789_v50, %s4653_s20  ;;  %4322 = vmatpush3.bf16.msra.mxu1 %v2542_v4 }
 0x21d   : > { %v2442_v63 = vpop.permute.xlu1 %2441  ;;  %4323 = vmatprep.subr.bf16.mxu1 %v4652_v0 }
 0x21e   : > { %v2440_v47 = vpop.permute.xlu0 %2439 }
 0x21f   : > { %v2454_v27 = vsel %vm448_vm3, %v2440_v47, %v2442_v63  ;;  %3107 = vrot.lane.b32.xlu1 %v5796_v55, %s4653_s20 }
 0x220   : > { %3105 = vrot.lane.b32.xlu0 %v5801_v62, %s4653_s20  ;;  %4308 = vmatpush3.bf16.msra.mxu0 %v2454_v27  ;;  %s3724_s20 = sshll.u32 %s6091_s12, 7 }
 0x221   : > { %v2531_v1 = vpop.permute.xlu1 %2530  ;;  %4309 = vmatprep.subr.bf16.mxu0 %v4652_v0  ;;  %s6048_s4 = scalar_lea.vmem %s6085_s3, %s3724_s20 }
 0x222   : > { %v2529_v5 = vpop.permute.xlu0 %2528 }
 0x223   : > { %v2543_v22 = vsel %vm539_vm4, %v2529_v5, %v2531_v1  ;;  %3229 = vrot.lane.b32.xlu1 %v5608_v53, %s4655_s23  ;;  %v4621_v5 = vld [vmem:[%s6083_s1] sm:$0xff]  }
 0x224   : > { %3227 = vrot.lane.b32.xlu0 %v5613_v54, %s4655_s23  ;;  %4324 = vmatpush3.bf16.msra.mxu1 %v2543_v22 }
 0x225   : > { %v2446_v31 = vpop.permute.xlu1 %2445  ;;  %4325 = vmatprep.subr.bf16.mxu1 %v4652_v0 }
 0x226   : > { %v2444_v49 = vpop.permute.xlu0 %2443 }
 0x227   : > { %v2455_v7 = vsel %vm448_vm3, %v2444_v49, %v2446_v31  ;;  %3318 = vrot.lane.b32.xlu1 %v5608_v53, %s4656_s24 }
 0x228   : > { %3316 = vrot.lane.b32.xlu0 %v5613_v54, %s4656_s24  ;;  %4310 = vmatpush3.bf16.msra.mxu0 %v2455_v7 }
 0x229   : > { %v2535_v18 = vpop.permute.xlu1 %2534  ;;  %4311 = vmatprep.subr.bf16.mxu0 %v4652_v0 }
 0x22a   : > { %v2533_v12 = vpop.permute.xlu0 %2532 }
 0x22b   : > { %v2544_v13 = vsel %vm539_vm4, %v2533_v12, %v2535_v18  ;;  %3233 = vrot.lane.b32.xlu1 %v5620_v57, %s4655_s23 }
 0x22c   : > { %3231 = vrot.lane.b32.xlu0 %v5625_v59, %s4655_s23  ;;  %4326 = vmatpush3.bf16.msra.mxu1 %v2544_v13  ;;  %v599_v13 = vld [vmem:[%s6084_s2 + $0x8] sm:$0xff] }
 0x22d   : > { %v2450_v32 = vpop.permute.xlu1 %2449  ;;  %4327 = vmatprep.subr.bf16.mxu1 %v4652_v0 }
 0x22e   : > { %v2448_v53 = vpop.permute.xlu0 %2447  ;;  %v1300_v14 = vpop.f32.mrb[20].mxu0 }
 0x22f   : > { %v2456_v24 = vsel %vm448_vm3, %v2448_v53, %v2450_v32  ;;  %3322 = vrot.lane.b32.xlu1 %v5620_v57, %s4656_s24  ;;  %v1307_v28 = vadd.f32 %v1300_v14, %v5763_v15  ;;  %v4123_v29 = vpop.f32.mrb[21].mxu0 }
 0x230   : > { %3320 = vrot.lane.b32.xlu0 %v5625_v59, %s4656_s24  ;;  %4312 = vmatpush3.bf16.msra.mxu0 %v2456_v24  ;;  %v1303_v6 = vpop.f32.mrb[22].mxu0  ;;  %v598_v24 = vld [vmem:[%s6084_s2] sm:$0xff] }
 0x231   : > { %v2539_v20 = vpop.permute.xlu1 %2538  ;;  %4333 = vmatprep.subr.bf16.mxu0 %v4652_v0  ;;  %v1308_v33 = vadd.f32 %v1303_v6, %v5766_v44  ;;  %v4124_v34 = vpop.f32.mrb[23].mxu0 }
 0x232   : > { %v2537_v9 = vpop.permute.xlu0 %2536  ;;  %v1389_v57 = vpop.f32.mrb[20].mxu1 }
 0x233   : > { %v2545_v37 = vsel %vm539_vm4, %v2537_v9, %v2539_v20  ;;  %3237 = vrot.lane.b32.xlu1 %v5756_v8, %s4655_s23  ;;  %4314 = vmatmul.mubr.msk.bf16.vlgmr.msra.gmra.mrb[44].mxu0 %vm316_vm1, %v4618_v25  ;;  %v5846_v40 = vadd.f32 %v1389_v57, %v1307_v28  ;;  %v4139_v23 = vpop.f32.mrb[21].mxu1 }
 0x234   : > { %3235 = vrot.lane.b32.xlu0 %v5761_v41, %s4655_s23  ;;  %4328 = vmatpush3.bf16.msra.mxu1 %v2545_v37  ;;  %v1392_v35 = vpop.f32.mrb[22].mxu1 }
 0x235   : > { %v2688_v15 = vpop.permute.xlu1 %2687  ;;  %4349 = vmatprep.subr.bf16.mxu1 %v4652_v0  ;;  %4345 = vmatprep.mubr.msk.bf16.mxu0 %vm4654_vm0, %v4652_v0  ;;  %v5853_v42 = vadd.f32 %v1392_v35, %v1308_v33  ;;  %v4140_v19 = vpop.f32.mrb[23].mxu1 }
 0x236   : > { %v2686_v43 = vpop.permute.xlu0 %2685 }
 0x237   : > { %v2709_v16 = vsel %vm303_vm2, %v2686_v43, %v2688_v15  ;;  %3326 = vrot.lane.b32.xlu1 %v5756_v8, %s4656_s24  ;;  %4330 = vmatmul.mubr.msk.bf16.vlgmr.msra.gmra.mrb[44].mxu1 %vm316_vm1, %v4619_v2 }
 0x238   : > { %3324 = vrot.lane.b32.xlu0 %v5761_v41, %s4656_s24  ;;  %4334 = vmatpush3.bf16.msra.mxu0 %v2709_v16 }
 0x239   : > { %v2692_v17 = vpop.permute.xlu1 %2691  ;;  %4335 = vmatprep.subr.bf16.mxu0 %v4652_v0  ;;  %4350 = vmatpush3.bf16.msra.mxu1 %v5441_v36 }
 0x23a   : > { %v2690_v44 = vpop.permute.xlu0 %2689  ;;  %4351 = vmatprep.subr.bf16.mxu1 %v4652_v0  ;;  %4361 = vmatprep.mubr.msk.bf16.mxu1 %vm4654_vm0, %v4652_v0 }
 0x23b   : > { %v2710_v21 = vsel %vm303_vm2, %v2690_v44, %v2692_v17  ;;  %3241 = vrot.lane.b32.xlu1 %v5772_v26, %s4655_s23 }
 0x23c   : > { %3239 = vrot.lane.b32.xlu0 %v5777_v46, %s4655_s23  ;;  %4336 = vmatpush3.bf16.msra.mxu0 %v2710_v21 }
 0x23d   : > { %v2696_v8 = vpop.permute.xlu1 %2695  ;;  %4337 = vmatprep.subr.bf16.mxu0 %v4652_v0  ;;  %4352 = vmatpush3.bf16.msra.mxu1 %v5453_v39 }
 0x23e   : > { %v2694_v36 = vpop.permute.xlu0 %2693  ;;  %4353 = vmatprep.subr.bf16.mxu1 %v4652_v0 }
 0x23f   : > { %v2711_v45 = vsel %vm303_vm2, %v2694_v36, %v2696_v8  ;;  %3330 = vrot.lane.b32.xlu1 %v5772_v26, %s4656_s24 }
 0x240   : > { %3328 = vrot.lane.b32.xlu0 %v5777_v46, %s4656_s24  ;;  %4338 = vmatpush3.bf16.msra.mxu0 %v2711_v45 }
 0x241   : > { %v2700_v38 = vpop.permute.xlu1 %2699  ;;  %4339 = vmatprep.subr.bf16.mxu0 %v4652_v0  ;;  %4354 = vmatpush3.bf16.msra.mxu1 %v5589_v61 }
 0x242   : > { %v2698_v51 = vpop.permute.xlu0 %2697  ;;  %4355 = vmatprep.subr.bf16.mxu1 %v4652_v0 }
 0x243   : > { %v2712_v39 = vsel %vm303_vm2, %v2698_v51, %v2700_v38  ;;  %3245 = vrot.lane.b32.xlu1 %v5784_v56, %s4655_s23 }
 0x244   : > { %3243 = vrot.lane.b32.xlu0 %v5789_v50, %s4655_s23  ;;  %4340 = vmatpush3.bf16.msra.mxu0 %v2712_v39 }
 0x245   : > { %v2704_v26 = vpop.permute.xlu1 %2703  ;;  %4341 = vmatprep.subr.bf16.mxu0 %v4652_v0  ;;  %4356 = vmatpush3.bf16.msra.mxu1 %v5601_v3 }
 0x246   : > { %v2702_v30 = vpop.permute.xlu0 %2701  ;;  %4357 = vmatprep.subr.bf16.mxu1 %v4652_v0 }
 0x247   : > { %v2713_v61 = vsel %vm303_vm2, %v2702_v30, %v2704_v26  ;;  %3334 = vrot.lane.b32.xlu1 %v5784_v56, %s4656_s24  ;;  %v4620_v56 = vld [vmem:[%s6083_s1 + $0x8] sm:$0xff]  }
 0x248   : > { %3332 = vrot.lane.b32.xlu0 %v5789_v50, %s4656_s24  ;;  %4342 = vmatpush3.bf16.msra.mxu0 %v2713_v61 }
 0x249   : > { %v2708_v58 = vpop.permute.xlu1 %2707  ;;  %4343 = vmatprep.subr.bf16.mxu0 %v4652_v0  ;;  %4358 = vmatpush3.bf16.msra.mxu1 %v5613_v54 }
 0x24a   : > { %v2706_v10 = vpop.permute.xlu0 %2705  ;;  %4359 = vmatprep.subr.bf16.mxu1 %v4652_v0  ;;  %v1558_v3 = vpop.f32.mrb[24].mxu0 }
 0x24b   : > { %v2714_v4 = vsel %vm303_vm2, %v2706_v10, %v2708_v58  ;;  %3249 = vrot.lane.b32.xlu1 %v5796_v55, %s4655_s23  ;;  %v4155_v63 = vpop.f32.mrb[25].mxu0  ;;  %v4622_v58 = vld [vmem:[%s6083_s1 + $0x10] sm:$0xff]  }
 0x24c   : > { %3247 = vrot.lane.b32.xlu0 %v5801_v62, %s4655_s23  ;;  %4344 = vmatpush3.bf16.msra.mxu0 %v2714_v4  ;;  %v1561_v47 = vpop.f32.mrb[26].mxu0  ;;  %v1613_v27 = vpop.f32.mrb[24].mxu1 }
 0x24d   : > { %v2830_v1 = vpop.permute.xlu1 %2829  ;;  %4365 = vmatprep.subr.bf16.mxu0 %v4652_v0  ;;  %4360 = vmatpush3.bf16.msra.mxu1 %v5625_v59  ;;  %v5911_v22 = vadd.f32 %v1613_v27, %v1558_v3  ;;  %v4156_v31 = vpop.f32.mrb[27].mxu0 }
 0x24e   : > { %v2828_v49 = vpop.permute.xlu0 %2827  ;;  %4381 = vmatprep.subr.bf16.mxu1 %v4652_v0  ;;  %v4171_v7 = vpop.f32.mrb[25].mxu1  ;;  %v4623_v31 = vld [vmem:[%s6083_s1 + $0x18] sm:$0xff]  }
 0x24f   : > { %v2851_v18 = vsel %vm448_vm3, %v2828_v49, %v2830_v1  ;;  %3338 = vrot.lane.b32.xlu1 %v5796_v55, %s4656_s24  ;;  %4346 = vmatmul.mubr.msk.bf16.vlgmr.msra.gmra.mrb[48].mxu0 %vm316_vm1, %v4620_v56  ;;  %v1616_v12 = vpop.f32.mrb[26].mxu1 }
 0x250   : > { %3336 = vrot.lane.b32.xlu0 %v5801_v62, %s4656_s24  ;;  %4366 = vmatpush3.bf16.msra.mxu0 %v2851_v18  ;;  %v5923_v32 = vadd.f32 %v1616_v12, %v1561_v47  ;;  %v4172_v53 = vpop.f32.mrb[27].mxu1 }
 0x251   : > { %v2919_v14 = vpop.permute.xlu1 %2918  ;;  %4362 = vmatmul.mubr.msk.bf16.vlgmr.msra.gmra.mrb[48].mxu1 %vm316_vm1, %v4621_v5  ;;  %4367 = vmatprep.subr.bf16.mxu0 %v4652_v0 }
 0x252   : > { %v2917_v55 = vpop.permute.xlu0 %2916  ;;  %4377 = vmatprep.mubr.msk.bf16.mxu0 %vm4654_vm0, %v4652_v0  ;;  %4393 = vmatprep.mubr.msk.bf16.mxu1 %vm4654_vm0, %v4652_v0 }
 0x253   : > { %v2940_v25 = vsel %vm539_vm4, %v2917_v55, %v2919_v14  ;;  %607 = vperm.xlu1 %4493, %v599_v13  }
 0x254   : > { %602 = vperm.xlu0 %4492, %v598_v24   ;;  %4382 = vmatpush3.bf16.msra.mxu1 %v2940_v25 }
 0x255   : > { %v2834_v28 = vpop.permute.xlu1 %2833  ;;  %4383 = vmatprep.subr.bf16.mxu1 %v4652_v0 }
 0x256   : > { %v2832_v29 = vpop.permute.xlu0 %2831 }
 0x257   : > { %v2852_v6 = vsel %vm448_vm3, %v2832_v29, %v2834_v28  ;;  %1002 = vperm.xlu1 %4493, %v598_v24  }
 0x258   : > { %1007 = vperm.xlu0 %4492, %v599_v13   ;;  %4368 = vmatpush3.bf16.msra.mxu0 %v2852_v6 }
 0x259   : > { %v2923_v20 = vpop.permute.xlu1 %2922  ;;  %4369 = vmatprep.subr.bf16.mxu0 %v4652_v0 }
 0x25a   : > { %v2921_v33 = vpop.permute.xlu0 %2920 }
 0x25b   : > { %v2941_v34 = vsel %vm539_vm4, %v2921_v33, %v2923_v20  ;;  %1402 = vperm.xlu1 %4493, %v598_v24  }
 0x25c   : > { %1407 = vperm.xlu0 %4492, %v599_v13   ;;  %4384 = vmatpush3.bf16.msra.mxu1 %v2941_v34 }
 0x25d   : > { %v2838_v9 = vpop.permute.xlu1 %2837  ;;  %4385 = vmatprep.subr.bf16.mxu1 %v4652_v0 }
 0x25e   : > { %v2836_v57 = vpop.permute.xlu0 %2835 }
 0x25f   : > { %v2853_v37 = vsel %vm448_vm3, %v2836_v57, %v2838_v9  ;;  %1802 = vperm.xlu1 %4493, %v598_v24  }
 0x260   : > { %1807 = vperm.xlu0 %4492, %v599_v13   ;;  %4370 = vmatpush3.bf16.msra.mxu0 %v2853_v37  ;;  %v4624_v37 = vld [vmem:[%s6083_s1 + $0x8] sm:$0xff]  }
 0x261   : > { %v2927_v2 = vpop.permute.xlu1 %2926  ;;  %4371 = vmatprep.subr.bf16.mxu0 %v4652_v0 }
 0x262   : > { %v2925_v23 = vpop.permute.xlu0 %2924 }
 0x263   : > { %v2942_v35 = vsel %vm539_vm4, %v2925_v23, %v2927_v2  ;;  %2202 = vperm.xlu1 %4493, %v598_v24   ;;  %v4625_v2 = vld [vmem:[%s6083_s1] sm:$0xff]  }
 0x264   : > { %4386 = vmatpush3.bf16.msra.mxu1 %v2942_v35  ;;  %2207 = vperm.xlu0 %4492, %v599_v13  }
 0x265   : > { %v2842_v15 = vpop.permute.xlu1 %2841  ;;  %4387 = vmatprep.subr.bf16.mxu1 %v4652_v0 }
 0x266   : > { %v2840_v19 = vpop.permute.xlu0 %2839 }
 0x267   : > { %v2854_v43 = vsel %vm448_vm3, %v2840_v19, %v2842_v15  ;;  %2602 = vperm.xlu1 %4493, %v598_v24  }
 0x268   : > { %4372 = vmatpush3.bf16.msra.mxu0 %v2854_v43  ;;  %2607 = vperm.xlu0 %4492, %v599_v13  }
 0x269   : > { %v2931_v16 = vpop.permute.xlu1 %2930  ;;  %4373 = vmatprep.subr.bf16.mxu0 %v4652_v0 }
 0x26a   : > { %v2929_v17 = vpop.permute.xlu0 %2928 }
 0x26b   : > { %v2943_v44 = vsel %vm539_vm4, %v2929_v17, %v2931_v16  ;;  %3002 = vperm.xlu1 %4493, %v598_v24  }
 0x26c   : > { %4388 = vmatpush3.bf16.msra.mxu1 %v2943_v44  ;;  %3007 = vperm.xlu0 %4492, %v599_v13  }
 0x26d   : > { %v2846_v21 = vpop.permute.xlu1 %2845  ;;  %4389 = vmatprep.subr.bf16.mxu1 %v4652_v0 }
 0x26e   : > { %v2844_v8 = vpop.permute.xlu0 %2843 }
 0x26f   : > { %v2855_v36 = vsel %vm448_vm3, %v2844_v8, %v2846_v21  ;;  %3402 = vperm.xlu1 %4493, %v598_v24  }
 0x270   : > { %4374 = vmatpush3.bf16.msra.mxu0 %v2855_v36  ;;  %3407 = vperm.xlu0 %4492, %v599_v13  }
 0x271   : > { %v2935_v45 = vpop.permute.xlu1 %2934  ;;  %4375 = vmatprep.subr.bf16.mxu0 %v4652_v0 }
 0x272   : > { %v2933_v38 = vpop.permute.xlu0 %2932 }
 0x273   : > { %v2944_v51 = vsel %vm539_vm4, %v2933_v38, %v2935_v45 }
 0x274   : > { %4390 = vmatpush3.bf16.msra.mxu1 %v2944_v51 }
 0x275   : > { %v2850_v39 = vpop.permute.xlu1 %2849  ;;  %4391 = vmatprep.subr.bf16.mxu1 %v4652_v0 }
 0x276   : > { %v2848_v26 = vpop.permute.xlu0 %2847  ;;  %v1700_v30 = vpop.f32.mrb[28].mxu0 }
 0x277   : > { %v2856_v61 = vsel %vm448_vm3, %v2848_v26, %v2850_v39  ;;  %v1707_v10 = vadd.f32 %v1700_v30, %v5911_v22  ;;  %v4187_v3 = vpop.f32.mrb[29].mxu0 }
 0x278   : > { %4376 = vmatpush3.bf16.msra.mxu0 %v2856_v61  ;;  %v1703_v4 = vpop.f32.mrb[30].mxu0 }
 0x279   : > { %v2939_v56 = vpop.permute.xlu1 %2938  ;;  %4397 = vmatprep.subr.bf16.mxu0 %v4652_v0  ;;  %v1708_v63 = vadd.f32 %v1703_v4, %v5923_v32  ;;  %v4188_v47 = vpop.f32.mrb[31].mxu0 }
 0x27a   : > { %v2937_v27 = vpop.permute.xlu0 %2936  ;;  %v1789_v1 = vpop.f32.mrb[28].mxu1 }
 0x27b   : > { %v2945_v5 = vsel %vm539_vm4, %v2937_v27, %v2939_v56  ;;  %4378 = vmatmul.mubr.msk.bf16.vlgmr.msra.gmra.mrb[52].mxu0 %vm316_vm1, %v4622_v58  ;;  %v5964_v22 = vadd.f32 %v1789_v1, %v1707_v10  ;;  %v4203_v49 = vpop.f32.mrb[29].mxu1 }
 0x27c   : > { %4392 = vmatpush3.bf16.msra.mxu1 %v2945_v5  ;;  %4409 = vmatprep.mubr.msk.bf16.mxu0 %vm4654_vm0, %v4652_v0  ;;  %v1792_v7 = vpop.f32.mrb[30].mxu1 }
 0x27d   : > { %v3088_v18 = vpop.permute.xlu1 %3087  ;;  %4413 = vmatprep.subr.bf16.mxu1 %v4652_v0  ;;  %v5969_v12 = vadd.f32 %v1792_v7, %v1708_v63  ;;  %v4204_v13 = vpop.f32.mrb[31].mxu1 }
 0x27e   : > { %v3086_v32 = vpop.permute.xlu0 %3085 }
 0x27f   : > { %v3109_v53 = vsel %vm303_vm2, %v3086_v32, %v3088_v18  ;;  %4394 = vmatmul.mubr.msk.bf16.vlgmr.msra.gmra.mrb[52].mxu1 %vm316_vm1, %v4623_v31 }
 0x280   : > { %4398 = vmatpush3.bf16.msra.mxu0 %v3109_v53  ;;  %4414 = vmatpush3.bf16.msra.mxu1 %v5613_v54 }
 0x281   : > { %v3092_v14 = vpop.permute.xlu1 %3091  ;;  %4399 = vmatprep.subr.bf16.mxu0 %v4652_v0  ;;  %4415 = vmatprep.subr.bf16.mxu1 %v4652_v0 }
 0x282   : > { %v3090_v24 = vpop.permute.xlu0 %3089  ;;  %4425 = vmatprep.mubr.msk.bf16.mxu1 %vm4654_vm0, %v4652_v0 }
 0x283   : > { %v3110_v55 = vsel %vm303_vm2, %v3090_v24, %v3092_v14 }
 0x284   : > { %4400 = vmatpush3.bf16.msra.mxu0 %v3110_v55  ;;  %4416 = vmatpush3.bf16.msra.mxu1 %v5625_v59 }
 0x285   : > { %v3096_v25 = vpop.permute.xlu1 %3095  ;;  %4401 = vmatprep.subr.bf16.mxu0 %v4652_v0  ;;  %4417 = vmatprep.subr.bf16.mxu1 %v4652_v0 }
 0x286   : > { %v3094_v54 = vpop.permute.xlu0 %3093 }
 0x287   : > { %v3111_v28 = vsel %vm303_vm2, %v3094_v54, %v3096_v25 }
 0x288   : > { %4402 = vmatpush3.bf16.msra.mxu0 %v3111_v28  ;;  %4418 = vmatpush3.bf16.msra.mxu1 %v5761_v41 }
 0x289   : > { %v3100_v29 = vpop.permute.xlu1 %3099  ;;  %4403 = vmatprep.subr.bf16.mxu0 %v4652_v0  ;;  %4419 = vmatprep.subr.bf16.mxu1 %v4652_v0 }
 0x28a   : > { %v3098_v6 = vpop.permute.xlu0 %3097 }
 0x28b   : > { %v3112_v20 = vsel %vm303_vm2, %v3098_v6, %v3100_v29  ;;  %v4626_v29 = vld [vmem:[%s6083_s1 + $0x10] sm:$0xff]  }
 0x28c   : > { %4404 = vmatpush3.bf16.msra.mxu0 %v3112_v20  ;;  %4420 = vmatpush3.bf16.msra.mxu1 %v5777_v46 }
 0x28d   : > { %v3104_v59 = vpop.permute.xlu1 %3103  ;;  %4405 = vmatprep.subr.bf16.mxu0 %v4652_v0  ;;  %4421 = vmatprep.subr.bf16.mxu1 %v4652_v0 }
 0x28e   : > { %v3102_v33 = vpop.permute.xlu0 %3101 }
 0x28f   : > { %v3113_v34 = vsel %vm303_vm2, %v3102_v33, %v3104_v59 }
 0x290   : > { %4406 = vmatpush3.bf16.msra.mxu0 %v3113_v34  ;;  %4422 = vmatpush3.bf16.msra.mxu1 %v5789_v50 }
 0x291   : > { %v3108_v41 = vpop.permute.xlu1 %3107  ;;  %4407 = vmatprep.subr.bf16.mxu0 %v4652_v0  ;;  %4423 = vmatprep.subr.bf16.mxu1 %v4652_v0 }
 0x292   : > { %v3106_v9 = vpop.permute.xlu0 %3105  ;;  %v1958_v57 = vpop.f32.mrb[32].mxu0 }
 0x293   : > { %v3114_v46 = vsel %vm303_vm2, %v3106_v9, %v3108_v41  ;;  %v4219_v23 = vpop.f32.mrb[33].mxu0 }
 0x294   : > { %4408 = vmatpush3.bf16.msra.mxu0 %v3114_v46  ;;  %4424 = vmatpush3.bf16.msra.mxu1 %v5801_v62  ;;  %v1961_v50 = vpop.f32.mrb[34].mxu0  ;;  %v2013_v35 = vpop.f32.mrb[32].mxu1  ;;  %v4627_v46 = vld [vmem:[%s6083_s1 + $0x18] sm:$0xff]  }
 0x295   : > { %v3230_v15 = vpop.permute.xlu1 %3229  ;;  %4429 = vmatprep.subr.bf16.mxu0 %v4652_v0  ;;  %4445 = vmatprep.subr.bf16.mxu1 %v4652_v0  ;;  %v6004_v19 = vadd.f32 %v2013_v35, %v1958_v57  ;;  %v4220_v43 = vpop.f32.mrb[35].mxu0 }
 0x296   : > { %v3228_v16 = vpop.permute.xlu0 %3227  ;;  %v4235_v17 = vpop.f32.mrb[33].mxu1 }
 0x297   : > { %v3251_v44 = vsel %vm448_vm3, %v3228_v16, %v3230_v15  ;;  %4410 = vmatmul.mubr.msk.bf16.vlgmr.msra.gmra.mrb[56].mxu0 %vm316_vm1, %v4624_v37  ;;  %4426 = vmatmul.mubr.msk.bf16.vlgmr.msra.gmra.mrb[56].mxu1 %vm316_vm1, %v4625_v2  ;;  %v2016_v21 = vpop.f32.mrb[34].mxu1 }
 0x298   : > { %4430 = vmatpush3.bf16.msra.mxu0 %v3251_v44  ;;  %4441 = vmatprep.mubr.msk.bf16.mxu0 %vm4654_vm0, %v4652_v0  ;;  %v2017_v62 = vadd.f32 %v2016_v21, %v1961_v50  ;;  %v4236_v8 = vpop.f32.mrb[35].mxu1 }
 0x299   : > { %v3319_v36 = vpop.permute.xlu1 %3318  ;;  %4431 = vmatprep.subr.bf16.mxu0 %v4652_v0  ;;  %4457 = vmatprep.mubr.msk.bf16.mxu1 %vm4654_vm0, %v4652_v0 }
 0x29a   : > { %v3317_v45 = vpop.permute.xlu0 %3316 }
 0x29b   : > { %v3340_v38 = vsel %vm539_vm4, %v3317_v45, %v3319_v36 }
 0x29c   : > { %4446 = vmatpush3.bf16.msra.mxu1 %v3340_v38 }
 0x29d   : > { %v3234_v51 = vpop.permute.xlu1 %3233  ;;  %4447 = vmatprep.subr.bf16.mxu1 %v4652_v0 }
 0x29e   : > { %v3232_v39 = vpop.permute.xlu0 %3231 }
 0x29f   : > { %v3252_v26 = vsel %vm448_vm3, %v3232_v39, %v3234_v51 }
 0x2a0   : > { %4432 = vmatpush3.bf16.msra.mxu0 %v3252_v26 }
 0x2a1   : > { %v3323_v30 = vpop.permute.xlu1 %3322  ;;  %4433 = vmatprep.subr.bf16.mxu0 %v4652_v0 }
 0x2a2   : > { %v3321_v61 = vpop.permute.xlu0 %3320 }
 0x2a3   : > { %v3341_v58 = vsel %vm539_vm4, %v3321_v61, %v3323_v30 }
 0x2a4   : > { %4448 = vmatpush3.bf16.msra.mxu1 %v3341_v58 }
 0x2a5   : > { %v3238_v10 = vpop.permute.xlu1 %3237  ;;  %4449 = vmatprep.subr.bf16.mxu1 %v4652_v0 }
 0x2a6   : > { %v3236_v3 = vpop.permute.xlu0 %3235 }
 0x2a7   : > { %v3253_v4 = vsel %vm448_vm3, %v3236_v3, %v3238_v10 }
 0x2a8   : > { %4434 = vmatpush3.bf16.msra.mxu0 %v3253_v4 }
 0x2a9   : > { %v3327_v56 = vpop.permute.xlu1 %3326  ;;  %4435 = vmatprep.subr.bf16.mxu0 %v4652_v0 }
 0x2aa   : > { %v3325_v63 = vpop.permute.xlu0 %3324 }
 0x2ab   : > { %v3342_v47 = vsel %vm539_vm4, %v3325_v63, %v3327_v56 }
 0x2ac   : > { %4450 = vmatpush3.bf16.msra.mxu1 %v3342_v47 }
 0x2ad   : > { %v3242_v27 = vpop.permute.xlu1 %3241  ;;  %4451 = vmatprep.subr.bf16.mxu1 %v4652_v0 }
 0x2ae   : > { %v3240_v1 = vpop.permute.xlu0 %3239 }
 0x2af   : > { %v3254_v5 = vsel %vm448_vm3, %v3240_v1, %v3242_v27 }
 0x2b0   : > { %4436 = vmatpush3.bf16.msra.mxu0 %v3254_v5 }
 0x2b1   : > { %v3331_v31 = vpop.permute.xlu1 %3330  ;;  %4437 = vmatprep.subr.bf16.mxu0 %v4652_v0 }
 0x2b2   : > { %v3329_v49 = vpop.permute.xlu0 %3328 }
 0x2b3   : > { %v3343_v7 = vsel %vm539_vm4, %v3329_v49, %v3331_v31 }
 0x2b4   : > { %4452 = vmatpush3.bf16.msra.mxu1 %v3343_v7 }
 0x2b5   : > { %v3246_v18 = vpop.permute.xlu1 %3245  ;;  %4453 = vmatprep.subr.bf16.mxu1 %v4652_v0 }
 0x2b6   : > { %v3244_v13 = vpop.permute.xlu0 %3243 }
 0x2b7   : > { %v3255_v32 = vsel %vm448_vm3, %v3244_v13, %v3246_v18 }
 0x2b8   : > { %4438 = vmatpush3.bf16.msra.mxu0 %v3255_v32 }
 0x2b9   : > { %v3335_v53 = vpop.permute.xlu1 %3334  ;;  %4439 = vmatprep.subr.bf16.mxu0 %v4652_v0 }
 0x2ba   : > { %v3333_v14 = vpop.permute.xlu0 %3332 }
 0x2bb   : > { %v3344_v24 = vsel %vm539_vm4, %v3333_v14, %v3335_v53 }
 0x2bc   : > { %4454 = vmatpush3.bf16.msra.mxu1 %v3344_v24 }
 0x2bd   : > { %v3250_v55 = vpop.permute.xlu1 %3249  ;;  %4455 = vmatprep.subr.bf16.mxu1 %v4652_v0 }
 0x2be   : > { %v3248_v25 = vpop.permute.xlu0 %3247  ;;  %v2100_v54 = vpop.f32.mrb[36].mxu0 }
 0x2bf   : > { %v3256_v28 = vsel %vm448_vm3, %v3248_v25, %v3250_v55  ;;  %v2107_v6 = vadd.f32 %v2100_v54, %v6004_v19  ;;  %v4251_v20 = vpop.f32.mrb[37].mxu0 }
 0x2c0   : > { %4440 = vmatpush3.bf16.msra.mxu0 %v3256_v28  ;;  %v2103_v59 = vpop.f32.mrb[38].mxu0 }
 0x2c1   : > { %v3339_v33 = vpop.permute.xlu1 %3338  ;;  %v2108_v34 = vadd.f32 %v2103_v59, %v2017_v62  ;;  %v4252_v41 = vpop.f32.mrb[39].mxu0 }
 0x2c2   : > { %v3337_v9 = vpop.permute.xlu0 %3336  ;;  %v2189_v57 = vpop.f32.mrb[36].mxu1 }
 0x2c3   : > { %v3345_v0 = vsel %vm539_vm4, %v3337_v9, %v3339_v33  ;;  %4442 = vmatmul.mubr.msk.bf16.vlgmr.msra.gmra.mrb[60].mxu0 %vm316_vm1, %v4626_v29  ;;  %v2196_v37 = vadd.f32 %v2189_v57, %v2107_v6  ;;  %v4267_v2 = vpop.f32.mrb[37].mxu1 }
 0x2c4   : > { %4456 = vmatpush3.bf16.msra.mxu1 %v3345_v0  ;;  %v2192_v23 = vpop.f32.mrb[38].mxu1 }
 0x2c5   : > { %v2197_v50 = vadd.f32 %v2192_v23, %v2108_v34  ;;  %v4268_v35 = vpop.f32.mrb[39].mxu1 }
 0x2c7   : > { %4458 = vmatmul.mubr.msk.bf16.vlgmr.msra.gmra.mrb[60].mxu1 %vm316_vm1, %v4627_v46 }
 0x2d2   : > { %v608_v15 = vpop.permute.xlu1 %607 }
 0x2d3   : > { %v611_v19 = vadd.f32 %v608_v15, %v5541_v11  ;;  %v603_v43 = vpop.permute.xlu0 %602 }
 0x2d4   : > { %v610_v16 = vadd.f32 %v603_v43, %v5535_v60 }
 0x2d5   : > { %v613_v17 = vmax.f32 %v611_v19, 0.0 }
 0x2d6   : > { %v612_v44 = vmax.f32 %v610_v16, 0.0  ;;  %v1003_v21 = vpop.permute.xlu1 %1002 }
 0x2d7   : > { %615 = vst [vmem:[%s6048_s4 + $0x40] sm:$0xff] %v613_v17  ;;  %v1010_v62 = vadd.f32 %v1003_v21, %v5668_v48  ;;  %v1008_v8 = vpop.permute.xlu0 %1007 }
 0x2d8   : > { %614 = vst [vmem:[%s6048_s4] sm:$0xff] %v612_v44  ;;  %v1011_v11 = vadd.f32 %v1008_v8, %v5675_v52 }
 0x2d9   : > { %v1012_v36 = vmax.f32 %v1010_v62, 0.0 }
 0x2da   : > { %v1013_v45 = vmax.f32 %v1011_v11, 0.0  ;;  %v1403_v38 = vpop.permute.xlu1 %1402  ;;  %v2358_v51 = vpop.f32.mrb[40].mxu0 }
 0x2db   : > { %1014 = vst [vmem:[%s6048_s4 + $0x8] sm:$0xff] %v1012_v36  ;;  %v1410_v39 = vadd.f32 %v1403_v38, %v5846_v40  ;;  %v1408_v60 = vpop.permute.xlu0 %1407  ;;  %v4283_v26 = vpop.f32.mrb[41].mxu0 }
 0x2dc   : > { %1015 = vst [vmem:[%s6048_s4 + $0x48] sm:$0xff] %v1013_v45  ;;  %v1411_v30 = vadd.f32 %v1408_v60, %v5853_v42  ;;  %v2361_v61 = vpop.f32.mrb[42].mxu0  ;;  %v2413_v48 = vpop.f32.mrb[40].mxu1 }
 0x2dd   : > { %v1412_v58 = vmax.f32 %v1410_v39, 0.0  ;;  %v2414_v10 = vadd.f32 %v2413_v48, %v2358_v51  ;;  %v4284_v52 = vpop.f32.mrb[43].mxu0  ;;  %v4299_v3 = vpop.f32.mrb[41].mxu1 }
 0x2de   : > { %v1413_v4 = vmax.f32 %v1411_v30, 0.0  ;;  %v1803_v56 = vpop.permute.xlu1 %1802  ;;  %v2416_v63 = vpop.f32.mrb[42].mxu1 }
 0x2df   : > { %1414 = vst [vmem:[%s6048_s4 + $0x10] sm:$0xff] %v1412_v58  ;;  %v1810_v40 = vadd.f32 %v1803_v56, %v5964_v22  ;;  %v1808_v47 = vpop.permute.xlu0 %1807  ;;  %v2417_v27 = vadd.f32 %v2416_v63, %v2361_v61  ;;  %v4300_v1 = vpop.f32.mrb[43].mxu1 }
 0x2e0   : > { %1415 = vst [vmem:[%s6048_s4 + $0x50] sm:$0xff] %v1413_v4  ;;  %v1811_v42 = vadd.f32 %v1808_v47, %v5969_v12 }
 0x2e1   : > { %v1812_v5 = vmax.f32 %v1810_v40, 0.0 }
 0x2e2   : > { %v1813_v31 = vmax.f32 %v1811_v42, 0.0  ;;  %v2203_v49 = vpop.permute.xlu1 %2202 }
 0x2e3   : > { %1814 = vst [vmem:[%s6048_s4 + $0x18] sm:$0xff] %v1812_v5  ;;  %v2210_v7 = vadd.f32 %v2203_v49, %v2196_v37  ;;  %v2208_v18 = vpop.permute.xlu0 %2207 }
 0x2e4   : > { %1815 = vst [vmem:[%s6048_s4 + $0x58] sm:$0xff] %v1813_v31  ;;  %v2211_v13 = vadd.f32 %v2208_v18, %v2197_v50 }
 0x2e5   : > { %v2212_v32 = vmax.f32 %v2210_v7, 0.0 }
 0x2e6   : > { %v2213_v53 = vmax.f32 %v2211_v13, 0.0  ;;  %v2603_v28 = vpop.permute.xlu1 %2602 }
 0x2e7   : > { %2214 = vst [vmem:[%s6048_s4 + $0x20] sm:$0xff] %v2212_v32  ;;  %v2608_v59 = vpop.permute.xlu0 %2607 }
 0x2e8   : > { %2215 = vst [vmem:[%s6048_s4 + $0x60] sm:$0xff] %v2213_v53 }
 0x2ea   : > { %v3003_v45 = vpop.permute.xlu1 %3002 }
 0x2eb   : > { %v3008_v60 = vpop.permute.xlu0 %3007 }
 0x306   : > { %v2500_v22 = vpop.f32.mrb[44].mxu0 }
 0x307   : > { %v2507_v14 = vadd.f32 %v2500_v22, %v2414_v10  ;;  %v4315_v24 = vpop.f32.mrb[45].mxu0 }
 0x308   : > { %v2503_v55 = vpop.f32.mrb[46].mxu0 }
 0x309   : > { %v2508_v25 = vadd.f32 %v2503_v55, %v2417_v27  ;;  %v4316_v12 = vpop.f32.mrb[47].mxu0 }
 0x30a   : > { %v2589_v54 = vpop.f32.mrb[44].mxu1 }
 0x30b   : > { %v2596_v29 = vadd.f32 %v2589_v54, %v2507_v14  ;;  %v4331_v6 = vpop.f32.mrb[45].mxu1  ;;  %v3403_v14 = vpop.permute.xlu1 %3402 }
 0x30c   : > { %v2592_v20 = vpop.f32.mrb[46].mxu1  ;;  %v3408_v54 = vpop.permute.xlu0 %3407 }
 0x30d   : > { %v2597_v33 = vadd.f32 %v2592_v20, %v2508_v25  ;;  %v2610_v34 = vadd.f32 %v2603_v28, %v2596_v29  ;;  %v4332_v41 = vpop.f32.mrb[47].mxu1 }
 0x30f   : > { %v2612_v9 = vmax.f32 %v2610_v34, 0.0  ;;  %v2611_v57 = vadd.f32 %v2608_v59, %v2597_v33 }
 0x311   : > { %2614 = vst [vmem:[%s6048_s4 + $0x28] sm:$0xff] %v2612_v9  ;;  %v2613_v0 = vmax.f32 %v2611_v57, 0.0 }
 0x313   : > { %2615 = vst [vmem:[%s6048_s4 + $0x68] sm:$0xff] %v2613_v0 }
 0x322   : > { %v2758_v46 = vpop.f32.mrb[48].mxu0 }
 0x323   : > { %v4347_v37 = vpop.f32.mrb[49].mxu0 }
 0x324   : > { %v2761_v2 = vpop.f32.mrb[50].mxu0  ;;  %v2813_v23 = vpop.f32.mrb[48].mxu1 }
 0x325   : > { %v2814_v50 = vadd.f32 %v2813_v23, %v2758_v46  ;;  %v4348_v35 = vpop.f32.mrb[51].mxu0  ;;  %v4363_v15 = vpop.f32.mrb[49].mxu1 }
 0x326   : > { %v2816_v19 = vpop.f32.mrb[50].mxu1 }
 0x327   : > { %v2817_v43 = vadd.f32 %v2816_v19, %v2761_v2  ;;  %v4364_v16 = vpop.f32.mrb[51].mxu1 }
 0x34e   : > { %v2900_v17 = vpop.f32.mrb[52].mxu0 }
 0x34f   : > { %v2907_v44 = vadd.f32 %v2900_v17, %v2814_v50  ;;  %v4379_v21 = vpop.f32.mrb[53].mxu0 }
 0x350   : > { %v2903_v62 = vpop.f32.mrb[54].mxu0 }
 0x351   : > { %v2908_v8 = vadd.f32 %v2903_v62, %v2817_v43  ;;  %v4380_v11 = vpop.f32.mrb[55].mxu0 }
 0x352   : > { %v2989_v36 = vpop.f32.mrb[52].mxu1 }
 0x353   : > { %v2996_v38 = vadd.f32 %v2989_v36, %v2907_v44  ;;  %v4395_v51 = vpop.f32.mrb[53].mxu1 }
 0x354   : > { %v2992_v39 = vpop.f32.mrb[54].mxu1 }
 0x355   : > { %v2997_v26 = vadd.f32 %v2992_v39, %v2908_v8  ;;  %v3010_v30 = vadd.f32 %v3003_v45, %v2996_v38  ;;  %v4396_v61 = vpop.f32.mrb[55].mxu1 }
 0x357   : > { %v3012_v48 = vmax.f32 %v3010_v30, 0.0  ;;  %v3011_v58 = vadd.f32 %v3008_v60, %v2997_v26 }
 0x359   : > { %3014 = vst [vmem:[%s6048_s4 + $0x30] sm:$0xff] %v3012_v48  ;;  %v3013_v10 = vmax.f32 %v3011_v58, 0.0 }
 0x35b   : > { %3015 = vst [vmem:[%s6048_s4 + $0x70] sm:$0xff] %v3013_v10 }
 0x36a   : > { %v3158_v52 = vpop.f32.mrb[56].mxu0  ;;  %v3213_v3 = vpop.f32.mrb[56].mxu1 }
 0x36b   : > { %v4411_v4 = vpop.f32.mrb[57].mxu0  ;;  %v3214_v56 = vadd.f32 %v3213_v3, %v3158_v52  ;;  %v4427_v63 = vpop.f32.mrb[57].mxu1 }
 0x36c   : > { %v3161_v40 = vpop.f32.mrb[58].mxu0  ;;  %v3216_v47 = vpop.f32.mrb[58].mxu1 }
 0x36d   : > { %v4412_v27 = vpop.f32.mrb[59].mxu0  ;;  %v3217_v1 = vadd.f32 %v3216_v47, %v3161_v40  ;;  %v4428_v42 = vpop.f32.mrb[59].mxu1 }
 0x396   : > { %v3300_v5 = vpop.f32.mrb[60].mxu0 }
 0x397   : > { %v3307_v31 = vadd.f32 %v3300_v5, %v3214_v56  ;;  %v4443_v49 = vpop.f32.mrb[61].mxu0 }
 0x398   : > { %v3303_v7 = vpop.f32.mrb[62].mxu0 }
 0x399   : > { %v3308_v18 = vadd.f32 %v3303_v7, %v3217_v1  ;;  %v4444_v13 = vpop.f32.mrb[63].mxu0 }
 0x39a   : > { %v3389_v32 = vpop.f32.mrb[60].mxu1 }
 0x39b   : > { %v3396_v53 = vadd.f32 %v3389_v32, %v3307_v31  ;;  %v4459_v22 = vpop.f32.mrb[61].mxu1 }
 0x39c   : > { %v3392_v24 = vpop.f32.mrb[62].mxu1 }
 0x39d   : > { %v3410_v55 = vadd.f32 %v3403_v14, %v3396_v53  ;;  %v3397_v25 = vadd.f32 %v3392_v24, %v3308_v18  ;;  %v4460_v12 = vpop.f32.mrb[63].mxu1 }
 0x39f   : > { %v3412_v28 = vmax.f32 %v3410_v55, 0.0  ;;  %v3411_v29 = vadd.f32 %v3408_v54, %v3397_v25 }
 0x3a1   : > { %3414 = vst [vmem:[%s6048_s4 + $0x38] sm:$0xff] %v3412_v28  ;;  %v3413_v6 = vmax.f32 %v3411_v29, 0.0 }
 0x3a3   : > { %3415 = vst [vmem:[%s6048_s4 + $0x78] sm:$0xff] %v3413_v6 }
 0x3a4 PF: > { %s13_s14 = sadd.s32 1, %s4650_s14   ;;  %s6086_s12 = smov %s4646_s13 }
 0x3a5   : > { %p10_p5 = scmp.ge.s32.totalorder %s13_s14, 4   ;;  %s6087_s13 = smov %s6089_s15 }
 0x3a7   :  { %12 = sbr.rel (!%p10_p5) target bundleno = 2 (0x2), region = 65 }

</bundles_post_ra>
